<compile_context>
chip_gen: v7x
topology: tpu7x:2x2x1
jax: 0.10.0
libtpu: 0.0.40
codegen_flags: <defaults>
</compile_context>

<pallas_src>
import functools

import jax
import jax.numpy as jnp
from jax.experimental import pallas as pl
from jax.experimental.pallas import tpu as pltpu

_VMEM_LIMIT = 32 * 1024 * 1024


# ----------------------------------------------------------------------------
# helpers
# ----------------------------------------------------------------------------
def _round_up(v, m):
    return ((v + m - 1) // m) * m


def _apply_act(x, act):
    if act == "leaky":                       # F.leaky_relu default slope 0.01
        return jnp.where(x >= 0, x, 0.01 * x)
    if act == "relu":
        return jnp.maximum(x, 0.0)
    return x


# ----------------------------------------------------------------------------
# ShareSepConv: shared-weight depthwise conv (stride 1, pad (k-1)//2)
# ----------------------------------------------------------------------------
def _sharesep_kernel(w_ref, x_ref, o_ref, *, k, h, w):
    # w_ref: (k*k,) f32 in SMEM; x_ref: (h+2p, w+2p, C) VMEM; o_ref: (h, w, C)
    xt = x_ref[...]
    acc = xt[0:h, 0:w, :] * w_ref[0]
    for t in range(1, k * k):
        ky, kx = t // k, t % k
        acc = acc + xt[ky:ky + h, kx:kx + w, :] * w_ref[t]
    o_ref[...] = acc


def sharesep_conv(x, w_shared, kernel_size):
    """x: NHWC f32, w_shared: (1,1,k,k) shared across all channels."""
    n, h, w, c = x.shape
    p = (kernel_size - 1) // 2
    xp = jnp.pad(x, ((0, 0), (p, p), (p, p), (0, 0)))
    w_flat = w_shared.reshape(kernel_size * kernel_size).astype(jnp.float32)
    return pl.pallas_call(
        functools.partial(_sharesep_kernel, k=kernel_size, h=h, w=w),
        out_shape=jax.ShapeDtypeStruct((n, h, w, c), jnp.float32),
        grid=(n,),
        in_specs=[
            pl.BlockSpec(memory_space=pltpu.MemorySpace.SMEM),       # weights
            pl.BlockSpec((None, h + 2 * p, w + 2 * p, c),
                         lambda i: (i, 0, 0, 0)),                    # padded img
        ],
        out_specs=pl.BlockSpec((None, h, w, c), lambda i: (i, 0, 0, 0)),
        compiler_params=pltpu.CompilerParams(
            dimension_semantics=("parallel",),
            vmem_limit_bytes=_VMEM_LIMIT),
    )(w_flat, xp)


# ----------------------------------------------------------------------------
# MXU matmul (bf16 inputs, f32 accumulation, adaptive M/N tiling)
# ----------------------------------------------------------------------------
def _matmul_kernel(a_ref, b_ref, o_ref):
    o_ref[...] = jnp.dot(a_ref[...], b_ref[...],
                         preferred_element_type=jnp.float32)


def matmul_mxu(a, b):
    """(M, K) @ (K, N) -> f32 (M, N)."""
    m, k = a.shape
    n = b.shape[1]
    # adaptive row tile: never inflate a small M up to 128
    if m > 128:
        tm = 128
        mp = _round_up(m, tm)
    else:
        tm = mp = _round_up(max(m, 8), 8)
    if mp != m:
        a = jnp.pad(a, ((0, mp - m), (0, 0)))
    # lane-dense Cout tile: 256-wide matches v6e/v7x MXU, 128 otherwise
    if n % 256 == 0:
        tn = 256
    elif n % 128 == 0:
        tn = 128
    else:
        tn = n                     # small / odd Cout: one full-width block
    out = pl.pallas_call(
        _matmul_kernel,
        out_shape=jax.ShapeDtypeStruct((mp, n), jnp.float32),
        grid=(mp // tm, n // tn),
        in_specs=[pl.BlockSpec((tm, k), lambda i, j: (i, 0)),
                  pl.BlockSpec((k, tn), lambda i, j: (0, j))],
        out_specs=pl.BlockSpec((tm, tn), lambda i, j: (i, j)),
        compiler_params=pltpu.CompilerParams(
            dimension_semantics=("parallel", "parallel"),
            vmem_limit_bytes=_VMEM_LIMIT),
    )(a, b)
    return out[:m]


# ----------------------------------------------------------------------------
# conv1 glue: im2col in plain JAX, contraction on the MXU
# ----------------------------------------------------------------------------
def _extract_taps(x, k, stride, padding, dilation):
    n, h, w, c = x.shape
    ho = (h + 2 * padding - dilation * (k - 1) - 1) // stride + 1
    wo = (w + 2 * padding - dilation * (k - 1) - 1) // stride + 1
    xp = jnp.pad(x, ((0, 0), (padding, padding), (padding, padding), (0, 0)))
    taps = []
    for ky in range(k):
        for kx in range(k):
            sl = xp[:,
                    ky * dilation: ky * dilation + stride * (ho - 1) + 1: stride,
                    kx * dilation: kx * dilation + stride * (wo - 1) + 1: stride,
                    :]
            taps.append(sl)
    return taps, ho, wo


def conv2d_nhwc(x, w, *, stride, padding, dilation):
    """x: NHWC, w: PyTorch (Cout, Cin, K, K); bias-free (conv1 has bias=False)."""
    n = x.shape[0]
    cout, cin, k, _ = w.shape
    taps, ho, wo = _extract_taps(x, k, stride, padding, dilation)
    patches = jnp.concatenate(taps, axis=-1).reshape(n * ho * wo, k * k * cin)
    w2 = jnp.transpose(w, (2, 3, 1, 0)).reshape(k * k * cin, cout)
    out = matmul_mxu(patches.astype(jnp.bfloat16), w2.astype(jnp.bfloat16))
    return out.reshape(n, ho, wo, cout)


# ----------------------------------------------------------------------------
# InstanceNorm2d(affine=True) + activation, fused
# ----------------------------------------------------------------------------
def _inorm_kernel(x_ref, g_ref, b_ref, o_ref, *, act, eps):
    x = x_ref[0]                                             # (HW, C)
    mean = jnp.mean(x, axis=0, keepdims=True)
    var = jnp.mean((x - mean) ** 2, axis=0, keepdims=True)   # biased, like torch
    y = (x - mean) * jax.lax.rsqrt(var + eps)
    y = y * g_ref[...] + b_ref[...]
    o_ref[0] = _apply_act(y, act)


def instance_norm_act(x, gamma, beta, act, eps=1e-5):
    n, h, w, c = x.shape
    xr = x.reshape(n, h * w, c)
    out = pl.pallas_call(
        functools.partial(_inorm_kernel, act=act, eps=eps),
        out_shape=jax.ShapeDtypeStruct((n, h * w, c), jnp.float32),
        grid=(n,),
        in_specs=[pl.BlockSpec((1, h * w, c), lambda i: (i, 0, 0)),
                  pl.BlockSpec((1, c), lambda i: (0, 0)),
                  pl.BlockSpec((1, c), lambda i: (0, 0))],
        out_specs=pl.BlockSpec((1, h * w, c), lambda i: (i, 0, 0)),
        compiler_params=pltpu.CompilerParams(
            dimension_semantics=("parallel",),
            vmem_limit_bytes=_VMEM_LIMIT),
    )(xr, gamma.reshape(1, c), beta.reshape(1, c))
    return out.reshape(n, h, w, c)


# ----------------------------------------------------------------------------
# SmoothDilatedResidualBlock forward
# ----------------------------------------------------------------------------
def smooth_dilated_block_forward(params, x, *, block_type, kernel_size,
                                 dilated_factor, stride):
    """x: NHWC. block_type: 'E' -> leaky_relu, 'D' -> relu."""
    y = sharesep_conv(x, params["pre_w"], kernel_size)                 # pre_conv1
    y = conv2d_nhwc(y, params["conv_w"], stride=stride,                # conv1
                    padding=dilated_factor, dilation=dilated_factor)
    act = "leaky" if block_type == "E" else "relu"
    return instance_norm_act(y, params["gamma"], params["beta"], act)  # norm1+act


# ----------------------------------------------------------------------------
# deterministic parameter construction (shapes match the PyTorch __init__)
# ----------------------------------------------------------------------------
def make_params(in_c, out_c, kernel_size, key):
    k1, k2, k3, k4 = jax.random.split(key, 4)
    # ShareSepConv init = delta kernel; add tiny noise so the depthwise path is
    # genuinely exercised (not an identity shortcut).
    pre = jnp.zeros((1, 1, kernel_size, kernel_size), jnp.float32)
    pre = pre.at[0, 0, kernel_size // 2, kernel_size // 2].set(1.0)
    pre = pre + 0.05 * jax.random.normal(k1, pre.shape, jnp.float32)
    conv_w = jax.random.normal(
        k2, (out_c, in_c, kernel_size, kernel_size), jnp.float32
    ) / jnp.sqrt(float(in_c * kernel_size * kernel_size))
    gamma = 1.0 + 0.1 * jax.random.normal(k3, (out_c,), jnp.float32)
    beta = 0.1 * jax.random.normal(k4, (out_c,), jnp.float32)
    return {"pre_w": pre, "conv_w": conv_w, "gamma": gamma, "beta": beta}


# ----------------------------------------------------------------------------
# plain-XLA reference (for numerical validation only)
# ----------------------------------------------------------------------------
def reference_forward(params, x_nhwc, block_type, kernel_size, dil, stride):
    c = x_nhwc.shape[-1]
    p = (kernel_size - 1) // 2
    x = jnp.transpose(x_nhwc, (0, 3, 1, 2))
    w_pre = jnp.broadcast_to(params["pre_w"], (c, 1, kernel_size, kernel_size))
    y = jax.lax.conv_general_dilated(
        x, w_pre, window_strides=(1, 1), padding=[(p, p), (p, p)],
        dimension_numbers=("NCHW", "OIHW", "NCHW"), feature_group_count=c)
    y = jax.lax.conv_general_dilated(
        y, params["conv_w"], window_strides=(stride, stride),
        padding=[(dil, dil), (dil, dil)], rhs_dilation=(dil, dil),
        dimension_numbers=("NCHW", "OIHW", "NCHW"))
    mean = jnp.mean(y, axis=(2, 3), keepdims=True)
    var = jnp.mean((y - mean) ** 2, axis=(2, 3), keepdims=True)
    y = (y - mean) * jax.lax.rsqrt(var + 1e-5)
    y = y * params["gamma"].reshape(1, -1, 1, 1) + params["beta"].reshape(1, -1, 1, 1)
    y = jnp.where(y >= 0, y, 0.01 * y) if block_type == "E" else jnp.maximum(y, 0.0)
    return jnp.transpose(y, (0, 2, 3, 1))


if __name__ == "__main__":
    # Block config matching a real network instantiation:
    # SmoothDilatedResidualBlock(64, kernel_size=3, dilated_factor=2, stride=1, 128)
    IN_C, OUT_C, K, DIL, STRIDE = 64, 128, 3, 2, 1
    N, H, W = 2, 16, 16

    params = make_params(IN_C, OUT_C, K, jax.random.PRNGKey(42))
    # PyTorch-convention input (N, C, H, W); kernels use NHWC internally.
    x_nchw = jax.random.normal(jax.random.PRNGKey(0), (N, IN_C, H, W), jnp.float32)
    x = jnp.transpose(x_nchw, (0, 2, 3, 1))

    fwd_e = jax.jit(functools.partial(smooth_dilated_block_forward,
                                      block_type="E", kernel_size=K,
                                      dilated_factor=DIL, stride=STRIDE))
    fwd_d = jax.jit(functools.partial(smooth_dilated_block_forward,
                                      block_type="D", kernel_size=K,
                                      dilated_factor=DIL, stride=STRIDE))

    out_e = jax.block_until_ready(fwd_e(params, x))
    out_d = jax.block_until_ready(fwd_d(params, x))
    assert out_e.shape == (N, H, W, OUT_C), out_e.shape
    assert out_d.shape == (N, H, W, OUT_C), out_d.shape
    assert bool(jnp.all(jnp.isfinite(out_e)))
    assert bool(jnp.all(jnp.isfinite(out_d)))

    # loose tolerance: MXU inputs are bf16 (f32 accumulation)
    ref_e = reference_forward(params, x, "E", K, DIL, STRIDE)
    ref_d = reference_forward(params, x, "D", K, DIL, STRIDE)
    err = max(float(jnp.max(jnp.abs(out_e - ref_e))),
              float(jnp.max(jnp.abs(out_d - ref_d))))
    assert err < 0.1, f"max abs err vs reference: {err}"

    print("KERNEL_OK")
</pallas_src>

<mosaic_0001>
module attributes {stable_mosaic.version = 11 : i64} {
  func.func @_sharesep_kernel(%arg0: i32, %arg1: memref<9xf32, #tpu.memory_space<smem>>, %arg2: memref<1x18x18x64xf32, #tpu.memory_space<vmem>>, %arg3: memref<1x16x16x64xf32, #tpu.memory_space<vmem>>) attributes {dimension_semantics = [#tpu.dimension_semantics<parallel>], iteration_bounds = array<i64: 2>, scalar_prefetch = 0 : i64, scratch_operands = 0 : i64, tpu.core_type = #tpu.core_type<tc>, window_params = [{transform_indices = @transform_0, window_bounds = array<i64: 9>}, {transform_indices = @transform_1, window_bounds = array<i64: 1, 18, 18, 64>}, {transform_indices = @transform_2, window_bounds = array<i64: 1, 16, 16, 64>}]} {
    %c0 = arith.constant 0 : index
    %c0_0 = arith.constant 0 : index
    %c0_1 = arith.constant 0 : index
    %c0_2 = arith.constant 0 : index
    %0 = vector.load %arg2[%c0, %c0_0, %c0_1, %c0_2] : memref<1x18x18x64xf32, #tpu.memory_space<vmem>>, vector<1x18x18x64xf32>
    %1 = vector.shape_cast %0 : vector<1x18x18x64xf32> to vector<18x18x64xf32>
    %2 = vector.extract_strided_slice %1 {offsets = [0, 0, 0], sizes = [16, 16, 64], strides = [1, 1, 1]} : vector<18x18x64xf32> to vector<16x16x64xf32>
    %c0_3 = arith.constant 0 : index
    %3 = memref.load %arg1[%c0_3] : memref<9xf32, #tpu.memory_space<smem>>
    %4 = vector.broadcast %3 : f32 to vector<16x16x64xf32>
    %5 = arith.mulf %2, %4 : vector<16x16x64xf32>
    %6 = vector.extract_strided_slice %1 {offsets = [0, 1, 0], sizes = [16, 16, 64], strides = [1, 1, 1]} : vector<18x18x64xf32> to vector<16x16x64xf32>
    %c1 = arith.constant 1 : index
    %7 = memref.load %arg1[%c1] : memref<9xf32, #tpu.memory_space<smem>>
    %8 = vector.broadcast %7 : f32 to vector<16x16x64xf32>
    %9 = arith.mulf %6, %8 : vector<16x16x64xf32>
    %10 = arith.addf %5, %9 : vector<16x16x64xf32>
    %11 = vector.extract_strided_slice %1 {offsets = [0, 2, 0], sizes = [16, 16, 64], strides = [1, 1, 1]} : vector<18x18x64xf32> to vector<16x16x64xf32>
    %c2 = arith.constant 2 : index
    %12 = memref.load %arg1[%c2] : memref<9xf32, #tpu.memory_space<smem>>
    %13 = vector.broadcast %12 : f32 to vector<16x16x64xf32>
    %14 = arith.mulf %11, %13 : vector<16x16x64xf32>
    %15 = arith.addf %10, %14 : vector<16x16x64xf32>
    %16 = vector.extract_strided_slice %1 {offsets = [1, 0, 0], sizes = [16, 16, 64], strides = [1, 1, 1]} : vector<18x18x64xf32> to vector<16x16x64xf32>
    %c3 = arith.constant 3 : index
    %17 = memref.load %arg1[%c3] : memref<9xf32, #tpu.memory_space<smem>>
    %18 = vector.broadcast %17 : f32 to vector<16x16x64xf32>
    %19 = arith.mulf %16, %18 : vector<16x16x64xf32>
    %20 = arith.addf %15, %19 : vector<16x16x64xf32>
    %21 = vector.extract_strided_slice %1 {offsets = [1, 1, 0], sizes = [16, 16, 64], strides = [1, 1, 1]} : vector<18x18x64xf32> to vector<16x16x64xf32>
    %c4 = arith.constant 4 : index
    %22 = memref.load %arg1[%c4] : memref<9xf32, #tpu.memory_space<smem>>
    %23 = vector.broadcast %22 : f32 to vector<16x16x64xf32>
    %24 = arith.mulf %21, %23 : vector<16x16x64xf32>
    %25 = arith.addf %20, %24 : vector<16x16x64xf32>
    %26 = vector.extract_strided_slice %1 {offsets = [1, 2, 0], sizes = [16, 16, 64], strides = [1, 1, 1]} : vector<18x18x64xf32> to vector<16x16x64xf32>
    %c5 = arith.constant 5 : index
    %27 = memref.load %arg1[%c5] : memref<9xf32, #tpu.memory_space<smem>>
    %28 = vector.broadcast %27 : f32 to vector<16x16x64xf32>
    %29 = arith.mulf %26, %28 : vector<16x16x64xf32>
    %30 = arith.addf %25, %29 : vector<16x16x64xf32>
    %31 = vector.extract_strided_slice %1 {offsets = [2, 0, 0], sizes = [16, 16, 64], strides = [1, 1, 1]} : vector<18x18x64xf32> to vector<16x16x64xf32>
    %c6 = arith.constant 6 : index
    %32 = memref.load %arg1[%c6] : memref<9xf32, #tpu.memory_space<smem>>
    %33 = vector.broadcast %32 : f32 to vector<16x16x64xf32>
    %34 = arith.mulf %31, %33 : vector<16x16x64xf32>
    %35 = arith.addf %30, %34 : vector<16x16x64xf32>
    %36 = vector.extract_strided_slice %1 {offsets = [2, 1, 0], sizes = [16, 16, 64], strides = [1, 1, 1]} : vector<18x18x64xf32> to vector<16x16x64xf32>
    %c7 = arith.constant 7 : index
    %37 = memref.load %arg1[%c7] : memref<9xf32, #tpu.memory_space<smem>>
    %38 = vector.broadcast %37 : f32 to vector<16x16x64xf32>
    %39 = arith.mulf %36, %38 : vector<16x16x64xf32>
    %40 = arith.addf %35, %39 : vector<16x16x64xf32>
    %41 = vector.extract_strided_slice %1 {offsets = [2, 2, 0], sizes = [16, 16, 64], strides = [1, 1, 1]} : vector<18x18x64xf32> to vector<16x16x64xf32>
    %c8 = arith.constant 8 : index
    %42 = memref.load %arg1[%c8] : memref<9xf32, #tpu.memory_space<smem>>
    %43 = vector.broadcast %42 : f32 to vector<16x16x64xf32>
    %44 = arith.mulf %41, %43 : vector<16x16x64xf32>
    %45 = arith.addf %40, %44 : vector<16x16x64xf32>
    %c0_4 = arith.constant 0 : index
    %c0_5 = arith.constant 0 : index
    %c0_6 = arith.constant 0 : index
    %c0_7 = arith.constant 0 : index
    %46 = vector.load %arg3[%c0_4, %c0_5, %c0_6, %c0_7] : memref<1x16x16x64xf32, #tpu.memory_space<vmem>>, vector<1x16x16x64xf32>
    %47 = vector.shape_cast %46 : vector<1x16x16x64xf32> to vector<16x16x64xf32>
    %48 = vector.shape_cast %45 : vector<16x16x64xf32> to vector<1x16x16x64xf32>
    tpu.vector_store %arg3[%c0_4, %c0_5, %c0_6, %c0_7], %48 {strides = array<i32>} : memref<1x16x16x64xf32, #tpu.memory_space<vmem>>, vector<1x16x16x64xf32>,
    return
  }
  func.func @transform_0(%arg0: i32) -> i32 {
    %c0_i32 = arith.constant 0 : i32
    %c0_i32_0 = arith.constant 0 : i32
    return %c0_i32 : i32
  }
  func.func @transform_1(%arg0: i32) -> (i32, i32, i32, i32) {
    %c0_i32 = arith.constant 0 : i32
    %c0_i32_0 = arith.constant 0 : i32
    %c0_i32_1 = arith.constant 0 : i32
    %c0_i32_2 = arith.constant 0 : i32
    return %arg0, %c0_i32, %c0_i32_0, %c0_i32_1 : i32, i32, i32, i32
  }
  func.func @transform_2(%arg0: i32) -> (i32, i32, i32, i32) {
    %c0_i32 = arith.constant 0 : i32
    %c0_i32_0 = arith.constant 0 : i32
    %c0_i32_1 = arith.constant 0 : i32
    %c0_i32_2 = arith.constant 0 : i32
    return %arg0, %c0_i32, %c0_i32_0, %c0_i32_1 : i32, i32, i32, i32
  }
}

module attributes {stable_mosaic.version = 11 : i64} {
  func.func @_matmul_kernel(%arg0: i32, %arg1: i32, %arg2: memref<128x576xbf16, #tpu.memory_space<vmem>>, %arg3: memref<576x128xbf16, #tpu.memory_space<vmem>>, %arg4: memref<128x128xf32, #tpu.memory_space<vmem>>) attributes {dimension_semantics = [#tpu.dimension_semantics<parallel>, #tpu.dimension_semantics<parallel>], iteration_bounds = array<i64: 4, 1>, scalar_prefetch = 0 : i64, scratch_operands = 0 : i64, tpu.core_type = #tpu.core_type<tc>, window_params = [{transform_indices = @transform_0, window_bounds = array<i64: 128, 576>}, {transform_indices = @transform_1, window_bounds = array<i64: 576, 128>}, {transform_indices = @transform_2, window_bounds = array<i64: 128, 128>}]} {
    %c0 = arith.constant 0 : index
    %c0_0 = arith.constant 0 : index
    %0 = vector.load %arg2[%c0, %c0_0] : memref<128x576xbf16, #tpu.memory_space<vmem>>, vector<128x576xbf16>
    %c0_1 = arith.constant 0 : index
    %c0_2 = arith.constant 0 : index
    %1 = vector.load %arg3[%c0_1, %c0_2] : memref<576x128xbf16, #tpu.memory_space<vmem>>, vector<576x128xbf16>
    %cst = arith.constant dense<0.000000e+00> : vector<128x128xf32>
    %2 = tpu.matmul %0, %1, %cst {dimension_numbers = #tpu.dot_dimension_numbers<[1], [0], [0], [1], [0, 0, 1, 1], [], []>} : vector<128x576xbf16>, vector<576x128xbf16>, vector<128x128xf32> -> vector<128x128xf32>
    %c0_3 = arith.constant 0 : index
    %c0_4 = arith.constant 0 : index
    %3 = vector.load %arg4[%c0_3, %c0_4] : memref<128x128xf32, #tpu.memory_space<vmem>>, vector<128x128xf32>
    tpu.vector_store %arg4[%c0_3, %c0_4], %2 {strides = array<i32>} : memref<128x128xf32, #tpu.memory_space<vmem>>, vector<128x128xf32>,
    return
  }
  func.func @transform_0(%arg0: i32, %arg1: i32) -> (i32, i32) {
    %c0_i32 = arith.constant 0 : i32
    %c0_i32_0 = arith.constant 0 : i32
    return %arg0, %c0_i32 : i32, i32
  }
  func.func @transform_1(%arg0: i32, %arg1: i32) -> (i32, i32) {
    %c0_i32 = arith.constant 0 : i32
    %c0_i32_0 = arith.constant 0 : i32
    return %c0_i32, %arg1 : i32, i32
  }
  func.func @transform_2(%arg0: i32, %arg1: i32) -> (i32, i32) {
    %c0_i32 = arith.constant 0 : i32
    return %arg0, %arg1 : i32, i32
  }
}

module attributes {stable_mosaic.version = 11 : i64} {
  func.func @_inorm_kernel(%arg0: i32, %arg1: memref<1x256x128xf32, #tpu.memory_space<vmem>>, %arg2: memref<1x128xf32, #tpu.memory_space<vmem>>, %arg3: memref<1x128xf32, #tpu.memory_space<vmem>>, %arg4: memref<1x256x128xf32, #tpu.memory_space<vmem>>) attributes {dimension_semantics = [#tpu.dimension_semantics<parallel>], iteration_bounds = array<i64: 2>, scalar_prefetch = 0 : i64, scratch_operands = 0 : i64, tpu.core_type = #tpu.core_type<tc>, window_params = [{transform_indices = @transform_0, window_bounds = array<i64: 1, 256, 128>}, {pipeline_mode = #tpu.pipeline_mode<synchronous>, transform_indices = @transform_1, window_bounds = array<i64: 1, 128>}, {pipeline_mode = #tpu.pipeline_mode<synchronous>, transform_indices = @transform_2, window_bounds = array<i64: 1, 128>}, {transform_indices = @transform_3, window_bounds = array<i64: 1, 256, 128>}]} {
    %c0 = arith.constant 0 : index
    %c0_0 = arith.constant 0 : index
    %c0_1 = arith.constant 0 : index
    %0 = vector.load %arg1[%c0, %c0_0, %c0_1] : memref<1x256x128xf32, #tpu.memory_space<vmem>>, vector<1x256x128xf32>
    %1 = vector.shape_cast %0 : vector<1x256x128xf32> to vector<256x128xf32>
    %cst = arith.constant dense<0.000000e+00> : vector<128xf32>
    %2 = vector.multi_reduction <add>, %1, %cst [0] : vector<256x128xf32> to vector<128xf32>
    %3 = vector.shape_cast %2 : vector<128xf32> to vector<1x128xf32>
    %cst_2 = arith.constant 2.560000e+02 : f32
    %4 = vector.broadcast %cst_2 : f32 to vector<1x128xf32>
    %5 = arith.divf %3, %4 : vector<1x128xf32>
    %6 = vector.broadcast %5 : vector<1x128xf32> to vector<256x128xf32>
    %7 = arith.subf %1, %6 : vector<256x128xf32>
    %8 = arith.mulf %7, %7 : vector<256x128xf32>
    %cst_3 = arith.constant dense<0.000000e+00> : vector<128xf32>
    %9 = vector.multi_reduction <add>, %8, %cst_3 [0] : vector<256x128xf32> to vector<128xf32>
    %10 = vector.shape_cast %9 : vector<128xf32> to vector<1x128xf32>
    %cst_4 = arith.constant 2.560000e+02 : f32
    %11 = vector.broadcast %cst_4 : f32 to vector<1x128xf32>
    %12 = arith.divf %10, %11 : vector<1x128xf32>
    %13 = vector.broadcast %5 : vector<1x128xf32> to vector<256x128xf32>
    %14 = arith.subf %1, %13 : vector<256x128xf32>
    %cst_5 = arith.constant 9.99999974E-6 : f32
    %15 = vector.broadcast %cst_5 : f32 to vector<1x128xf32>
    %16 = arith.addf %12, %15 : vector<1x128xf32>
    %17 = math.rsqrt %16 : vector<1x128xf32>
    %18 = vector.broadcast %17 : vector<1x128xf32> to vector<256x128xf32>
    %19 = arith.mulf %14, %18 : vector<256x128xf32>
    %c0_6 = arith.constant 0 : index
    %c0_7 = arith.constant 0 : index
    %20 = vector.load %arg2[%c0_6, %c0_7] : memref<1x128xf32, #tpu.memory_space<vmem>>, vector<1x128xf32>
    %21 = vector.broadcast %20 : vector<1x128xf32> to vector<256x128xf32>
    %22 = arith.mulf %19, %21 : vector<256x128xf32>
    %c0_8 = arith.constant 0 : index
    %c0_9 = arith.constant 0 : index
    %23 = vector.load %arg3[%c0_8, %c0_9] : memref<1x128xf32, #tpu.memory_space<vmem>>, vector<1x128xf32>
    %24 = vector.broadcast %23 : vector<1x128xf32> to vector<256x128xf32>
    %25 = arith.addf %22, %24 : vector<256x128xf32>
    %cst_10 = arith.constant 0.000000e+00 : f32
    %26 = vector.broadcast %cst_10 : f32 to vector<256x128xf32>
    %27 = arith.cmpf oge, %25, %26 : vector<256x128xf32>
    %cst_11 = arith.constant 0.00999999977 : f32
    %28 = vector.broadcast %cst_11 : f32 to vector<256x128xf32>
    %29 = arith.mulf %28, %25 : vector<256x128xf32>
    %30 = arith.select %27, %25, %29 : vector<256x128xi1>, vector<256x128xf32>
    %c0_12 = arith.constant 0 : index
    %c0_13 = arith.constant 0 : index
    %c0_14 = arith.constant 0 : index
    %31 = vector.load %arg4[%c0_12, %c0_13, %c0_14] : memref<1x256x128xf32, #tpu.memory_space<vmem>>, vector<1x256x128xf32>
    %32 = vector.shape_cast %31 : vector<1x256x128xf32> to vector<256x128xf32>
    %33 = vector.shape_cast %30 : vector<256x128xf32> to vector<1x256x128xf32>
    tpu.vector_store %arg4[%c0_12, %c0_13, %c0_14], %33 {strides = array<i32>} : memref<1x256x128xf32, #tpu.memory_space<vmem>>, vector<1x256x128xf32>,
    return
  }
  func.func @transform_0(%arg0: i32) -> (i32, i32, i32) {
    %c0_i32 = arith.constant 0 : i32
    %c0_i32_0 = arith.constant 0 : i32
    %c0_i32_1 = arith.constant 0 : i32
    return %arg0, %c0_i32, %c0_i32_0 : i32, i32, i32
  }
  func.func @transform_1(%arg0: i32) -> (i32, i32) {
    %c0_i32 = arith.constant 0 : i32
    %c0_i32_0 = arith.constant 0 : i32
    %c0_i32_1 = arith.constant 0 : i32
    return %c0_i32, %c0_i32_0 : i32, i32
  }
  func.func @transform_2(%arg0: i32) -> (i32, i32) {
    %c0_i32 = arith.constant 0 : i32
    %c0_i32_0 = arith.constant 0 : i32
    %c0_i32_1 = arith.constant 0 : i32
    return %c0_i32, %c0_i32_0 : i32, i32
  }
  func.func @transform_3(%arg0: i32) -> (i32, i32, i32) {
    %c0_i32 = arith.constant 0 : i32
    %c0_i32_0 = arith.constant 0 : i32
    %c0_i32_1 = arith.constant 0 : i32
    return %arg0, %c0_i32, %c0_i32_0 : i32, i32, i32
  }
}

</mosaic_0001>

<bundles_post_ra>
// kernel: smooth_dilated_block_forward.3
= control target key start
LH: loop header
LB: loop body
LE: loop exit
PB: predicated region body
PF: predicated region fallthrough
CT: control target
= control target key end

     0   :  { %7 = vsyncpa [#allocation3], 0  ;;  %s2016_s9 = smov 0   ;;  %s3331_s0 = inlined_call_operand.vmem [shape: f32[9], index: 0, kind: input, shape index: {}]   ;;  %s3332_s1 = inlined_call_operand.vmem [shape: f32[2,18,18,64], index: 1, kind: input, shape index: {}]   ;;  %s3333_s2 = inlined_call_operand.vmem [shape: f32[2,16,16,64], index: 2, kind: output, shape index: {}]  }
   0x1 LB: > { %s1932_s10 = sadd.s32 4294967295, %s1998_s9   ;;  %p1934_p0 = scmp.ge.s32.totalorder %s1998_s9, 1  ;;  %s1998_s9 = sphi %s2016_s9, %s13_s9  }
   0x2   : > { %p91_p1 = scmp.lt.s32.totalorder %s1998_s9, 3  ;;  %s104_s13 = sshll.u32 %s3331_s0, 4  ;;  %s105_s13 = int_to_ptr.vmem [resolvable:$true] %s104_s13 }
   0x3   : > { %p1962_p3 = scmp.eq.s32.totalorder %s1932_s10, 0  ;;  %s1973_s15 = scalar_lea.vmem %s105_s13, 16 }
   0x4   : > { %p2027_p2 = pnand %p1934_p0, %p91_p1  ;;  %p1974_p6 = scmp.ne.s32.totalorder %s105_s13, %s1973_s15 }
   0x5   : > { %p1981_p10 = scmp.lt.s32.totalorder %s105_s13, %s105_s13  ;;  %p1982_p11 = scmp.lt.s32.totalorder %s1973_s15, %s1973_s15 }
   0x6   : > { %p1958_p4 = pneg %p2027_p2 }
   0x7   : > { %p1983_p12 = por %p1982_p11, %p1981_p10 }
   0x8   : > { %p1959_p5 = pnand %p1962_p3, %p1958_p4 }
   0xa   : > { %p1975_p7 = pneg %p1959_p5 }
   0xc   : > { %p1976_p8 = pnand %p1975_p7, %p1974_p6 }
   0xe   : > { %p1977_p9 = pneg %p1976_p8 }
  0x10   : > { %p1984_p13 = pnand %p1983_p12, %p1977_p9 }
  0x12   : > { %1987 = shalt.err (!%p1984_p13)
}
  0x13   : > { %s2000_s16 = smov [#allocation2]   ;;  %125 = sbr.rel (%p2027_p2) target bundleno = 330 (0x14a), region = 28 }
  0x14   : > { %1961 = dma.vmem_to_smem (!%p1959_p5), %s105_s13, 16, %s2000_s16, [#allocation3]  }
  0x1a   : > { %1993 = dma.done.wait (%p1962_p3), [#allocation3], 16  }
  0x1b   : > { %1995 = vsyncadd (%p1962_p3), [#allocation3], 4294967280 }
  0x1c   : > { %131 = sfence }
  0x1d   : > { %p148_p0 = scmp.lt.s32.totalorder %s1932_s10, 1  ;;  %s212_s17 = sld [smem:[#allocation2]]  ;;  %vm344_vm0 = vcmask 1046528   ;;  %vm587_vm1 = vcmask 1045504   ;;  %vm1832_vm2 = vcmask 523264  }
  0x1e   : > { %s1942_s18 = sld [smem:[#allocation2 + $0x1]]  ;;  %s1943_s19 = sld [smem:[#allocation2 + $0x2]] }
  0x1f   : > { %s3336_s10 = smov (!%p148_p0, %s1932_s10), 1  ;;  %s1944_s20 = sld [smem:[#allocation2 + $0x3]] }
  0x20   : > { %s1945_s21 = sld [smem:[#allocation2 + $0x4]]  ;;  %s1953_s22 = smul.u32 432, %s3336_s10 }
  0x21   : > { %s1946_s23 = sld [smem:[#allocation2 + $0x5]]  ;;  %s2048_s27 = sld [smem:[#allocation2 + $0x6]] }
  0x22   : > { %s2044_s26 = scalar_lea.vmem %s3332_s1, %s1953_s22  ;;  %s2054_s28 = sld [smem:[#allocation2 + $0x7]] }
  0x23   : > { %v2046_v0 = vstv %s212_s17  ;;  %v158_v1 = vld [vmem:[%s2044_s26] sm:$0xff]  ;;  %v159_v2 = vld [vmem:[%s2044_s26 + $0x8] sm:$0xff]  ;;  %s2061_s29 = sld [smem:[#allocation2 + $0x8]]  ;;  %v2064_v8 = vld [vmem:[%s2044_s26 + $0x18] sm:$0xff]  ;;  %s1952_s30 = sshll.u32 %s3336_s10, 8 }
  0x24   : > { %v2052_v3 = vstv %s1942_s18  ;;  %v214_v4 = vmul.f32 %v2046_v0, %v158_v1  ;;  %v2059_v7 = vstv %s1943_s19  ;;  %v2073_v13 = vld [vmem:[%s2044_s26 + $0x20] sm:$0xff]  ;;  %v160_v30 = vld [vmem:[%s2044_s26 + $0x10] sm:$0x3]  ;;  %v215_v42 = vmul.f32 %v2046_v0, %v159_v2  ;;  %s2156_s5 = scalar_lea.vmem %s3333_s2, %s1952_s30 }
  0x25   : > { %v248_v5 = vmul.f32 %v2052_v3, %v158_v1  ;;  %v249_v6 = vmul.f32 %v2052_v3, %v159_v2  ;;  %v491_v9 = vmul.f32 %v2059_v7, %v158_v1  ;;  %v492_v10 = vmul.f32 %v2059_v7, %v159_v2  ;;  %v2094_v31 = vld [vmem:[%s2044_s26 + $0x30] sm:$0xff]  ;;  %v2097_v32 = vld [vmem:[%s2044_s26 + $0x38] sm:$0xff]  ;;  %v2120_v50 = vld [vmem:[%s2044_s26 + $0x28] sm:$0x3] }
  0x26   : > { %v2068_v11 = vstv %s1944_s20  ;;  %v2070_v12 = vstv %s1945_s21  ;;  %v250_v43 = vmul.f32 %v2052_v3, %v160_v30  ;;  %v493_v52 = vmul.f32 %v2059_v7, %v160_v30  ;;  %v2132_v63 = vld [vmem:[%s2044_s26 + $0x40] sm:$0x3] }
  0x27   : > { %v345_v14 = vrot.slane %v248_v5, 1  ;;  %v346_v15 = vrot.slane %v249_v6, 1  ;;  %v734_v16 = vmul.f32 %v2068_v11, %v2064_v8  ;;  %v800_v17 = vmul.f32 %v2070_v12, %v2064_v8 }
  0x28   : > { %v588_v18 = vrot.slane %v491_v9, 2  ;;  %v589_v19 = vrot.slane %v492_v10, 2  ;;  %v801_v20 = vmul.f32 %v2070_v12, %v2073_v13  ;;  %v2081_v21 = vstv %s1946_s23 }
  0x29   : > { %v347_v22 = vsel %vm344_vm0, %v345_v14, %v346_v15  ;;  %v896_v23 = vrot.slane %v800_v17, 1  ;;  %v1042_v24 = vmul.f32 %v2081_v21, %v2064_v8  ;;  %v1043_v25 = vmul.f32 %v2081_v21, %v2073_v13 }
  0x2a   : > { %v457_v26 = vadd.f32 %v347_v22, %v214_v4  ;;  %v590_v27 = vsel %vm587_vm1, %v588_v18, %v589_v19  ;;  %v897_v28 = vrot.slane %v801_v20, 1  ;;  %v2090_v29 = vstv %s2048_s27 }
  0x2b   : > { %v1138_v33 = vrot.slane %v1042_v24, 2  ;;  %v1139_v34 = vrot.slane %v1043_v25, 2  ;;  %v2100_v35 = vstv %s2054_s28  ;;  %v1284_v37 = vmul.f32 %v2090_v29, %v2094_v31 }
  0x2c   : > { %v700_v36 = vadd.f32 %v590_v27, %v457_v26  ;;  %v1350_v38 = vmul.f32 %v2100_v35, %v2094_v31  ;;  %v1351_v39 = vmul.f32 %v2100_v35, %v2097_v32  ;;  %v898_v40 = vsel %vm344_vm0, %v896_v23, %v897_v28 }
  0x2d   : > { %v2110_v41 = vstv %s2061_s29  ;;  %v1140_v48 = vsel %vm587_vm1, %v1138_v33, %v1139_v34  ;;  %v348_v51 = vrot.slane %v250_v43, 1  ;;  %v735_v55 = vmul.f32 %v2068_v11, %v2073_v13 }
  0x2e   : > { %v766_v44 = vadd.f32 %v734_v16, %v700_v36  ;;  %v1446_v45 = vrot.slane %v1350_v38, 1  ;;  %v1447_v46 = vrot.slane %v1351_v39, 1  ;;  %v1592_v47 = vmul.f32 %v2110_v41, %v2094_v31 }
  0x2f   : > { %v1593_v49 = vmul.f32 %v2110_v41, %v2097_v32  ;;  %v802_v56 = vmul.f32 %v2070_v12, %v2120_v50  ;;  %v349_v58 = vsel %vm344_vm0, %v346_v15, %v348_v51  ;;  %v591_v59 = vrot.slane %v493_v52, 2 }
  0x30   : > { %v1008_v53 = vadd.f32 %v898_v40, %v766_v44  ;;  %v1688_v54 = vrot.slane %v1592_v47, 2  ;;  %v1044_v60 = vmul.f32 %v2081_v21, %v2120_v50  ;;  %v1448_v62 = vsel %vm344_vm0, %v1446_v45, %v1447_v46 }
  0x31   : > { %v1689_v57 = vrot.slane %v1593_v49, 2  ;;  %v458_v1 = vadd.f32 %v349_v58, %v215_v42  ;;  %v899_v2 = vrot.slane %v802_v56, 1  ;;  %v592_v4 = vsel %vm587_vm1, %v589_v19, %v591_v59 }
  0x32   : > { %v1250_v61 = vadd.f32 %v1140_v48, %v1008_v53  ;;  %v1141_v5 = vrot.slane %v1044_v60, 2  ;;  %v1285_v6 = vmul.f32 %v2090_v29, %v2097_v32  ;;  %v1352_v9 = vmul.f32 %v2100_v35, %v2132_v63  ;;  %v2180_v53 = vld [vmem:[%s2044_s26 + $0x48] sm:$0xff] }
  0x33   : > { %v1690_v14 = vsel %vm587_vm1, %v1688_v54, %v1689_v57  ;;  %v701_v15 = vadd.f32 %v592_v4, %v458_v1  ;;  %v1594_v16 = vmul.f32 %v2110_v41, %v2132_v63  ;;  %v900_v17 = vsel %vm344_vm0, %v897_v28, %v899_v2  ;;  %v2183_v54 = vld [vmem:[%s2044_s26 + $0x50] sm:$0xff] }
  0x34   : > { %v1316_v10 = vadd.f32 %v1284_v37, %v1250_v61  ;;  %v1142_v18 = vsel %vm587_vm1, %v1139_v34, %v1141_v5  ;;  %v1449_v19 = vrot.slane %v1352_v9, 1  ;;  %v251_v20 = vmul.f32 %v2052_v3, %v2064_v8 }
  0x35   : > { %v767_v23 = vadd.f32 %v735_v55, %v701_v15  ;;  %v216_v24 = vmul.f32 %v2046_v0, %v2064_v8  ;;  %v2151_v25 = vmul.f32 %v2052_v3, %v2073_v13  ;;  %v1691_v26 = vrot.slane %v1594_v16, 2 }
  0x36   : > { %v1558_v22 = vadd.f32 %v1448_v62, %v1316_v10  ;;  %v350_v27 = vrot.slane %v251_v20, 1  ;;  %v494_v28 = vmul.f32 %v2059_v7, %v2064_v8  ;;  %v495_v30 = vmul.f32 %v2059_v7, %v2073_v13 }
  0x37   : > { %v1009_v34 = vadd.f32 %v900_v17, %v767_v23  ;;  %v1450_v36 = vsel %vm344_vm0, %v1447_v46, %v1449_v19  ;;  %v351_v37 = vrot.slane %v2151_v25, 1  ;;  %v736_v40 = vmul.f32 %v2068_v11, %v2094_v31 }
  0x38   : > { %v1800_v33 = vadd.f32 %v1690_v14, %v1558_v22  ;;  %v593_v38 = vrot.slane %v494_v28, 2  ;;  %v594_v39 = vrot.slane %v495_v30, 2  ;;  %v803_v42 = vmul.f32 %v2070_v12, %v2094_v31 }
  0x39   : > { %v1251_v8 = vadd.f32 %v1142_v18, %v1009_v34  ;;  %v352_v43 = vsel %vm344_vm0, %v350_v27, %v351_v37  ;;  %v804_v44 = vmul.f32 %v2070_v12, %v2097_v32  ;;  %v1045_v45 = vmul.f32 %v2081_v21, %v2094_v31 }
  0x3a   : > { %1833 = vst.msk [vmem:[%s2156_s5] sm:$0xff] %vm1832_vm2, %v1800_v33  ;;  %v459_v46 = vadd.f32 %v352_v43, %v216_v24  ;;  %v595_v47 = vsel %vm587_vm1, %v593_v38, %v594_v39  ;;  %v901_v48 = vrot.slane %v803_v42, 1  ;;  %v1046_v49 = vmul.f32 %v2081_v21, %v2097_v32 }
  0x3b   : > { %v1317_v51 = vadd.f32 %v1285_v6, %v1251_v8  ;;  %v1692_v52 = vsel %vm587_vm1, %v1689_v57, %v1691_v26  ;;  %v902_v55 = vrot.slane %v804_v44, 1  ;;  %v1143_v56 = vrot.slane %v1045_v45, 2 }
  0x3c   : > { %v702_v58 = vadd.f32 %v595_v47, %v459_v46  ;;  %v1144_v59 = vrot.slane %v1046_v49, 2  ;;  %v1353_v60 = vmul.f32 %v2100_v35, %v2180_v53  ;;  %v1354_v61 = vmul.f32 %v2100_v35, %v2183_v54 }
  0x3d   : > { %v1559_v62 = vadd.f32 %v1450_v36, %v1317_v51  ;;  %v903_v1 = vsel %vm344_vm0, %v901_v48, %v902_v55  ;;  %v1595_v57 = vmul.f32 %v2110_v41, %v2180_v53  ;;  %v1596_v2 = vmul.f32 %v2110_v41, %v2183_v54 }
  0x3e   : > { %v768_v4 = vadd.f32 %v736_v40, %v702_v58  ;;  %v1286_v5 = vmul.f32 %v2090_v29, %v2180_v53  ;;  %v1451_v6 = vrot.slane %v1353_v60, 1  ;;  %v1452_v9 = vrot.slane %v1354_v61, 1 }
  0x3f   : > { %v1801_v10 = vadd.f32 %v1692_v52, %v1559_v62  ;;  %v1145_v14 = vsel %vm587_vm1, %v1143_v56, %v1144_v59  ;;  %v1693_v15 = vrot.slane %v1595_v57, 2  ;;  %v1694_v16 = vrot.slane %v1596_v2, 2 }
  0x40   : > { %v1010_v17 = vadd.f32 %v903_v1, %v768_v4  ;;  %v217_v18 = vmul.f32 %v2046_v0, %v2073_v13  ;;  %v253_v19 = vmul.f32 %v2052_v3, %v2120_v50  ;;  %v496_v20 = vmul.f32 %v2059_v7, %v2120_v50  ;;  %v2212_v13 = vld [vmem:[%s2044_s26 + $0x58] sm:$0x3] }
  0x41   : > { %1834 = vst.msk [vmem:[%s2156_s5 + $0x8] sm:$0xff] %vm1832_vm2, %v1801_v10  ;;  %v1453_v22 = vsel %vm344_vm0, %v1451_v6, %v1452_v9  ;;  %v1695_v23 = vsel %vm587_vm1, %v1693_v15, %v1694_v16  ;;  %v805_v24 = vmul.f32 %v2070_v12, %v2132_v63  ;;  %v1047_v25 = vmul.f32 %v2081_v21, %v2132_v63 }
  0x42   : > { %v1252_v26 = vadd.f32 %v1145_v14, %v1010_v17  ;;  %v353_v27 = vrot.slane %v253_v19, 1  ;;  %v596_v28 = vrot.slane %v496_v20, 2  ;;  %v737_v50 = vmul.f32 %v2068_v11, %v2097_v32  ;;  %v2256_v17 = vld [vmem:[%s2044_s26 + $0x60] sm:$0xff] }
  0x43   : > { %v904_v30 = vrot.slane %v805_v24, 1  ;;  %v1146_v33 = vrot.slane %v1047_v25, 2  ;;  %v1355_v34 = vmul.f32 %v2100_v35, %v2212_v13  ;;  %v1597_v36 = vmul.f32 %v2110_v41, %v2212_v13 }
  0x44   : > { %v1318_v38 = vadd.f32 %v1286_v5, %v1252_v26  ;;  %v354_v40 = vsel %vm344_vm0, %v351_v37, %v353_v27  ;;  %v597_v42 = vsel %vm587_vm1, %v594_v39, %v596_v28  ;;  %v1287_v8 = vmul.f32 %v2090_v29, %v2183_v54 }
  0x45   : > { %v460_v43 = vadd.f32 %v354_v40, %v217_v18  ;;  %v905_v44 = vsel %vm344_vm0, %v902_v55, %v904_v30  ;;  %v1454_v45 = vrot.slane %v1355_v34, 1  ;;  %v218_v46 = vmul.f32 %v2046_v0, %v2094_v31 }
  0x46   : > { %v1560_v47 = vadd.f32 %v1453_v22, %v1318_v38  ;;  %v1147_v48 = vsel %vm587_vm1, %v1144_v59, %v1146_v33  ;;  %v254_v49 = vmul.f32 %v2052_v3, %v2094_v31  ;;  %v2232_v37 = vmul.f32 %v2052_v3, %v2097_v32 }
  0x47   : > { %v703_v39 = vadd.f32 %v597_v42, %v460_v43  ;;  %v1696_v51 = vrot.slane %v1597_v36, 2  ;;  %v497_v52 = vmul.f32 %v2059_v7, %v2094_v31  ;;  %v498_v55 = vmul.f32 %v2059_v7, %v2097_v32 }
  0x48   : > { %v1802_v56 = vadd.f32 %v1695_v23, %v1560_v47  ;;  %v1455_v58 = vsel %vm344_vm0, %v1452_v9, %v1454_v45  ;;  %v355_v60 = vrot.slane %v254_v49, 1  ;;  %v356_v59 = vrot.slane %v2232_v37, 1  ;;  %v2259_v23 = vld [vmem:[%s2044_s26 + $0x68] sm:$0xff] }
  0x49   : > { %v769_v61 = vadd.f32 %v737_v50, %v703_v39  ;;  %v598_v62 = vrot.slane %v497_v52, 2  ;;  %v599_v1 = vrot.slane %v498_v55, 2  ;;  %v738_v57 = vmul.f32 %v2068_v11, %v2180_v53 }
  0x4a   : > { %1835 = vst.msk [vmem:[%s2156_s5 + $0x10] sm:$0xff] %vm1832_vm2, %v1802_v56  ;;  %v357_v31 = vsel %vm344_vm0, %v355_v60, %v356_v59  ;;  %v806_v2 = vmul.f32 %v2070_v12, %v2180_v53  ;;  %v807_v4 = vmul.f32 %v2070_v12, %v2183_v54  ;;  %v1048_v5 = vmul.f32 %v2081_v21, %v2180_v53 }
  0x4b   : > { %v1011_v6 = vadd.f32 %v905_v44, %v769_v61  ;;  %v461_v9 = vadd.f32 %v357_v31, %v218_v46  ;;  %v600_v10 = vsel %vm587_vm1, %v598_v62, %v599_v1  ;;  %v1049_v14 = vmul.f32 %v2081_v21, %v2183_v54 }
  0x4c   : > { %v1697_v15 = vsel %vm587_vm1, %v1694_v16, %v1696_v51  ;;  %v906_v18 = vrot.slane %v806_v2, 1  ;;  %v907_v19 = vrot.slane %v807_v4, 1  ;;  %v1148_v20 = vrot.slane %v1048_v5, 2  ;;  %v2286_v51 = vld [vmem:[%s2044_s26 + $0x70] sm:$0x3] }
  0x4d   : > { %v1253_v22 = vadd.f32 %v1147_v48, %v1011_v6  ;;  %v704_v24 = vadd.f32 %v600_v10, %v461_v9  ;;  %v1149_v25 = vrot.slane %v1049_v14, 2  ;;  %v1356_v26 = vmul.f32 %v2100_v35, %v2256_v17 }
  0x4e   : > { %v908_v27 = vsel %vm344_vm0, %v906_v18, %v907_v19  ;;  %v1357_v28 = vmul.f32 %v2100_v35, %v2259_v23  ;;  %v1598_v16 = vmul.f32 %v2110_v41, %v2256_v17  ;;  %v2270_v50 = vmul.f32 %v2110_v41, %v2259_v23 }
  0x4f   : > { %v1319_v30 = vadd.f32 %v1287_v8, %v1253_v22  ;;  %v770_v33 = vadd.f32 %v738_v57, %v704_v24  ;;  %v1288_v34 = vmul.f32 %v2090_v29, %v2256_v17  ;;  %v1456_v36 = vrot.slane %v1356_v26, 1 }
  0x50   : > { %v1150_v38 = vsel %vm587_vm1, %v1148_v20, %v1149_v25  ;;  %v1457_v40 = vrot.slane %v1357_v28, 1  ;;  %v1698_v42 = vrot.slane %v1598_v16, 2  ;;  %v1699_v43 = vrot.slane %v2270_v50, 2 }
  0x51   : > { %v1561_v44 = vadd.f32 %v1455_v58, %v1319_v30  ;;  %v1012_v45 = vadd.f32 %v908_v27, %v770_v33  ;;  %v256_v46 = vmul.f32 %v2052_v3, %v2132_v63  ;;  %v499_v8 = vmul.f32 %v2059_v7, %v2132_v63 }
  0x52   : > { %v1458_v47 = vsel %vm344_vm0, %v1456_v36, %v1457_v40  ;;  %v219_v48 = vmul.f32 %v2046_v0, %v2097_v32  ;;  %v808_v49 = vmul.f32 %v2070_v12, %v2212_v13  ;;  %v1700_v56 = vsel %vm587_vm1, %v1698_v42, %v1699_v43 }
  0x53   : > { %v1803_v37 = vadd.f32 %v1697_v15, %v1561_v44  ;;  %v1254_v39 = vadd.f32 %v1150_v38, %v1012_v45  ;;  %v358_v52 = vrot.slane %v256_v46, 1  ;;  %v601_v55 = vrot.slane %v499_v8, 2  ;;  %v2330_v8 = vld [vmem:[%s2044_s26 + $0x78] sm:$0xff] }
  0x54   : > { %v909_v58 = vrot.slane %v808_v49, 1  ;;  %v1050_v63 = vmul.f32 %v2081_v21, %v2212_v13  ;;  %v1358_v60 = vmul.f32 %v2100_v35, %v2286_v51  ;;  %v1600_v57 = vmul.f32 %v2110_v41, %v2286_v51 }
  0x55   : > { %1836 = vst.msk [vmem:[%s2156_s5 + $0x18] sm:$0xff] %vm1832_vm2, %v1803_v37  ;;  %v1320_v32 = vadd.f32 %v1288_v34, %v1254_v39  ;;  %v359_v61 = vsel %vm344_vm0, %v356_v59, %v358_v52  ;;  %v602_v62 = vsel %vm587_vm1, %v599_v1, %v601_v55  ;;  %v739_v2 = vmul.f32 %v2068_v11, %v2183_v54 }
  0x56   : > { %v462_v31 = vadd.f32 %v359_v61, %v219_v48  ;;  %v1151_v4 = vrot.slane %v1050_v63, 2  ;;  %v1459_v5 = vrot.slane %v1358_v60, 1  ;;  %v910_v9 = vsel %vm344_vm0, %v907_v19, %v909_v58 }
  0x57   : > { %v1562_v6 = vadd.f32 %v1458_v47, %v1320_v32  ;;  %v1289_v10 = vmul.f32 %v2090_v29, %v2259_v23  ;;  %v257_v59 = vmul.f32 %v2052_v3, %v2180_v53  ;;  %v1701_v14 = vrot.slane %v1600_v57, 2  ;;  %v2333_v47 = vld [vmem:[%s2044_s26 + $0x80] sm:$0xff] }
  0x58   : > { %v705_v1 = vadd.f32 %v602_v62, %v462_v31  ;;  %v220_v15 = vmul.f32 %v2046_v0, %v2180_v53  ;;  %v258_v18 = vmul.f32 %v2052_v3, %v2183_v54  ;;  %v1152_v22 = vsel %vm587_vm1, %v1149_v25, %v1151_v4 }
  0x59   : > { %v1804_v20 = vadd.f32 %v1700_v56, %v1562_v6  ;;  %v360_v24 = vrot.slane %v257_v59, 1  ;;  %v500_v19 = vmul.f32 %v2059_v7, %v2180_v53  ;;  %v1460_v27 = vsel %vm344_vm0, %v1457_v40, %v1459_v5 }
  0x5a   : > { %v771_v26 = vadd.f32 %v739_v2, %v705_v1  ;;  %v361_v28 = vrot.slane %v258_v18, 1  ;;  %v501_v16 = vmul.f32 %v2059_v7, %v2183_v54  ;;  %v809_v30 = vmul.f32 %v2070_v12, %v2256_v17 }
  0x5b   : > { %1837 = vst.msk [vmem:[%s2156_s5 + $0x20] sm:$0xff] %vm1832_vm2, %v1804_v20  ;;  %v603_v50 = vrot.slane %v500_v19, 2  ;;  %v810_v25 = vmul.f32 %v2070_v12, %v2259_v23  ;;  %v1051_v53 = vmul.f32 %v2081_v21, %v2256_v17  ;;  %v1052_v38 = vmul.f32 %v2081_v21, %v2259_v23 }
  0x5c   : > { %v1013_v33 = vadd.f32 %v910_v9, %v771_v26  ;;  %v362_v34 = vsel %vm344_vm0, %v360_v24, %v361_v28  ;;  %v604_v36 = vrot.slane %v501_v16, 2  ;;  %v740_v42 = vmul.f32 %v2068_v11, %v2256_v17 }
  0x5d   : > { %v463_v40 = vadd.f32 %v362_v34, %v220_v15  ;;  %v911_v44 = vrot.slane %v809_v30, 1  ;;  %v912_v45 = vrot.slane %v810_v25, 1  ;;  %v1153_v49 = vrot.slane %v1051_v53, 2 }
  0x5e   : > { %v1255_v46 = vadd.f32 %v1152_v22, %v1013_v33  ;;  %v605_v48 = vsel %vm587_vm1, %v603_v50, %v604_v36  ;;  %v1154_v37 = vrot.slane %v1052_v38, 2  ;;  %v1702_v39 = vsel %vm587_vm1, %v1699_v43, %v1701_v14  ;;  %v2362_v22 = vld [vmem:[%s2044_s26 + $0x88] sm:$0x3] }
  0x5f   : > { %v706_v52 = vadd.f32 %v605_v48, %v463_v40  ;;  %v1359_v55 = vmul.f32 %v2100_v35, %v2330_v8  ;;  %v1360_v56 = vmul.f32 %v2100_v35, %v2333_v47  ;;  %v913_v63 = vsel %vm344_vm0, %v911_v44, %v912_v45 }
  0x60   : > { %v1321_v58 = vadd.f32 %v1289_v10, %v1255_v46  ;;  %v1601_v60 = vmul.f32 %v2110_v41, %v2330_v8  ;;  %v2346_v32 = vmul.f32 %v2110_v41, %v2333_v47  ;;  %v1290_v43 = vmul.f32 %v2090_v29, %v2330_v8 }
  0x61   : > { %v772_v61 = vadd.f32 %v740_v42, %v706_v52  ;;  %v1461_v62 = vrot.slane %v1359_v55, 1  ;;  %v1462_v57 = vrot.slane %v1360_v56, 1  ;;  %v1155_v2 = vsel %vm587_vm1, %v1153_v49, %v1154_v37 }
  0x62   : > { %v1563_v31 = vadd.f32 %v1460_v27, %v1321_v58  ;;  %v221_v4 = vmul.f32 %v2046_v0, %v2183_v54  ;;  %v259_v5 = vmul.f32 %v2052_v3, %v2212_v13  ;;  %v1703_v9 = vrot.slane %v1601_v60, 2 }
  0x63   : > { %v1014_v6 = vadd.f32 %v913_v63, %v772_v61  ;;  %v1704_v10 = vrot.slane %v2346_v32, 2  ;;  %v502_v59 = vmul.f32 %v2059_v7, %v2212_v13  ;;  %v1463_v14 = vsel %vm344_vm0, %v1461_v62, %v1462_v57 }
  0x64   : > { %v1805_v1 = vadd.f32 %v1702_v39, %v1563_v31  ;;  %v363_v15 = vrot.slane %v259_v5, 1  ;;  %v811_v18 = vmul.f32 %v2070_v12, %v2286_v51  ;;  %v741_v24 = vmul.f32 %v2068_v11, %v2259_v23  ;;  %v2406_v5 = vld [vmem:[%s2044_s26 + $0x90] sm:$0xff] }
  0x65   : > { %v1256_v20 = vadd.f32 %v1155_v2, %v1014_v6  ;;  %v606_v54 = vrot.slane %v502_v59, 2  ;;  %v1053_v19 = vmul.f32 %v2081_v21, %v2286_v51  ;;  %v1361_v27 = vmul.f32 %v2100_v35, %v2362_v22  ;;  %v2409_v6 = vld [vmem:[%s2044_s26 + $0x98] sm:$0xff] }
  0x66   : > { %1838 = vst.msk [vmem:[%s2156_s5 + $0x28] sm:$0xff] %vm1832_vm2, %v1805_v1  ;;  %v364_v13 = vsel %vm344_vm0, %v361_v28, %v363_v15  ;;  %v914_v26 = vrot.slane %v811_v18, 1  ;;  %v1603_v16 = vmul.f32 %v2110_v41, %v2362_v22  ;;  %v1705_v33 = vsel %vm587_vm1, %v1703_v9, %v1704_v10 }
  0x67   : > { %v1322_v50 = vadd.f32 %v1290_v43, %v1256_v20  ;;  %v464_v30 = vadd.f32 %v364_v13, %v221_v4  ;;  %v607_v25 = vsel %vm587_vm1, %v604_v36, %v606_v54  ;;  %v1156_v53 = vrot.slane %v1053_v19, 2 }
  0x68   : > { %v915_v34 = vsel %vm344_vm0, %v912_v45, %v914_v26  ;;  %v1291_v38 = vmul.f32 %v2090_v29, %v2333_v47  ;;  %v1464_v28 = vrot.slane %v1361_v27, 1  ;;  %v1706_v44 = vrot.slane %v1603_v16, 2 }
  0x69   : > { %v1564_v40 = vadd.f32 %v1463_v14, %v1322_v50  ;;  %v707_v42 = vadd.f32 %v607_v25, %v464_v30  ;;  %v260_v46 = vmul.f32 %v2052_v3, %v2256_v17  ;;  %v1157_v48 = vsel %vm587_vm1, %v1154_v37, %v1156_v53 }
  0x6a   : > { %v222_v36 = vmul.f32 %v2046_v0, %v2256_v17  ;;  %v261_v49 = vmul.f32 %v2052_v3, %v2259_v23  ;;  %v503_v45 = vmul.f32 %v2059_v7, %v2256_v17  ;;  %v504_v56 = vmul.f32 %v2059_v7, %v2259_v23 }
  0x6b   : > { %v1806_v39 = vadd.f32 %v1705_v33, %v1564_v40  ;;  %v773_v52 = vadd.f32 %v741_v24, %v707_v42  ;;  %v365_v55 = vrot.slane %v260_v46, 1  ;;  %v1465_v58 = vsel %vm344_vm0, %v1462_v57, %v1464_v28 }
  0x6c   : > { %v366_v37 = vrot.slane %v261_v49, 1  ;;  %v608_v63 = vrot.slane %v503_v45, 2  ;;  %v812_v60 = vmul.f32 %v2070_v12, %v2330_v8  ;;  %v609_v61 = vrot.slane %v504_v56, 2 }
  0x6d   : > { %1839 = vst.msk [vmem:[%s2156_s5 + $0x30] sm:$0xff] %vm1832_vm2, %v1806_v39  ;;  %v1015_v32 = vadd.f32 %v915_v34, %v773_v52  ;;  %v813_v17 = vmul.f32 %v2070_v12, %v2333_v47  ;;  %v1054_v43 = vmul.f32 %v2081_v21, %v2330_v8  ;;  %v742_v57 = vmul.f32 %v2068_v11, %v2330_v8 }
  0x6e   : > { %v367_v62 = vsel %vm344_vm0, %v365_v55, %v366_v37  ;;  %v916_v31 = vrot.slane %v812_v60, 1  ;;  %v1055_v2 = vmul.f32 %v2081_v21, %v2333_v47  ;;  %v610_v59 = vsel %vm587_vm1, %v608_v63, %v609_v61 }
  0x6f   : > { %v1257_v4 = vadd.f32 %v1157_v48, %v1015_v32  ;;  %v465_v9 = vadd.f32 %v367_v62, %v222_v36  ;;  %v917_v1 = vrot.slane %v813_v17, 1  ;;  %v1158_v14 = vrot.slane %v1054_v43, 2  ;;  %v2443_v36 = vld [vmem:[%s2044_s26 + $0xa0] sm:$0x3] }
  0x70   : > { %v1159_v15 = vrot.slane %v1055_v2, 2  ;;  %v1362_v18 = vmul.f32 %v2100_v35, %v2406_v5  ;;  %v2416_v20 = vmul.f32 %v2100_v35, %v2409_v6  ;;  %v1707_v24 = vsel %vm587_vm1, %v1704_v10, %v1706_v44 }
  0x71   : > { %v1323_v54 = vadd.f32 %v1291_v38, %v1257_v4  ;;  %v708_v19 = vadd.f32 %v610_v59, %v465_v9  ;;  %v1604_v13 = vmul.f32 %v2110_v41, %v2406_v5  ;;  %v918_v26 = vsel %vm344_vm0, %v916_v31, %v917_v1 }
  0x72   : > { %v1466_v27 = vrot.slane %v1362_v18, 1  ;;  %v1467_v16 = vrot.slane %v2416_v20, 1  ;;  %v2425_v50 = vmul.f32 %v2110_v41, %v2409_v6  ;;  %v1160_v53 = vsel %vm587_vm1, %v1158_v14, %v1159_v15 }
  0x73   : > { %v1565_v30 = vadd.f32 %v1465_v58, %v1323_v54  ;;  %v774_v25 = vadd.f32 %v742_v57, %v708_v19  ;;  %v1292_v10 = vmul.f32 %v2090_v29, %v2406_v5  ;;  %v1708_v33 = vrot.slane %v1604_v13, 2 }
  0x74   : > { %v223_v34 = vmul.f32 %v2046_v0, %v2259_v23  ;;  %v262_v38 = vmul.f32 %v2052_v3, %v2286_v51  ;;  %v505_v28 = vmul.f32 %v2059_v7, %v2286_v51  ;;  %v1709_v44 = vrot.slane %v2425_v50, 2 }
  0x75   : > { %v1807_v40 = vadd.f32 %v1707_v24, %v1565_v30  ;;  %v1016_v42 = vadd.f32 %v918_v26, %v774_v25  ;;  %v814_v46 = vmul.f32 %v2070_v12, %v2362_v22  ;;  %v1468_v48 = vsel %vm344_vm0, %v1466_v27, %v1467_v16 }
  0x76   : > { %v368_v23 = vrot.slane %v262_v38, 1  ;;  %v611_v49 = vrot.slane %v505_v28, 2  ;;  %v1056_v45 = vmul.f32 %v2081_v21, %v2362_v22  ;;  %v743_v39 = vmul.f32 %v2068_v11, %v2333_v47 }
  0x77   : > { %1840 = vst.msk [vmem:[%s2156_s5 + $0x38] sm:$0xff] %vm1832_vm2, %v1807_v40  ;;  %v1258_v51 = vadd.f32 %v1160_v53, %v1016_v42  ;;  %v919_v52 = vrot.slane %v814_v46, 1  ;;  %v1364_v55 = vmul.f32 %v2100_v35, %v2443_v36  ;;  %v1606_v60 = vmul.f32 %v2110_v41, %v2443_v36  ;;  %v2490_v46 = vld [vmem:[%s2044_s26 + $0xa8] sm:$0xff] }
  0x78   : > { %v369_v56 = vsel %vm344_vm0, %v366_v37, %v368_v23  ;;  %v612_v58 = vsel %vm587_vm1, %v609_v61, %v611_v49  ;;  %v1161_v63 = vrot.slane %v1056_v45, 2  ;;  %v1710_v17 = vsel %vm587_vm1, %v1708_v33, %v1709_v44 }
  0x79   : > { %v1324_v32 = vadd.f32 %v1292_v10, %v1258_v51  ;;  %v466_v43 = vadd.f32 %v369_v56, %v223_v34  ;;  %v1293_v62 = vmul.f32 %v2090_v29, %v2409_v6  ;;  %v920_v57 = vsel %vm344_vm0, %v917_v1, %v919_v52 }
  0x7a   : > { %v1162_v31 = vsel %vm587_vm1, %v1159_v15, %v1161_v63  ;;  %v1469_v2 = vrot.slane %v1364_v55, 1  ;;  %v263_v37 = vmul.f32 %v2052_v3, %v2330_v8  ;;  %v1711_v9 = vrot.slane %v1606_v60, 2 }
  0x7b   : > { %v1566_v61 = vadd.f32 %v1468_v48, %v1324_v32  ;;  %v709_v4 = vadd.f32 %v612_v58, %v466_v43  ;;  %v264_v59 = vmul.f32 %v2052_v3, %v2333_v47  ;;  %v224_v14 = vmul.f32 %v2046_v0, %v2330_v8  ;;  %v2493_v48 = vld [vmem:[%s2044_s26 + $0xb0] sm:$0xff] }
  0x7c   : > { %v370_v18 = vrot.slane %v263_v37, 1  ;;  %v506_v1 = vmul.f32 %v2059_v7, %v2330_v8  ;;  %v507_v15 = vmul.f32 %v2059_v7, %v2333_v47  ;;  %v744_v13 = vmul.f32 %v2068_v11, %v2406_v5 }
  0x7d   : > { %v1808_v54 = vadd.f32 %v1710_v17, %v1566_v61  ;;  %v775_v24 = vadd.f32 %v743_v39, %v709_v4  ;;  %v371_v19 = vrot.slane %v264_v59, 1  ;;  %v815_v50 = vmul.f32 %v2070_v12, %v2406_v5 }
  0x7e   : > { %v613_v26 = vrot.slane %v506_v1, 2  ;;  %v614_v27 = vrot.slane %v507_v15, 2  ;;  %v816_v30 = vmul.f32 %v2070_v12, %v2409_v6  ;;  %v1057_v53 = vmul.f32 %v2081_v21, %v2406_v5 }
  0x7f   : > { %1841 = vst.msk [vmem:[%s2156_s5 + $0x40] sm:$0xff] %vm1832_vm2, %v1808_v54  ;;  %v1017_v8 = vadd.f32 %v920_v57, %v775_v24  ;;  %v372_v25 = vsel %vm344_vm0, %v370_v18, %v371_v19  ;;  %v1058_v10 = vmul.f32 %v2081_v21, %v2409_v6  ;;  %v921_v38 = vrot.slane %v815_v50, 1  ;;  %v2521_v18 = vld [vmem:[%s2044_s26 + $0xb8] sm:$0x3] }
  0x80   : > { %v467_v33 = vadd.f32 %v372_v25, %v224_v14  ;;  %v615_v34 = vsel %vm587_vm1, %v613_v26, %v614_v27  ;;  %v922_v28 = vrot.slane %v816_v30, 1  ;;  %v1470_v42 = vsel %vm344_vm0, %v1467_v16, %v1469_v2 }
  0x81   : > { %v1259_v40 = vadd.f32 %v1162_v31, %v1017_v8  ;;  %v1163_v23 = vrot.slane %v1057_v53, 2  ;;  %v1164_v49 = vrot.slane %v1058_v10, 2  ;;  %v1712_v45 = vsel %vm587_vm1, %v1709_v44, %v1711_v9 }
  0x82   : > { %v710_v51 = vadd.f32 %v615_v34, %v467_v33  ;;  %v1365_v39 = vmul.f32 %v2100_v35, %v2490_v46  ;;  %v1366_v52 = vmul.f32 %v2100_v35, %v2493_v48  ;;  %v923_v20 = vsel %vm344_vm0, %v921_v38, %v922_v28 }
  0x83   : > { %v1325_v55 = vadd.f32 %v1293_v62, %v1259_v40  ;;  %v1607_v16 = vmul.f32 %v2110_v41, %v2490_v46  ;;  %v2505_v56 = vmul.f32 %v2110_v41, %v2493_v48  ;;  %v1294_v44 = vmul.f32 %v2090_v29, %v2490_v46 }
  0x84   : > { %v776_v58 = vadd.f32 %v744_v13, %v710_v51  ;;  %v1471_v63 = vrot.slane %v1365_v39, 1  ;;  %v1472_v60 = vrot.slane %v1366_v52, 1  ;;  %v1165_v17 = vsel %vm587_vm1, %v1163_v23, %v1164_v49 }
  0x85   : > { %v1567_v32 = vadd.f32 %v1470_v42, %v1325_v55  ;;  %v225_v43 = vmul.f32 %v2046_v0, %v2333_v47  ;;  %v265_v62 = vmul.f32 %v2052_v3, %v2362_v22  ;;  %v1713_v31 = vrot.slane %v1607_v16, 2 }
  0x86   : > { %v1018_v57 = vadd.f32 %v923_v20, %v776_v58  ;;  %v1714_v2 = vrot.slane %v2505_v56, 2  ;;  %v508_v37 = vmul.f32 %v2059_v7, %v2362_v22  ;;  %v1473_v4 = vsel %vm344_vm0, %v1471_v63, %v1472_v60 }
  0x87   : > { %v1809_v61 = vadd.f32 %v1712_v45, %v1567_v32  ;;  %v373_v9 = vrot.slane %v265_v62, 1  ;;  %v817_v59 = vmul.f32 %v2070_v12, %v2443_v36  ;;  %v745_v1 = vmul.f32 %v2068_v11, %v2409_v6  ;;  %v2565_v62 = vld [vmem:[%s2044_s26 + $0xc0] sm:$0xff] }
  0x88   : > { %v1260_v14 = vadd.f32 %v1165_v17, %v1018_v57  ;;  %v616_v47 = vrot.slane %v508_v37, 2  ;;  %v1059_v15 = vmul.f32 %v2081_v21, %v2443_v36  ;;  %v1367_v24 = vmul.f32 %v2100_v35, %v2521_v18  ;;  %v2568_v57 = vld [vmem:[%s2044_s26 + $0xc8] sm:$0xff] }
  0x89   : > { %1842 = vst.msk [vmem:[%s2156_s5 + $0x48] sm:$0xff] %vm1832_vm2, %v1809_v61  ;;  %v374_v22 = vsel %vm344_vm0, %v371_v19, %v373_v9  ;;  %v924_v54 = vrot.slane %v817_v59, 1  ;;  %v1609_v13 = vmul.f32 %v2110_v41, %v2521_v18  ;;  %v1715_v25 = vsel %vm587_vm1, %v1713_v31, %v1714_v2 }
  0x8a   : > { %v1326_v26 = vadd.f32 %v1294_v44, %v1260_v14  ;;  %v468_v50 = vadd.f32 %v374_v22, %v225_v43  ;;  %v617_v30 = vsel %vm587_vm1, %v614_v27, %v616_v47  ;;  %v1166_v8 = vrot.slane %v1059_v15, 2 }
  0x8b   : > { %v925_v53 = vsel %vm344_vm0, %v922_v28, %v924_v54  ;;  %v1295_v10 = vmul.f32 %v2090_v29, %v2493_v48  ;;  %v1474_v19 = vrot.slane %v1367_v24, 1  ;;  %v1716_v38 = vrot.slane %v1609_v13, 2 }
  0x8c   : > { %v1568_v33 = vadd.f32 %v1473_v4, %v1326_v26  ;;  %v711_v34 = vadd.f32 %v617_v30, %v468_v50  ;;  %v266_v40 = vmul.f32 %v2052_v3, %v2406_v5  ;;  %v1167_v42 = vsel %vm587_vm1, %v1164_v49, %v1166_v8 }
  0x8d   : > { %v226_v27 = vmul.f32 %v2046_v0, %v2406_v5  ;;  %v267_v23 = vmul.f32 %v2052_v3, %v2409_v6  ;;  %v509_v28 = vmul.f32 %v2059_v7, %v2406_v5  ;;  %v510_v52 = vmul.f32 %v2059_v7, %v2409_v6 }
  0x8e   : > { %v1810_v45 = vadd.f32 %v1715_v25, %v1568_v33  ;;  %v777_v51 = vadd.f32 %v745_v1, %v711_v34  ;;  %v375_v39 = vrot.slane %v266_v40, 1  ;;  %v1475_v55 = vsel %vm344_vm0, %v1472_v60, %v1474_v19 }
  0x8f   : > { %v376_v49 = vrot.slane %v267_v23, 1  ;;  %v618_v20 = vrot.slane %v509_v28, 2  ;;  %v818_v16 = vmul.f32 %v2070_v12, %v2490_v46  ;;  %v619_v58 = vrot.slane %v510_v52, 2 }
  0x90   : > { %1843 = vst.msk [vmem:[%s2156_s5 + $0x50] sm:$0xff] %vm1832_vm2, %v1810_v45  ;;  %v1019_v56 = vadd.f32 %v925_v53, %v777_v51  ;;  %v819_v5 = vmul.f32 %v2070_v12, %v2493_v48  ;;  %v1060_v44 = vmul.f32 %v2081_v21, %v2490_v46  ;;  %v746_v60 = vmul.f32 %v2068_v11, %v2490_v46 }
  0x91   : > { %v377_v63 = vsel %vm344_vm0, %v375_v39, %v376_v49  ;;  %v926_v32 = vrot.slane %v818_v16, 1  ;;  %v1061_v17 = vmul.f32 %v2081_v21, %v2493_v48  ;;  %v620_v37 = vsel %vm587_vm1, %v618_v20, %v619_v58 }
  0x92   : > { %v1261_v43 = vadd.f32 %v1167_v42, %v1019_v56  ;;  %v469_v31 = vadd.f32 %v377_v63, %v226_v27  ;;  %v927_v61 = vrot.slane %v819_v5, 1  ;;  %v1168_v4 = vrot.slane %v1060_v44, 2  ;;  %v2602_v27 = vld [vmem:[%s2044_s26 + $0xd0] sm:$0x3] }
  0x93   : > { %v1169_v9 = vrot.slane %v1061_v17, 2  ;;  %v1368_v59 = vmul.f32 %v2100_v35, %v2565_v62  ;;  %v2575_v14 = vmul.f32 %v2100_v35, %v2568_v57  ;;  %v1717_v1 = vsel %vm587_vm1, %v1714_v2, %v1716_v38 }
  0x94   : > { %v1327_v47 = vadd.f32 %v1295_v10, %v1261_v43  ;;  %v712_v15 = vadd.f32 %v620_v37, %v469_v31  ;;  %v1610_v22 = vmul.f32 %v2110_v41, %v2565_v62  ;;  %v928_v54 = vsel %vm344_vm0, %v926_v32, %v927_v61 }
  0x95   : > { %v1476_v24 = vrot.slane %v1368_v59, 1  ;;  %v1477_v13 = vrot.slane %v2575_v14, 1  ;;  %v2584_v26 = vmul.f32 %v2110_v41, %v2568_v57  ;;  %v1170_v8 = vsel %vm587_vm1, %v1168_v4, %v1169_v9 }
  0x96   : > { %v1569_v50 = vadd.f32 %v1475_v55, %v1327_v47  ;;  %v778_v30 = vadd.f32 %v746_v60, %v712_v15  ;;  %v1296_v2 = vmul.f32 %v2090_v29, %v2565_v62  ;;  %v1718_v25 = vrot.slane %v1610_v22, 2 }
  0x97   : > { %v227_v53 = vmul.f32 %v2046_v0, %v2409_v6  ;;  %v268_v10 = vmul.f32 %v2052_v3, %v2443_v36  ;;  %v511_v19 = vmul.f32 %v2059_v7, %v2443_v36  ;;  %v1719_v38 = vrot.slane %v2584_v26, 2 }
  0x98   : > { %v1811_v33 = vadd.f32 %v1717_v1, %v1569_v50  ;;  %v1020_v34 = vadd.f32 %v928_v54, %v778_v30  ;;  %v820_v40 = vmul.f32 %v2070_v12, %v2521_v18  ;;  %v1478_v42 = vsel %vm344_vm0, %v1476_v24, %v1477_v13 }
  0x99   : > { %v378_v6 = vrot.slane %v268_v10, 1  ;;  %v621_v23 = vrot.slane %v511_v19, 2  ;;  %v1062_v28 = vmul.f32 %v2081_v21, %v2521_v18  ;;  %v747_v45 = vmul.f32 %v2068_v11, %v2493_v48 }
  0x9a   : > { %1844 = vst.msk [vmem:[%s2156_s5 + $0x58] sm:$0xff] %vm1832_vm2, %v1811_v33  ;;  %v1262_v36 = vadd.f32 %v1170_v8, %v1020_v34  ;;  %v929_v51 = vrot.slane %v820_v40, 1  ;;  %v1370_v39 = vmul.f32 %v2100_v35, %v2602_v27  ;;  %v1612_v16 = vmul.f32 %v2110_v41, %v2602_v27  ;;  %v2649_v40 = vld [vmem:[%s2044_s26 + $0xd8] sm:$0xff] }
  0x9b   : > { %v379_v52 = vsel %vm344_vm0, %v376_v49, %v378_v6  ;;  %v622_v55 = vsel %vm587_vm1, %v619_v58, %v621_v23  ;;  %v1171_v20 = vrot.slane %v1062_v28, 2  ;;  %v1720_v5 = vsel %vm587_vm1, %v1718_v25, %v1719_v38 }
  0x9c   : > { %v1328_v56 = vadd.f32 %v1296_v2, %v1262_v36  ;;  %v470_v44 = vadd.f32 %v379_v52, %v227_v53  ;;  %v1297_v63 = vmul.f32 %v2090_v29, %v2568_v57  ;;  %v930_v60 = vsel %vm344_vm0, %v927_v61, %v929_v51 }
  0x9d   : > { %v1172_v32 = vsel %vm587_vm1, %v1169_v9, %v1171_v20  ;;  %v1479_v17 = vrot.slane %v1370_v39, 1  ;;  %v269_v49 = vmul.f32 %v2052_v3, %v2490_v46  ;;  %v1721_v31 = vrot.slane %v1612_v16, 2 }
  0x9e   : > { %v1570_v58 = vadd.f32 %v1478_v42, %v1328_v56  ;;  %v713_v43 = vadd.f32 %v622_v55, %v470_v44  ;;  %v270_v37 = vmul.f32 %v2052_v3, %v2493_v48  ;;  %v228_v4 = vmul.f32 %v2046_v0, %v2490_v46  ;;  %v2652_v42 = vld [vmem:[%s2044_s26 + $0xe0] sm:$0xff] }
  0x9f   : > { %v380_v59 = vrot.slane %v269_v49, 1  ;;  %v512_v61 = vmul.f32 %v2059_v7, %v2490_v46  ;;  %v513_v9 = vmul.f32 %v2059_v7, %v2493_v48  ;;  %v748_v22 = vmul.f32 %v2068_v11, %v2565_v62 }
  0xa0   : > { %v1812_v47 = vadd.f32 %v1720_v5, %v1570_v58  ;;  %v779_v1 = vadd.f32 %v747_v45, %v713_v43  ;;  %v381_v15 = vrot.slane %v270_v37, 1  ;;  %v821_v26 = vmul.f32 %v2070_v12, %v2565_v62 }
  0xa1   : > { %v623_v54 = vrot.slane %v512_v61, 2  ;;  %v624_v24 = vrot.slane %v513_v9, 2  ;;  %v822_v50 = vmul.f32 %v2070_v12, %v2568_v57  ;;  %v1063_v8 = vmul.f32 %v2081_v21, %v2565_v62 }
  0xa2   : > { %1845 = vst.msk [vmem:[%s2156_s5 + $0x60] sm:$0xff] %vm1832_vm2, %v1812_v47  ;;  %v1021_v46 = vadd.f32 %v930_v60, %v779_v1  ;;  %v382_v30 = vsel %vm344_vm0, %v380_v59, %v381_v15  ;;  %v1064_v2 = vmul.f32 %v2081_v21, %v2568_v57  ;;  %v931_v10 = vrot.slane %v821_v26, 1  ;;  %v2680_v59 = vld [vmem:[%s2044_s26 + $0xe8] sm:$0x3] }
  0xa3   : > { %v471_v25 = vadd.f32 %v382_v30, %v228_v4  ;;  %v625_v53 = vsel %vm587_vm1, %v623_v54, %v624_v24  ;;  %v932_v19 = vrot.slane %v822_v50, 1  ;;  %v1480_v34 = vsel %vm344_vm0, %v1477_v13, %v1479_v17 }
  0xa4   : > { %v1263_v33 = vadd.f32 %v1172_v32, %v1021_v46  ;;  %v1173_v6 = vrot.slane %v1063_v8, 2  ;;  %v1174_v23 = vrot.slane %v1064_v2, 2  ;;  %v1722_v28 = vsel %vm587_vm1, %v1719_v38, %v1721_v31 }
  0xa5   : > { %v714_v36 = vadd.f32 %v625_v53, %v471_v25  ;;  %v1371_v45 = vmul.f32 %v2100_v35, %v2649_v40  ;;  %v1372_v51 = vmul.f32 %v2100_v35, %v2652_v42  ;;  %v933_v14 = vsel %vm344_vm0, %v931_v10, %v932_v19 }
  0xa6   : > { %v1329_v39 = vadd.f32 %v1297_v63, %v1263_v33  ;;  %v1613_v13 = vmul.f32 %v2110_v41, %v2649_v40  ;;  %v2664_v52 = vmul.f32 %v2110_v41, %v2652_v42  ;;  %v1298_v38 = vmul.f32 %v2090_v29, %v2649_v40 }
  0xa7   : > { %v780_v55 = vadd.f32 %v748_v22, %v714_v36  ;;  %v1481_v20 = vrot.slane %v1371_v45, 1  ;;  %v1482_v16 = vrot.slane %v1372_v51, 1  ;;  %v1175_v5 = vsel %vm587_vm1, %v1173_v6, %v1174_v23 }
  0xa8   : > { %v1571_v56 = vadd.f32 %v1480_v34, %v1329_v39  ;;  %v229_v44 = vmul.f32 %v2046_v0, %v2493_v48  ;;  %v271_v63 = vmul.f32 %v2052_v3, %v2521_v18  ;;  %v1723_v32 = vrot.slane %v1613_v13, 2 }
  0xa9   : > { %v1022_v60 = vadd.f32 %v933_v14, %v780_v55  ;;  %v1724_v17 = vrot.slane %v2664_v52, 2  ;;  %v514_v49 = vmul.f32 %v2059_v7, %v2521_v18  ;;  %v1483_v43 = vsel %vm344_vm0, %v1481_v20, %v1482_v16 }
  0xaa   : > { %v1813_v58 = vadd.f32 %v1722_v28, %v1571_v56  ;;  %v383_v31 = vrot.slane %v271_v63, 1  ;;  %v823_v37 = vmul.f32 %v2070_v12, %v2602_v27  ;;  %v749_v61 = vmul.f32 %v2068_v11, %v2568_v57  ;;  %v2724_v63 = vld [vmem:[%s2044_s26 + $0xf0] sm:$0xff] }
  0xab   : > { %v1264_v4 = vadd.f32 %v1175_v5, %v1022_v60  ;;  %v626_v48 = vrot.slane %v514_v49, 2  ;;  %v1065_v9 = vmul.f32 %v2081_v21, %v2602_v27  ;;  %v1373_v1 = vmul.f32 %v2100_v35, %v2680_v59  ;;  %v2727_v60 = vld [vmem:[%s2044_s26 + $0xf8] sm:$0xff] }
  0xac   : > { %1846 = vst.msk [vmem:[%s2156_s5 + $0x68] sm:$0xff] %vm1832_vm2, %v1813_v58  ;;  %v384_v18 = vsel %vm344_vm0, %v381_v15, %v383_v31  ;;  %v934_v47 = vrot.slane %v823_v37, 1  ;;  %v1615_v22 = vmul.f32 %v2110_v41, %v2680_v59  ;;  %v1725_v30 = vsel %vm587_vm1, %v1723_v32, %v1724_v17 }
  0xad   : > { %v1330_v54 = vadd.f32 %v1298_v38, %v1264_v4  ;;  %v472_v26 = vadd.f32 %v384_v18, %v229_v44  ;;  %v627_v50 = vsel %vm587_vm1, %v624_v24, %v626_v48  ;;  %v1176_v46 = vrot.slane %v1065_v9, 2 }
  0xae   : > { %v935_v8 = vsel %vm344_vm0, %v932_v19, %v934_v47  ;;  %v1299_v2 = vmul.f32 %v2090_v29, %v2652_v42  ;;  %v1484_v15 = vrot.slane %v1373_v1, 1  ;;  %v1726_v10 = vrot.slane %v1615_v22, 2 }
  0xaf   : > { %v1572_v25 = vadd.f32 %v1483_v43, %v1330_v54  ;;  %v715_v53 = vadd.f32 %v627_v50, %v472_v26  ;;  %v272_v33 = vmul.f32 %v2052_v3, %v2565_v62  ;;  %v1177_v34 = vsel %vm587_vm1, %v1174_v23, %v1176_v46 }
  0xb0   : > { %v230_v24 = vmul.f32 %v2046_v0, %v2565_v62  ;;  %v273_v6 = vmul.f32 %v2052_v3, %v2568_v57  ;;  %v515_v19 = vmul.f32 %v2059_v7, %v2565_v62  ;;  %v516_v51 = vmul.f32 %v2059_v7, %v2568_v57 }
  0xb1   : > { %v1814_v28 = vadd.f32 %v1725_v30, %v1572_v25  ;;  %v781_v36 = vadd.f32 %v749_v61, %v715_v53  ;;  %v385_v45 = vrot.slane %v272_v33, 1  ;;  %v1485_v39 = vsel %vm344_vm0, %v1482_v16, %v1484_v15 }
  0xb2   : > { %v386_v23 = vrot.slane %v273_v6, 1  ;;  %v628_v14 = vrot.slane %v515_v19, 2  ;;  %v824_v13 = vmul.f32 %v2070_v12, %v2649_v40  ;;  %v629_v55 = vrot.slane %v516_v51, 2 }
  0xb3   : > { %1847 = vst.msk [vmem:[%s2156_s5 + $0x70] sm:$0xff] %vm1832_vm2, %v1814_v28  ;;  %v1023_v52 = vadd.f32 %v935_v8, %v781_v36  ;;  %v825_v62 = vmul.f32 %v2070_v12, %v2652_v42  ;;  %v1066_v38 = vmul.f32 %v2081_v21, %v2649_v40  ;;  %v750_v16 = vmul.f32 %v2068_v11, %v2649_v40 }
  0xb4   : > { %v387_v20 = vsel %vm344_vm0, %v385_v45, %v386_v23  ;;  %v936_v56 = vrot.slane %v824_v13, 1  ;;  %v1067_v5 = vmul.f32 %v2081_v21, %v2652_v42  ;;  %v630_v49 = vsel %vm587_vm1, %v628_v14, %v629_v55 }
  0xb5   : > { %v1265_v44 = vadd.f32 %v1177_v34, %v1023_v52  ;;  %v473_v32 = vadd.f32 %v387_v20, %v230_v24  ;;  %v937_v58 = vrot.slane %v825_v62, 1  ;;  %v1178_v43 = vrot.slane %v1066_v38, 2  ;;  %v2761_v24 = vld [vmem:[%s2044_s26 + $0x100] sm:$0x3] }
  0xb6   : > { %v1179_v31 = vrot.slane %v1067_v5, 2  ;;  %v1374_v37 = vmul.f32 %v2100_v35, %v2724_v63  ;;  %v2734_v4 = vmul.f32 %v2100_v35, %v2727_v60  ;;  %v1727_v61 = vsel %vm587_vm1, %v1724_v17, %v1726_v10 }
  0xb7   : > { %v1331_v48 = vadd.f32 %v1299_v2, %v1265_v44  ;;  %v716_v9 = vadd.f32 %v630_v49, %v473_v32  ;;  %v1616_v18 = vmul.f32 %v2110_v41, %v2724_v63  ;;  %v938_v47 = vsel %vm344_vm0, %v936_v56, %v937_v58 }
  0xb8   : > { %v1486_v1 = vrot.slane %v1374_v37, 1  ;;  %v1487_v22 = vrot.slane %v2734_v4, 1  ;;  %v2743_v54 = vmul.f32 %v2110_v41, %v2727_v60  ;;  %v1180_v46 = vsel %vm587_vm1, %v1178_v43, %v1179_v31 }
  0xb9   : > { %v1573_v26 = vadd.f32 %v1485_v39, %v1331_v48  ;;  %v782_v50 = vadd.f32 %v750_v16, %v716_v9  ;;  %v1300_v17 = vmul.f32 %v2090_v29, %v2724_v63  ;;  %v1728_v30 = vrot.slane %v1616_v18, 2 }
  0xba   : > { %v231_v8 = vmul.f32 %v2046_v0, %v2568_v57  ;;  %v274_v2 = vmul.f32 %v2052_v3, %v2602_v27  ;;  %v517_v15 = vmul.f32 %v2059_v7, %v2602_v27  ;;  %v1729_v10 = vrot.slane %v2743_v54, 2 }
  0xbb   : > { %v1815_v25 = vadd.f32 %v1727_v61, %v1573_v26  ;;  %v1024_v53 = vadd.f32 %v938_v47, %v782_v50  ;;  %v826_v33 = vmul.f32 %v2070_v12, %v2680_v59  ;;  %v1488_v34 = vsel %vm344_vm0, %v1486_v1, %v1487_v22 }
  0xbc   : > { %v388_v57 = vrot.slane %v274_v2, 1  ;;  %v631_v6 = vrot.slane %v517_v15, 2  ;;  %v1068_v19 = vmul.f32 %v2081_v21, %v2680_v59  ;;  %v751_v28 = vmul.f32 %v2068_v11, %v2652_v42 }
  0xbd   : > { %1848 = vst.msk [vmem:[%s2156_s5 + $0x78] sm:$0xff] %vm1832_vm2, %v1815_v25  ;;  %v1266_v27 = vadd.f32 %v1180_v46, %v1024_v53  ;;  %v939_v36 = vrot.slane %v826_v33, 1  ;;  %v1376_v45 = vmul.f32 %v2100_v35, %v2761_v24  ;;  %v1618_v13 = vmul.f32 %v2110_v41, %v2761_v24  ;;  %v2808_v33 = vld [vmem:[%s2044_s26 + $0x108] sm:$0xff] }
  0xbe   : > { %v389_v51 = vsel %vm344_vm0, %v386_v23, %v388_v57  ;;  %v632_v39 = vsel %vm587_vm1, %v629_v55, %v631_v6  ;;  %v1181_v14 = vrot.slane %v1068_v19, 2  ;;  %v1730_v62 = vsel %vm587_vm1, %v1728_v30, %v1729_v10 }
  0xbf   : > { %v1332_v52 = vadd.f32 %v1300_v17, %v1266_v27  ;;  %v474_v38 = vadd.f32 %v389_v51, %v231_v8  ;;  %v1301_v20 = vmul.f32 %v2090_v29, %v2727_v60  ;;  %v940_v16 = vsel %vm344_vm0, %v937_v58, %v939_v36 }
  0xc0   : > { %v1182_v56 = vsel %vm587_vm1, %v1179_v31, %v1181_v14  ;;  %v1489_v5 = vrot.slane %v1376_v45, 1  ;;  %v275_v23 = vmul.f32 %v2052_v3, %v2649_v40  ;;  %v1731_v32 = vrot.slane %v1618_v13, 2 }
  0xc1   : > { %v1574_v55 = vadd.f32 %v1488_v34, %v1332_v52  ;;  %v717_v44 = vadd.f32 %v632_v39, %v474_v38  ;;  %v276_v49 = vmul.f32 %v2052_v3, %v2652_v42  ;;  %v232_v43 = vmul.f32 %v2046_v0, %v2649_v40  ;;  %v2811_v34 = vld [vmem:[%s2044_s26 + $0x110] sm:$0xff] }
  0xc2   : > { %v390_v37 = vrot.slane %v275_v23, 1  ;;  %v518_v58 = vmul.f32 %v2059_v7, %v2649_v40  ;;  %v519_v31 = vmul.f32 %v2059_v7, %v2652_v42  ;;  %v752_v18 = vmul.f32 %v2068_v11, %v2724_v63 }
  0xc3   : > { %v1816_v48 = vadd.f32 %v1730_v62, %v1574_v55  ;;  %v783_v61 = vadd.f32 %v751_v28, %v717_v44  ;;  %v391_v9 = vrot.slane %v276_v49, 1  ;;  %v827_v54 = vmul.f32 %v2070_v12, %v2724_v63 }
  0xc4   : > { %v633_v47 = vrot.slane %v518_v58, 2  ;;  %v634_v1 = vrot.slane %v519_v31, 2  ;;  %v828_v26 = vmul.f32 %v2070_v12, %v2727_v60  ;;  %v1069_v46 = vmul.f32 %v2081_v21, %v2724_v63 }
  0xc5   : > { %1849 = vst.msk [vmem:[%s2156_s5 + $0x80] sm:$0xff] %vm1832_vm2, %v1816_v48  ;;  %v1025_v40 = vadd.f32 %v940_v16, %v783_v61  ;;  %v392_v50 = vsel %vm344_vm0, %v390_v37, %v391_v9  ;;  %v1070_v17 = vmul.f32 %v2081_v21, %v2727_v60  ;;  %v941_v2 = vrot.slane %v827_v54, 1  ;;  %v2839_v37 = vld [vmem:[%s2044_s26 + $0x118] sm:$0x3] }
  0xc6   : > { %v475_v30 = vadd.f32 %v392_v50, %v232_v43  ;;  %v635_v8 = vsel %vm587_vm1, %v633_v47, %v634_v1  ;;  %v942_v15 = vrot.slane %v828_v26, 1  ;;  %v1490_v53 = vsel %vm344_vm0, %v1487_v22, %v1489_v5 }
  0xc7   : > { %v1267_v25 = vadd.f32 %v1182_v56, %v1025_v40  ;;  %v1183_v57 = vrot.slane %v1069_v46, 2  ;;  %v1184_v6 = vrot.slane %v1070_v17, 2  ;;  %v1732_v19 = vsel %vm587_vm1, %v1729_v10, %v1731_v32 }
  0xc8   : > { %v718_v27 = vadd.f32 %v635_v8, %v475_v30  ;;  %v1377_v28 = vmul.f32 %v2100_v35, %v2808_v33  ;;  %v1378_v36 = vmul.f32 %v2100_v35, %v2811_v34  ;;  %v943_v4 = vsel %vm344_vm0, %v941_v2, %v942_v15 }
  0xc9   : > { %v1333_v45 = vadd.f32 %v1301_v20, %v1267_v25  ;;  %v1619_v22 = vmul.f32 %v2110_v41, %v2808_v33  ;;  %v2823_v51 = vmul.f32 %v2110_v41, %v2811_v34  ;;  %v1302_v10 = vmul.f32 %v2090_v29, %v2808_v33 }
  0xca   : > { %v784_v39 = vadd.f32 %v752_v18, %v718_v27  ;;  %v1491_v14 = vrot.slane %v1377_v28, 1  ;;  %v1492_v13 = vrot.slane %v1378_v36, 1  ;;  %v1185_v62 = vsel %vm587_vm1, %v1183_v57, %v1184_v6 }
  0xcb   : > { %v1575_v52 = vadd.f32 %v1490_v53, %v1333_v45  ;;  %v233_v38 = vmul.f32 %v2046_v0, %v2652_v42  ;;  %v277_v20 = vmul.f32 %v2052_v3, %v2680_v59  ;;  %v1733_v56 = vrot.slane %v1619_v22, 2 }
  0xcc   : > { %v1026_v16 = vadd.f32 %v943_v4, %v784_v39  ;;  %v1734_v5 = vrot.slane %v2823_v51, 2  ;;  %v520_v23 = vmul.f32 %v2059_v7, %v2680_v59  ;;  %v1493_v44 = vsel %vm344_vm0, %v1491_v14, %v1492_v13 }
  0xcd   : > { %v1817_v55 = vadd.f32 %v1732_v19, %v1575_v52  ;;  %v393_v32 = vrot.slane %v277_v20, 1  ;;  %v829_v49 = vmul.f32 %v2070_v12, %v2761_v24  ;;  %v753_v58 = vmul.f32 %v2068_v11, %v2727_v60  ;;  %v2883_v20 = vld [vmem:[%s2044_s26 + $0x120] sm:$0xff] }
  0xce   : > { %v1268_v43 = vadd.f32 %v1185_v62, %v1026_v16  ;;  %v636_v42 = vrot.slane %v520_v23, 2  ;;  %v1071_v31 = vmul.f32 %v2081_v21, %v2761_v24  ;;  %v1379_v61 = vmul.f32 %v2100_v35, %v2839_v37  ;;  %v2886_v16 = vld [vmem:[%s2044_s26 + $0x128] sm:$0xff] }
  0xcf   : > { %1850 = vst.msk [vmem:[%s2156_s5 + $0x88] sm:$0xff] %vm1832_vm2, %v1817_v55  ;;  %v394_v59 = vsel %vm344_vm0, %v391_v9, %v393_v32  ;;  %v944_v48 = vrot.slane %v829_v49, 1  ;;  %v1621_v18 = vmul.f32 %v2110_v41, %v2839_v37  ;;  %v1735_v50 = vsel %vm587_vm1, %v1733_v56, %v1734_v5 }
  0xd0   : > { %v1334_v47 = vadd.f32 %v1302_v10, %v1268_v43  ;;  %v476_v54 = vadd.f32 %v394_v59, %v233_v38  ;;  %v637_v26 = vsel %vm587_vm1, %v634_v1, %v636_v42  ;;  %v1186_v40 = vrot.slane %v1071_v31, 2 }
  0xd1   : > { %v945_v46 = vsel %vm344_vm0, %v942_v15, %v944_v48  ;;  %v1303_v17 = vmul.f32 %v2090_v29, %v2811_v34  ;;  %v1494_v9 = vrot.slane %v1379_v61, 1  ;;  %v1736_v2 = vrot.slane %v1621_v18, 2 }
  0xd2   : > { %v1576_v30 = vadd.f32 %v1493_v44, %v1334_v47  ;;  %v719_v8 = vadd.f32 %v637_v26, %v476_v54  ;;  %v278_v25 = vmul.f32 %v2052_v3, %v2724_v63  ;;  %v1187_v53 = vsel %vm587_vm1, %v1184_v6, %v1186_v40 }
  0xd3   : > { %v234_v1 = vmul.f32 %v2046_v0, %v2724_v63  ;;  %v279_v57 = vmul.f32 %v2052_v3, %v2727_v60  ;;  %v521_v15 = vmul.f32 %v2059_v7, %v2724_v63  ;;  %v522_v36 = vmul.f32 %v2059_v7, %v2727_v60 }
  0xd4   : > { %v1818_v19 = vadd.f32 %v1735_v50, %v1576_v30  ;;  %v785_v27 = vadd.f32 %v753_v58, %v719_v8  ;;  %v395_v28 = vrot.slane %v278_v25, 1  ;;  %v1495_v45 = vsel %vm344_vm0, %v1492_v13, %v1494_v9 }
  0xd5   : > { %v396_v6 = vrot.slane %v279_v57, 1  ;;  %v638_v4 = vrot.slane %v521_v15, 2  ;;  %v830_v22 = vmul.f32 %v2070_v12, %v2808_v33  ;;  %v639_v39 = vrot.slane %v522_v36, 2 }
  0xd6   : > { %1851 = vst.msk [vmem:[%s2156_s5 + $0x90] sm:$0xff] %vm1832_vm2, %v1818_v19  ;;  %v1027_v51 = vadd.f32 %v945_v46, %v785_v27  ;;  %v831_v63 = vmul.f32 %v2070_v12, %v2811_v34  ;;  %v1072_v10 = vmul.f32 %v2081_v21, %v2808_v33  ;;  %v754_v13 = vmul.f32 %v2068_v11, %v2808_v33 }
  0xd7   : > { %v397_v14 = vsel %vm344_vm0, %v395_v28, %v396_v6  ;;  %v946_v52 = vrot.slane %v830_v22, 1  ;;  %v1073_v62 = vmul.f32 %v2081_v21, %v2811_v34  ;;  %v640_v23 = vsel %vm587_vm1, %v638_v4, %v639_v39 }
  0xd8   : > { %v1269_v38 = vadd.f32 %v1187_v53, %v1027_v51  ;;  %v477_v56 = vadd.f32 %v397_v14, %v234_v1  ;;  %v947_v55 = vrot.slane %v831_v63, 1  ;;  %v1188_v44 = vrot.slane %v1072_v10, 2  ;;  %v2920_v1 = vld [vmem:[%s2044_s26 + $0x130] sm:$0x3] }
  0xd9   : > { %v1189_v32 = vrot.slane %v1073_v62, 2  ;;  %v1380_v49 = vmul.f32 %v2100_v35, %v2883_v20  ;;  %v2893_v43 = vmul.f32 %v2100_v35, %v2886_v16  ;;  %v1737_v58 = vsel %vm587_vm1, %v1734_v5, %v1736_v2 }
  0xda   : > { %v1335_v42 = vadd.f32 %v1303_v17, %v1269_v38  ;;  %v720_v31 = vadd.f32 %v640_v23, %v477_v56  ;;  %v1622_v59 = vmul.f32 %v2110_v41, %v2883_v20  ;;  %v948_v48 = vsel %vm344_vm0, %v946_v52, %v947_v55 }
  0xdb   : > { %v1496_v61 = vrot.slane %v1380_v49, 1  ;;  %v1497_v18 = vrot.slane %v2893_v43, 1  ;;  %v2902_v47 = vmul.f32 %v2110_v41, %v2886_v16  ;;  %v1190_v40 = vsel %vm587_vm1, %v1188_v44, %v1189_v32 }
  0xdc   : > { %v1577_v54 = vadd.f32 %v1495_v45, %v1335_v42  ;;  %v786_v26 = vadd.f32 %v754_v13, %v720_v31  ;;  %v1304_v5 = vmul.f32 %v2090_v29, %v2883_v20  ;;  %v1738_v50 = vrot.slane %v1622_v59, 2 }
  0xdd   : > { %v235_v46 = vmul.f32 %v2046_v0, %v2727_v60  ;;  %v280_v17 = vmul.f32 %v2052_v3, %v2761_v24  ;;  %v523_v9 = vmul.f32 %v2059_v7, %v2761_v24  ;;  %v1739_v2 = vrot.slane %v2902_v47, 2 }
  0xde   : > { %v1819_v30 = vadd.f32 %v1737_v58, %v1577_v54  ;;  %v1028_v8 = vadd.f32 %v948_v48, %v786_v26  ;;  %v832_v25 = vmul.f32 %v2070_v12, %v2839_v37  ;;  %v1498_v53 = vsel %vm344_vm0, %v1496_v61, %v1497_v18 }
  0xdf   : > { %v398_v60 = vrot.slane %v280_v17, 1  ;;  %v641_v57 = vrot.slane %v523_v9, 2  ;;  %v1074_v15 = vmul.f32 %v2081_v21, %v2839_v37  ;;  %v755_v19 = vmul.f32 %v2068_v11, %v2811_v34 }
  0xe0   : > { %1852 = vst.msk [vmem:[%s2156_s5 + $0x98] sm:$0xff] %vm1832_vm2, %v1819_v30  ;;  %v1270_v24 = vadd.f32 %v1190_v40, %v1028_v8  ;;  %v949_v27 = vrot.slane %v832_v25, 1  ;;  %v1382_v28 = vmul.f32 %v2100_v35, %v2920_v1  ;;  %v1624_v22 = vmul.f32 %v2110_v41, %v2920_v1  ;;  %v2967_v25 = vld [vmem:[%s2044_s26 + $0x138] sm:$0xff] }
  0xe1   : > { %v399_v36 = vsel %vm344_vm0, %v396_v6, %v398_v60  ;;  %v642_v45 = vsel %vm587_vm1, %v639_v39, %v641_v57  ;;  %v1191_v4 = vrot.slane %v1074_v15, 2  ;;  %v1740_v63 = vsel %vm587_vm1, %v1738_v50, %v1739_v2 }
  0xe2   : > { %v1336_v51 = vadd.f32 %v1304_v5, %v1270_v24  ;;  %v478_v10 = vadd.f32 %v399_v36, %v235_v46  ;;  %v1305_v14 = vmul.f32 %v2090_v29, %v2886_v16  ;;  %v950_v13 = vsel %vm344_vm0, %v947_v55, %v949_v27 }
  0xe3   : > { %v1192_v52 = vsel %vm587_vm1, %v1189_v32, %v1191_v4  ;;  %v1499_v62 = vrot.slane %v1382_v28, 1  ;;  %v281_v6 = vmul.f32 %v2052_v3, %v2808_v33  ;;  %v1741_v56 = vrot.slane %v1624_v22, 2 }
  0xe4   : > { %v1578_v39 = vadd.f32 %v1498_v53, %v1336_v51  ;;  %v721_v38 = vadd.f32 %v642_v45, %v478_v10  ;;  %v282_v23 = vmul.f32 %v2052_v3, %v2811_v34  ;;  %v236_v44 = vmul.f32 %v2046_v0, %v2808_v33  ;;  %v2970_v53 = vld [vmem:[%s2044_s26 + $0x140] sm:$0xff] }
  0xe5   : > { %v400_v49 = vrot.slane %v281_v6, 1  ;;  %v524_v55 = vmul.f32 %v2059_v7, %v2808_v33  ;;  %v525_v32 = vmul.f32 %v2059_v7, %v2811_v34  ;;  %v756_v59 = vmul.f32 %v2068_v11, %v2883_v20 }
  0xe6   : > { %v1820_v42 = vadd.f32 %v1740_v63, %v1578_v39  ;;  %v787_v58 = vadd.f32 %v755_v19, %v721_v38  ;;  %v401_v31 = vrot.slane %v282_v23, 1  ;;  %v833_v47 = vmul.f32 %v2070_v12, %v2883_v20 }
  0xe7   : > { %v643_v48 = vrot.slane %v524_v55, 2  ;;  %v644_v61 = vrot.slane %v525_v32, 2  ;;  %v834_v54 = vmul.f32 %v2070_v12, %v2886_v16  ;;  %v1075_v40 = vmul.f32 %v2081_v21, %v2883_v20 }
  0xe8   : > { %1853 = vst.msk [vmem:[%s2156_s5 + $0xa0] sm:$0xff] %vm1832_vm2, %v1820_v42  ;;  %v1029_v33 = vadd.f32 %v950_v13, %v787_v58  ;;  %v402_v26 = vsel %vm344_vm0, %v400_v49, %v401_v31  ;;  %v1076_v5 = vmul.f32 %v2081_v21, %v2886_v16  ;;  %v951_v17 = vrot.slane %v833_v47, 1  ;;  %v2998_v49 = vld [vmem:[%s2044_s26 + $0x148] sm:$0x3] }
  0xe9   : > { %v479_v50 = vadd.f32 %v402_v26, %v236_v44  ;;  %v645_v46 = vsel %vm587_vm1, %v643_v48, %v644_v61  ;;  %v952_v9 = vrot.slane %v834_v54, 1  ;;  %v1500_v8 = vsel %vm344_vm0, %v1497_v18, %v1499_v62 }
  0xea   : > { %v1271_v30 = vadd.f32 %v1192_v52, %v1029_v33  ;;  %v1193_v60 = vrot.slane %v1075_v40, 2  ;;  %v1194_v57 = vrot.slane %v1076_v5, 2  ;;  %v1742_v15 = vsel %vm587_vm1, %v1739_v2, %v1741_v56 }
  0xeb   : > { %v722_v24 = vadd.f32 %v645_v46, %v479_v50  ;;  %v1383_v19 = vmul.f32 %v2100_v35, %v2967_v25  ;;  %v1384_v27 = vmul.f32 %v2100_v35, %v2970_v53  ;;  %v953_v43 = vsel %vm344_vm0, %v951_v17, %v952_v9 }
  0xec   : > { %v1337_v28 = vadd.f32 %v1305_v14, %v1271_v30  ;;  %v1625_v18 = vmul.f32 %v2110_v41, %v2967_v25  ;;  %v2982_v36 = vmul.f32 %v2110_v41, %v2970_v53  ;;  %v1306_v2 = vmul.f32 %v2090_v29, %v2967_v25 }
  0xed   : > { %v788_v45 = vadd.f32 %v756_v59, %v722_v24  ;;  %v1501_v4 = vrot.slane %v1383_v19, 1  ;;  %v1502_v22 = vrot.slane %v1384_v27, 1  ;;  %v1195_v63 = vsel %vm587_vm1, %v1193_v60, %v1194_v57 }
  0xee   : > { %v1579_v51 = vadd.f32 %v1500_v8, %v1337_v28  ;;  %v237_v10 = vmul.f32 %v2046_v0, %v2811_v34  ;;  %v283_v14 = vmul.f32 %v2052_v3, %v2839_v37  ;;  %v1743_v52 = vrot.slane %v1625_v18, 2 }
  0xef   : > { %v1030_v13 = vadd.f32 %v953_v43, %v788_v45  ;;  %v1744_v62 = vrot.slane %v2982_v36, 2  ;;  %v526_v6 = vmul.f32 %v2059_v7, %v2839_v37  ;;  %v1503_v38 = vsel %vm344_vm0, %v1501_v4, %v1502_v22 }
  0xf0   : > { %v1821_v39 = vadd.f32 %v1742_v15, %v1579_v51  ;;  %v403_v56 = vrot.slane %v283_v14, 1  ;;  %v835_v23 = vmul.f32 %v2070_v12, %v2920_v1  ;;  %v757_v55 = vmul.f32 %v2068_v11, %v2886_v16  ;;  %v3042_v14 = vld [vmem:[%s2044_s26 + $0x150] sm:$0xff] }
  0xf1   : > { %v1272_v44 = vadd.f32 %v1195_v63, %v1030_v13  ;;  %v646_v34 = vrot.slane %v526_v6, 2  ;;  %v1077_v32 = vmul.f32 %v2081_v21, %v2920_v1  ;;  %v1385_v58 = vmul.f32 %v2100_v35, %v2998_v49  ;;  %v3045_v13 = vld [vmem:[%s2044_s26 + $0x158] sm:$0xff] }
  0xf2   : > { %1854 = vst.msk [vmem:[%s2156_s5 + $0xa8] sm:$0xff] %vm1832_vm2, %v1821_v39  ;;  %v404_v37 = vsel %vm344_vm0, %v401_v31, %v403_v56  ;;  %v954_v42 = vrot.slane %v835_v23, 1  ;;  %v1627_v59 = vmul.f32 %v2110_v41, %v2998_v49  ;;  %v1745_v26 = vsel %vm587_vm1, %v1743_v52, %v1744_v62 }
  0xf3   : > { %v1338_v48 = vadd.f32 %v1306_v2, %v1272_v44  ;;  %v480_v47 = vadd.f32 %v404_v37, %v237_v10  ;;  %v647_v54 = vsel %vm587_vm1, %v644_v61, %v646_v34  ;;  %v1196_v33 = vrot.slane %v1077_v32, 2 }
  0xf4   : > { %v955_v40 = vsel %vm344_vm0, %v952_v9, %v954_v42  ;;  %v1307_v5 = vmul.f32 %v2090_v29, %v2970_v53  ;;  %v1504_v31 = vrot.slane %v1385_v58, 1  ;;  %v1746_v17 = vrot.slane %v1627_v59, 2 }
  0xf5   : > { %v1580_v50 = vadd.f32 %v1503_v38, %v1338_v48  ;;  %v723_v46 = vadd.f32 %v647_v54, %v480_v47  ;;  %v284_v30 = vmul.f32 %v2052_v3, %v2883_v20  ;;  %v1197_v8 = vsel %vm587_vm1, %v1194_v57, %v1196_v33 }
  0xf6   : > { %v238_v61 = vmul.f32 %v2046_v0, %v2883_v20  ;;  %v285_v60 = vmul.f32 %v2052_v3, %v2886_v16  ;;  %v527_v9 = vmul.f32 %v2059_v7, %v2883_v20  ;;  %v528_v27 = vmul.f32 %v2059_v7, %v2886_v16 }
  0xf7   : > { %v1822_v15 = vadd.f32 %v1745_v26, %v1580_v50  ;;  %v789_v24 = vadd.f32 %v757_v55, %v723_v46  ;;  %v405_v19 = vrot.slane %v284_v30, 1  ;;  %v1505_v28 = vsel %vm344_vm0, %v1502_v22, %v1504_v31 }
  0xf8   : > { %v406_v57 = vrot.slane %v285_v60, 1  ;;  %v648_v43 = vrot.slane %v527_v9, 2  ;;  %v836_v18 = vmul.f32 %v2070_v12, %v2967_v25  ;;  %v649_v45 = vrot.slane %v528_v27, 2 }
  0xf9   : > { %1855 = vst.msk [vmem:[%s2156_s5 + $0xb0] sm:$0xff] %vm1832_vm2, %v1822_v15  ;;  %v1031_v36 = vadd.f32 %v955_v40, %v789_v24  ;;  %v837_v20 = vmul.f32 %v2070_v12, %v2970_v53  ;;  %v1078_v2 = vmul.f32 %v2081_v21, %v2967_v25  ;;  %v758_v22 = vmul.f32 %v2068_v11, %v2967_v25 }
  0xfa   : > { %v407_v4 = vsel %vm344_vm0, %v405_v19, %v406_v57  ;;  %v956_v51 = vrot.slane %v836_v18, 1  ;;  %v1079_v63 = vmul.f32 %v2081_v21, %v2970_v53  ;;  %v650_v6 = vsel %vm587_vm1, %v648_v43, %v649_v45 }
  0xfb   : > { %v1273_v10 = vadd.f32 %v1197_v8, %v1031_v36  ;;  %v481_v52 = vadd.f32 %v407_v4, %v238_v61  ;;  %v957_v39 = vrot.slane %v837_v20, 1  ;;  %v1198_v38 = vrot.slane %v1078_v2, 2  ;;  %v3079_v61 = vld [vmem:[%s2044_s26 + $0x160] sm:$0x3] }
  0xfc   : > { %v1199_v56 = vrot.slane %v1079_v63, 2  ;;  %v1386_v23 = vmul.f32 %v2100_v35, %v3042_v14  ;;  %v3052_v44 = vmul.f32 %v2100_v35, %v3045_v13  ;;  %v1747_v55 = vsel %vm587_vm1, %v1744_v62, %v1746_v17 }
  0xfd   : > { %v1339_v34 = vadd.f32 %v1307_v5, %v1273_v10  ;;  %v724_v32 = vadd.f32 %v650_v6, %v481_v52  ;;  %v1628_v37 = vmul.f32 %v2110_v41, %v3042_v14  ;;  %v958_v42 = vsel %vm344_vm0, %v956_v51, %v957_v39 }
  0xfe   : > { %v1506_v58 = vrot.slane %v1386_v23, 1  ;;  %v1507_v59 = vrot.slane %v3052_v44, 1  ;;  %v3061_v48 = vmul.f32 %v2110_v41, %v3045_v13  ;;  %v1200_v33 = vsel %vm587_vm1, %v1198_v38, %v1199_v56 }
  0xff   : > { %v1581_v47 = vadd.f32 %v1505_v28, %v1339_v34  ;;  %v790_v54 = vadd.f32 %v758_v22, %v724_v32  ;;  %v1308_v62 = vmul.f32 %v2090_v29, %v3042_v14  ;;  %v1748_v26 = vrot.slane %v1628_v37, 2 }
 0x100   : > { %v239_v40 = vmul.f32 %v2046_v0, %v2886_v16  ;;  %v286_v5 = vmul.f32 %v2052_v3, %v2920_v1  ;;  %v529_v31 = vmul.f32 %v2059_v7, %v2920_v1  ;;  %v1749_v17 = vrot.slane %v3061_v48, 2 }
 0x101   : > { %v1823_v50 = vadd.f32 %v1747_v55, %v1581_v47  ;;  %v1032_v46 = vadd.f32 %v958_v42, %v790_v54  ;;  %v838_v30 = vmul.f32 %v2070_v12, %v2998_v49  ;;  %v1508_v8 = vsel %vm344_vm0, %v1506_v58, %v1507_v59 }
 0x102   : > { %v408_v16 = vrot.slane %v286_v5, 1  ;;  %v651_v60 = vrot.slane %v529_v31, 2  ;;  %v1080_v9 = vmul.f32 %v2081_v21, %v2998_v49  ;;  %v759_v15 = vmul.f32 %v2068_v11, %v2970_v53 }
 0x103   : > { %1856 = vst.msk [vmem:[%s2156_s5 + $0xb8] sm:$0xff] %vm1832_vm2, %v1823_v50  ;;  %v1274_v1 = vadd.f32 %v1200_v33, %v1032_v46  ;;  %v959_v24 = vrot.slane %v838_v30, 1  ;;  %v1388_v19 = vmul.f32 %v2100_v35, %v3079_v61  ;;  %v1630_v18 = vmul.f32 %v2110_v41, %v3079_v61  ;;  %v3126_v30 = vld [vmem:[%s2044_s26 + $0x168] sm:$0xff] }
 0x104   : > { %v409_v27 = vsel %vm344_vm0, %v406_v57, %v408_v16  ;;  %v652_v28 = vsel %vm587_vm1, %v649_v45, %v651_v60  ;;  %v1201_v43 = vrot.slane %v1080_v9, 2  ;;  %v1750_v20 = vsel %vm587_vm1, %v1748_v26, %v1749_v17 }
 0x105   : > { %v1340_v36 = vadd.f32 %v1308_v62, %v1274_v1  ;;  %v482_v2 = vadd.f32 %v409_v27, %v239_v40  ;;  %v1309_v4 = vmul.f32 %v2090_v29, %v3045_v13  ;;  %v960_v22 = vsel %vm344_vm0, %v957_v39, %v959_v24 }
 0x106   : > { %v1202_v51 = vsel %vm587_vm1, %v1199_v56, %v1201_v43  ;;  %v1509_v63 = vrot.slane %v1388_v19, 1  ;;  %v287_v57 = vmul.f32 %v2052_v3, %v2967_v25  ;;  %v1751_v52 = vrot.slane %v1630_v18, 2 }
 0x107   : > { %v1582_v45 = vadd.f32 %v1508_v8, %v1340_v36  ;;  %v725_v10 = vadd.f32 %v652_v28, %v482_v2  ;;  %v288_v6 = vmul.f32 %v2052_v3, %v2970_v53  ;;  %v240_v38 = vmul.f32 %v2046_v0, %v2967_v25  ;;  %v3129_v8 = vld [vmem:[%s2044_s26 + $0x170] sm:$0xff] }
 0x108   : > { %v410_v23 = vrot.slane %v287_v57, 1  ;;  %v530_v39 = vmul.f32 %v2059_v7, %v2967_v25  ;;  %v531_v56 = vmul.f32 %v2059_v7, %v2970_v53  ;;  %v760_v37 = vmul.f32 %v2068_v11, %v3042_v14 }
 0x109   : > { %v1824_v34 = vadd.f32 %v1750_v20, %v1582_v45  ;;  %v791_v55 = vadd.f32 %v759_v15, %v725_v10  ;;  %v411_v32 = vrot.slane %v288_v6, 1  ;;  %v839_v48 = vmul.f32 %v2070_v12, %v3042_v14 }
 0x10a   : > { %v653_v42 = vrot.slane %v530_v39, 2  ;;  %v654_v58 = vrot.slane %v531_v56, 2  ;;  %v840_v47 = vmul.f32 %v2070_v12, %v3045_v13  ;;  %v1081_v33 = vmul.f32 %v2081_v21, %v3042_v14 }
 0x10b   : > { %1857 = vst.msk [vmem:[%s2156_s5 + $0xc0] sm:$0xff] %vm1832_vm2, %v1824_v34  ;;  %v1033_v25 = vadd.f32 %v960_v22, %v791_v55  ;;  %v412_v54 = vsel %vm344_vm0, %v410_v23, %v411_v32  ;;  %v1082_v62 = vmul.f32 %v2081_v21, %v3045_v13  ;;  %v961_v5 = vrot.slane %v839_v48, 1  ;;  %v3157_v23 = vld [vmem:[%s2044_s26 + $0x178] sm:$0x3] }
 0x10c   : > { %v483_v26 = vadd.f32 %v412_v54, %v240_v38  ;;  %v655_v40 = vsel %vm587_vm1, %v653_v42, %v654_v58  ;;  %v962_v31 = vrot.slane %v840_v47, 1  ;;  %v1510_v46 = vsel %vm344_vm0, %v1507_v59, %v1509_v63 }
 0x10d   : > { %v1275_v50 = vadd.f32 %v1202_v51, %v1033_v25  ;;  %v1203_v16 = vrot.slane %v1081_v33, 2  ;;  %v1204_v60 = vrot.slane %v1082_v62, 2  ;;  %v1752_v9 = vsel %vm587_vm1, %v1749_v17, %v1751_v52 }
 0x10e   : > { %v726_v1 = vadd.f32 %v655_v40, %v483_v26  ;;  %v1389_v15 = vmul.f32 %v2100_v35, %v3126_v30  ;;  %v1390_v24 = vmul.f32 %v2100_v35, %v3129_v8  ;;  %v963_v44 = vsel %vm344_vm0, %v961_v5, %v962_v31 }
 0x10f   : > { %v1341_v19 = vadd.f32 %v1309_v4, %v1275_v50  ;;  %v1631_v59 = vmul.f32 %v2110_v41, %v3126_v30  ;;  %v3141_v27 = vmul.f32 %v2110_v41, %v3129_v8  ;;  %v1310_v17 = vmul.f32 %v2090_v29, %v3126_v30 }
 0x110   : > { %v792_v28 = vadd.f32 %v760_v37, %v726_v1  ;;  %v1511_v43 = vrot.slane %v1389_v15, 1  ;;  %v1512_v18 = vrot.slane %v1390_v24, 1  ;;  %v1205_v20 = vsel %vm587_vm1, %v1203_v16, %v1204_v60 }
 0x111   : > { %v1583_v36 = vadd.f32 %v1510_v46, %v1341_v19  ;;  %v241_v2 = vmul.f32 %v2046_v0, %v2970_v53  ;;  %v289_v4 = vmul.f32 %v2052_v3, %v2998_v49  ;;  %v1753_v51 = vrot.slane %v1631_v59, 2 }
 0x112   : > { %v1034_v22 = vadd.f32 %v963_v44, %v792_v28  ;;  %v1754_v63 = vrot.slane %v3141_v27, 2  ;;  %v532_v57 = vmul.f32 %v2059_v7, %v2998_v49  ;;  %v1513_v10 = vsel %vm344_vm0, %v1511_v43, %v1512_v18 }
 0x113   : > { %v1825_v45 = vadd.f32 %v1752_v9, %v1583_v36  ;;  %v413_v52 = vrot.slane %v289_v4, 1  ;;  %v841_v6 = vmul.f32 %v2070_v12, %v3079_v61  ;;  %v761_v39 = vmul.f32 %v2068_v11, %v3045_v13  ;;  %v3201_v4 = vld [vmem:[%s2044_s26 + $0x180] sm:$0xff] }
 0x114   : > { %v1276_v38 = vadd.f32 %v1205_v20, %v1034_v22  ;;  %v656_v53 = vrot.slane %v532_v57, 2  ;;  %v1083_v56 = vmul.f32 %v2081_v21, %v3079_v61  ;;  %v1391_v55 = vmul.f32 %v2100_v35, %v3157_v23  ;;  %v3204_v22 = vld [vmem:[%s2044_s26 + $0x188] sm:$0xff] }
 0x115   : > { %1858 = vst.msk [vmem:[%s2156_s5 + $0xc8] sm:$0xff] %vm1832_vm2, %v1825_v45  ;;  %v414_v49 = vsel %vm344_vm0, %v411_v32, %v413_v52  ;;  %v964_v34 = vrot.slane %v841_v6, 1  ;;  %v1633_v37 = vmul.f32 %v2110_v41, %v3157_v23  ;;  %v1755_v54 = vsel %vm587_vm1, %v1753_v51, %v1754_v63 }
 0x116   : > { %v1342_v42 = vadd.f32 %v1310_v17, %v1276_v38  ;;  %v484_v48 = vadd.f32 %v414_v49, %v241_v2  ;;  %v657_v47 = vsel %vm587_vm1, %v654_v58, %v656_v53  ;;  %v1206_v25 = vrot.slane %v1083_v56, 2 }
 0x117   : > { %v965_v33 = vsel %vm344_vm0, %v962_v31, %v964_v34  ;;  %v1311_v62 = vmul.f32 %v2090_v29, %v3129_v8  ;;  %v1514_v32 = vrot.slane %v1391_v55, 1  ;;  %v1756_v5 = vrot.slane %v1633_v37, 2 }
 0x118   : > { %v1584_v26 = vadd.f32 %v1513_v10, %v1342_v42  ;;  %v727_v40 = vadd.f32 %v657_v47, %v484_v48  ;;  %v290_v50 = vmul.f32 %v2052_v3, %v3042_v14  ;;  %v1207_v46 = vsel %vm587_vm1, %v1204_v60, %v1206_v25 }
 0x119   : > { %v242_v58 = vmul.f32 %v2046_v0, %v3042_v14  ;;  %v291_v16 = vmul.f32 %v2052_v3, %v3045_v13  ;;  %v533_v31 = vmul.f32 %v2059_v7, %v3042_v14  ;;  %v534_v24 = vmul.f32 %v2059_v7, %v3045_v13 }
 0x11a   : > { %v1826_v9 = vadd.f32 %v1755_v54, %v1584_v26  ;;  %v793_v1 = vadd.f32 %v761_v39, %v727_v40  ;;  %v415_v15 = vrot.slane %v290_v50, 1  ;;  %v1515_v19 = vsel %vm344_vm0, %v1512_v18, %v1514_v32 }
 0x11b   : > { %v416_v60 = vrot.slane %v291_v16, 1  ;;  %v658_v44 = vrot.slane %v533_v31, 2  ;;  %v842_v59 = vmul.f32 %v2070_v12, %v3126_v30  ;;  %v659_v28 = vrot.slane %v534_v24, 2 }
 0x11c   : > { %1859 = vst.msk [vmem:[%s2156_s5 + $0xd0] sm:$0xff] %vm1832_vm2, %v1826_v9  ;;  %v1035_v27 = vadd.f32 %v965_v33, %v793_v1  ;;  %v843_v14 = vmul.f32 %v2070_v12, %v3129_v8  ;;  %v1084_v17 = vmul.f32 %v2081_v21, %v3126_v30  ;;  %v762_v18 = vmul.f32 %v2068_v11, %v3126_v30 }
 0x11d   : > { %v417_v43 = vsel %vm344_vm0, %v415_v15, %v416_v60  ;;  %v966_v36 = vrot.slane %v842_v59, 1  ;;  %v1085_v20 = vmul.f32 %v2081_v21, %v3129_v8  ;;  %v660_v57 = vsel %vm587_vm1, %v658_v44, %v659_v28 }
 0x11e   : > { %v1277_v2 = vadd.f32 %v1207_v46, %v1035_v27  ;;  %v485_v51 = vadd.f32 %v417_v43, %v242_v58  ;;  %v967_v45 = vrot.slane %v843_v14, 1  ;;  %v1208_v10 = vrot.slane %v1084_v17, 2  ;;  %v3238_v58 = vld [vmem:[%s2044_s26 + $0x190] sm:$0x3] }
 0x11f   : > { %v1209_v52 = vrot.slane %v1085_v20, 2  ;;  %v1392_v6 = vmul.f32 %v2100_v35, %v3201_v4  ;;  %v3211_v38 = vmul.f32 %v2100_v35, %v3204_v22  ;;  %v1757_v39 = vsel %vm587_vm1, %v1754_v63, %v1756_v5 }
 0x120   : > { %v1343_v53 = vadd.f32 %v1311_v62, %v1277_v2  ;;  %v728_v56 = vadd.f32 %v660_v57, %v485_v51  ;;  %v1634_v49 = vmul.f32 %v2110_v41, %v3201_v4  ;;  %v968_v34 = vsel %vm344_vm0, %v966_v36, %v967_v45 }
 0x121   : > { %v1516_v55 = vrot.slane %v1392_v6, 1  ;;  %v1517_v37 = vrot.slane %v3211_v38, 1  ;;  %v3220_v42 = vmul.f32 %v2110_v41, %v3204_v22  ;;  %v1210_v25 = vsel %vm587_vm1, %v1208_v10, %v1209_v52 }
 0x122   : > { %v1585_v48 = vadd.f32 %v1515_v19, %v1343_v53  ;;  %v794_v47 = vadd.f32 %v762_v18, %v728_v56  ;;  %v1312_v63 = vmul.f32 %v2090_v29, %v3201_v4  ;;  %v1758_v54 = vrot.slane %v1634_v49, 2 }
 0x123   : > { %v243_v33 = vmul.f32 %v2046_v0, %v3045_v13  ;;  %v292_v62 = vmul.f32 %v2052_v3, %v3079_v61  ;;  %v535_v32 = vmul.f32 %v2059_v7, %v3079_v61  ;;  %v1759_v5 = vrot.slane %v3220_v42, 2 }
 0x124   : > { %v1827_v26 = vadd.f32 %v1757_v39, %v1585_v48  ;;  %v1036_v40 = vadd.f32 %v968_v34, %v794_v47  ;;  %v844_v50 = vmul.f32 %v2070_v12, %v3157_v23  ;;  %v1518_v46 = vsel %vm344_vm0, %v1516_v55, %v1517_v37 }
 0x125   : > { %v418_v13 = vrot.slane %v292_v62, 1  ;;  %v661_v16 = vrot.slane %v535_v32, 2  ;;  %v1086_v31 = vmul.f32 %v2081_v21, %v3157_v23  ;;  %v763_v9 = vmul.f32 %v2068_v11, %v3129_v8 }
 0x126   : > { %1860 = vst.msk [vmem:[%s2156_s5 + $0xd8] sm:$0xff] %vm1832_vm2, %v1827_v26  ;;  %v1278_v61 = vadd.f32 %v1210_v25, %v1036_v40  ;;  %v969_v1 = vrot.slane %v844_v50, 1  ;;  %v1394_v15 = vmul.f32 %v2100_v35, %v3238_v58  ;;  %v1636_v59 = vmul.f32 %v2110_v41, %v3238_v58  ;;  %v209_v25 = vld [vmem:[%s2044_s26 + $0x198] sm:$0xff] }
 0x127   : > { %v419_v24 = vsel %vm344_vm0, %v416_v60, %v418_v13  ;;  %v662_v19 = vsel %vm587_vm1, %v659_v28, %v661_v16  ;;  %v1211_v44 = vrot.slane %v1086_v31, 2  ;;  %v1760_v14 = vsel %vm587_vm1, %v1758_v54, %v1759_v5 }
 0x128   : > { %v1344_v27 = vadd.f32 %v1312_v63, %v1278_v61  ;;  %v486_v17 = vadd.f32 %v419_v24, %v243_v33  ;;  %v1313_v43 = vmul.f32 %v2090_v29, %v3204_v22  ;;  %v970_v18 = vsel %vm344_vm0, %v967_v45, %v969_v1  ;;  %v210_v63 = vld [vmem:[%s2044_s26 + $0x1a0] sm:$0xff] }
 0x129   : > { %v1212_v36 = vsel %vm587_vm1, %v1209_v52, %v1211_v44  ;;  %v1519_v60 = vrot.slane %v1394_v15, 1  ;;  %v293_v28 = vmul.f32 %v2052_v3, %v3126_v30  ;;  %v1761_v51 = vrot.slane %v1636_v59, 2 }
 0x12a   : > { %v1586_v20 = vadd.f32 %v1518_v46, %v1344_v27  ;;  %v729_v2 = vadd.f32 %v662_v19, %v486_v17  ;;  %v294_v57 = vmul.f32 %v2052_v3, %v3129_v8  ;;  %v244_v10 = vmul.f32 %v2046_v0, %v3126_v30 }
 0x12b   : > { %v420_v6 = vrot.slane %v293_v28, 1  ;;  %v536_v45 = vmul.f32 %v2059_v7, %v3126_v30  ;;  %v537_v52 = vmul.f32 %v2059_v7, %v3129_v8  ;;  %v764_v49 = vmul.f32 %v2068_v11, %v3201_v4 }
 0x12c   : > { %v1828_v53 = vadd.f32 %v1760_v14, %v1586_v20  ;;  %v795_v39 = vadd.f32 %v763_v9, %v729_v2  ;;  %v421_v56 = vrot.slane %v294_v57, 1  ;;  %v845_v48 = vmul.f32 %v2070_v12, %v3201_v4  ;;  %v211_v57 = vld [vmem:[%s2044_s26 + $0x1a8] sm:$0x3] }
 0x12d   : > { %v663_v34 = vrot.slane %v536_v45, 2  ;;  %v664_v55 = vrot.slane %v537_v52, 2  ;;  %v846_v47 = vmul.f32 %v2070_v12, %v3204_v22  ;;  %v1087_v33 = vmul.f32 %v2081_v21, %v3201_v4 }
 0x12e   : > { %1861 = vst.msk [vmem:[%s2156_s5 + $0xe0] sm:$0xff] %vm1832_vm2, %v1828_v53  ;;  %v1037_v30 = vadd.f32 %v970_v18, %v795_v39  ;;  %v422_v54 = vsel %vm344_vm0, %v420_v6, %v421_v56  ;;  %v1088_v62 = vmul.f32 %v2081_v21, %v3204_v22  ;;  %v971_v40 = vrot.slane %v845_v48, 1 }
 0x12f   : > { %v487_v32 = vadd.f32 %v422_v54, %v244_v10  ;;  %v665_v26 = vsel %vm587_vm1, %v663_v34, %v664_v55  ;;  %v972_v50 = vrot.slane %v846_v47, 1  ;;  %v1213_v13 = vrot.slane %v1087_v33, 2 }
 0x130   : > { %v1279_v46 = vadd.f32 %v1212_v36, %v1037_v30  ;;  %v1214_v16 = vrot.slane %v1088_v62, 2  ;;  %v1520_v31 = vsel %vm344_vm0, %v1517_v37, %v1519_v60  ;;  %v1395_v9 = vmul.f32 %v2100_v35, %v209_v25 }
 0x131   : > { %v730_v61 = vadd.f32 %v665_v26, %v487_v32  ;;  %v1396_v4 = vmul.f32 %v2100_v35, %v210_v63  ;;  %v973_v15 = vsel %vm344_vm0, %v971_v40, %v972_v50  ;;  %v1637_v24 = vmul.f32 %v2110_v41, %v209_v25 }
 0x132   : > { %v1345_v1 = vadd.f32 %v1313_v43, %v1279_v46  ;;  %v1638_v19 = vmul.f32 %v2110_v41, %v210_v63  ;;  %v1762_v44 = vsel %vm587_vm1, %v1759_v5, %v1761_v51  ;;  %v1215_v38 = vsel %vm587_vm1, %v1213_v13, %v1214_v16 }
 0x133   : > { %v796_v59 = vadd.f32 %v764_v49, %v730_v61  ;;  %v1314_v37 = vmul.f32 %v2090_v29, %v209_v25  ;;  %v1521_v14 = vrot.slane %v1395_v9, 1  ;;  %v1522_v17 = vrot.slane %v1396_v4, 1 }
 0x134   : > { %v1587_v27 = vadd.f32 %v1520_v31, %v1345_v1  ;;  %v295_v43 = vmul.f32 %v2052_v3, %v3157_v23  ;;  %v1763_v36 = vrot.slane %v1637_v24, 2  ;;  %v245_v42 = vmul.f32 %v2046_v0, %v3129_v8 }
 0x135   : > { %v1038_v18 = vadd.f32 %v973_v15, %v796_v59  ;;  %v538_v5 = vmul.f32 %v2059_v7, %v3157_v23  ;;  %v1764_v28 = vrot.slane %v1638_v19, 2  ;;  %v847_v2 = vmul.f32 %v2070_v12, %v3238_v58 }
 0x136   : > { %v1829_v60 = vadd.f32 %v1762_v44, %v1587_v27  ;;  %v423_v20 = vrot.slane %v295_v43, 1  ;;  %v1089_v3 = vmul.f32 %v2081_v21, %v3238_v58  ;;  %v1523_v6 = vsel %vm344_vm0, %v1521_v14, %v1522_v17 }
 0x137   : > { %v1280_v51 = vadd.f32 %v1215_v38, %v1038_v18  ;;  %v666_v10 = vrot.slane %v538_v5, 2  ;;  %v974_v8 = vrot.slane %v847_v2, 1  ;;  %v765_v12 = vmul.f32 %v2068_v11, %v3204_v22 }
 0x138   : > { %1862 = vst.msk [vmem:[%s2156_s5 + $0xe8] sm:$0xff] %vm1832_vm2, %v1829_v60  ;;  %v424_v0 = vsel %vm344_vm0, %v421_v56, %v423_v20  ;;  %v1765_v52 = vsel %vm587_vm1, %v1763_v36, %v1764_v28  ;;  %v1216_v53 = vrot.slane %v1089_v3, 2  ;;  %v1397_v21 = vmul.f32 %v2100_v35, %v211_v57 }
 0x139   : > { %v1346_v7 = vadd.f32 %v1314_v37, %v1280_v51  ;;  %v488_v23 = vadd.f32 %v424_v0, %v245_v42  ;;  %v667_v45 = vsel %vm587_vm1, %v664_v55, %v666_v10  ;;  %v975_v49 = vsel %vm344_vm0, %v972_v50, %v974_v8 }
 0x13a   : > { %v1639_v56 = vmul.f32 %v2110_v41, %v211_v57  ;;  %v1217_v47 = vsel %vm587_vm1, %v1214_v16, %v1216_v53  ;;  %v1524_v55 = vrot.slane %v1397_v21, 1  ;;  %v1315_v22 = vmul.f32 %v2090_v29, %v210_v63 }
 0x13b   : > { %v1588_v58 = vadd.f32 %v1523_v6, %v1346_v7  ;;  %v731_v39 = vadd.f32 %v667_v45, %v488_v23 }
 0x13c   : > { %v1766_v30 = vrot.slane %v1639_v56, 2  ;;  %v1525_v35 = vsel %vm344_vm0, %v1522_v17, %v1524_v55 }
 0x13d   : > { %v1830_v34 = vadd.f32 %v1765_v52, %v1588_v58  ;;  %v797_v48 = vadd.f32 %v765_v12, %v731_v39 }
 0x13e   : > { %v1767_v33 = vsel %vm587_vm1, %v1764_v28, %v1766_v30 }
 0x13f   : > { %1863 = vst.msk [vmem:[%s2156_s5 + $0xf0] sm:$0xff] %vm1832_vm2, %v1830_v34  ;;  %v1039_v11 = vadd.f32 %v975_v49, %v797_v48 }
 0x141   : > { %v1281_v25 = vadd.f32 %v1217_v47, %v1039_v11 }
 0x143   : > { %v1347_v54 = vadd.f32 %v1315_v22, %v1281_v25 }
 0x145   : > { %v1589_v62 = vadd.f32 %v1525_v35, %v1347_v54 }
 0x147   : > { %v1831_v32 = vadd.f32 %v1767_v33, %v1589_v62 }
 0x149   : > { %1864 = vst.msk [vmem:[%s2156_s5 + $0xf8] sm:$0xff] %vm1832_vm2, %v1831_v32 }
 0x14a PF: > { %s13_s9 = sadd.s32 1, %s1998_s9  }
 0x14b   : > { %p10_p1 = scmp.ge.s32.totalorder %s13_s9, 4  }
 0x14d   :  { %12 = sbr.rel (!%p10_p1) target bundleno = 1 (0x1), region = 63 }
 0x154   :  { %1886 = vsyncpa [#allocation3], 1 }
 0x155   :  { %1888 = vsyncpa [#allocation3 + $0x1], 1 }

// kernel: smooth_dilated_block_forward.4
= control target key start
LH: loop header
LB: loop body
LE: loop exit
PB: predicated region body
PF: predicated region fallthrough
CT: control target
= control target key end

     0   :  { %s1570_s9 = smov 0   ;;  %s1572_s10 = smov 0   ;;  %s1813_s0 = inlined_call_operand.vmem [shape: bf16[512,576], index: 0, kind: input, shape index: {}]   ;;  %s1814_s1 = inlined_call_operand.vmem [shape: bf16[576,128], index: 1, kind: input, shape index: {}]   ;;  %s1815_s2 = inlined_call_operand.vmem [shape: f32[512,128], index: 2, kind: output, shape index: {}]  }
   0x1   :  { %s1574_s11 = smov 0  }
   0x2 LB: > { %s24_s12 = sadd.s32 1, %s1549_s10  ;;  %p1151_p0 = scmp.ge.s32.totalorder %s1553_s11, 1  ;;  %s1553_s11 = sphi %s1574_s11, %s12_s11   ;;  %s1549_s10 = sphi %s1572_s10, %s1817_s10   ;;  %s1545_s9 = sphi %s1570_s9, %s1816_s9  }
   0x3   : > { %p26_p1 = scmp.ge.s32.totalorder %s24_s12, 4  ;;  %p137_p2 = scmp.lt.s32.totalorder %s1553_s11, 5 }
   0x5   : > { %s1819_s12 = smov (%p26_p1, %s24_s12), 0  ;;  %p138_p3 = pnand %p1151_p0, %p137_p2 }
   0x6   : > { %v1439_v0 = vld [vmem:[%s1814_s1 + $0x40] sm:$0xff] (!%p138_p3)   ;;  %v1443_v4 = vld [vmem:[%s1814_s1 + $0x48] sm:$0xff] (!%p138_p3)   ;;  %v1447_v8 = vld [vmem:[%s1814_s1 + $0x50] sm:$0xff] (!%p138_p3)   ;;  %s1152_s19 = sshll.u32 (!%p138_p3), %s1545_s9, 4  ;;  %vm724_vm0 = vcmask (!%p138_p3), 523264  }
   0x7   : > { %141 = sbr.rel (%p138_p3) target bundleno = 331 (0x14b), region = 28  ;;  %v1440_v1 = vld [vmem:[%s1814_s1 + $0xc0] sm:$0xff] (!%p138_p3)   ;;  %1242 = vmatprep.subr.bf16.mxu0 (!%p138_p3), %v1439_v0  ;;  %v1444_v5 = vld [vmem:[%s1814_s1 + $0xc8] sm:$0xff] (!%p138_p3)   ;;  %v1448_v9 = vld [vmem:[%s1814_s1 + $0xd0] sm:$0xff] (!%p138_p3)   ;;  %p168_p4 = scmp.lt.s32.totalorder (!%p138_p3), %s1152_s19, 63 }
   0x8   : > { %v1441_v2 = vld [vmem:[%s1814_s1] sm:$0xff] (!%p138_p3)   ;;  %1306 = vmatprep.subr.bf16.mxu1 (!%p138_p3), %v1440_v1  ;;  %v1445_v6 = vld [vmem:[%s1814_s1 + $0x8] sm:$0xff] (!%p138_p3)   ;;  %v1449_v10 = vld [vmem:[%s1814_s1 + $0x10] sm:$0xff] (!%p138_p3)  }
   0x9   : > { %v1442_v3 = vld [vmem:[%s1814_s1 + $0x80] sm:$0xff] (!%p138_p3)   ;;  %1243 = vmatpush3.bf16.msra.mxu0 (!%p138_p3), %v1441_v2  ;;  %v1446_v7 = vld [vmem:[%s1814_s1 + $0x88] sm:$0xff] (!%p138_p3)   ;;  %v1450_v11 = vld [vmem:[%s1814_s1 + $0x90] sm:$0xff] (!%p138_p3)  }
   0xa   : > { %1307 = vmatpush3.bf16.msra.mxu1 (!%p138_p3), %v1442_v3  ;;  %1244 = vmatprep.subr.bf16.mxu0 (!%p138_p3), %v1443_v4  ;;  %v1451_v12 = vld [vmem:[%s1814_s1 + $0x58] sm:$0xff] (!%p138_p3)   ;;  %v1455_v16 = vld [vmem:[%s1814_s1 + $0x60] sm:$0xff] (!%p138_p3)   ;;  %v1459_v20 = vld [vmem:[%s1814_s1 + $0x68] sm:$0xff] (!%p138_p3)  }
   0xb   : > { %1308 = vmatprep.subr.bf16.mxu1 (!%p138_p3), %v1444_v5  ;;  %v1452_v13 = vld [vmem:[%s1814_s1 + $0xd8] sm:$0xff] (!%p138_p3)   ;;  %v1456_v17 = vld [vmem:[%s1814_s1 + $0xe0] sm:$0xff] (!%p138_p3)   ;;  %v1460_v21 = vld [vmem:[%s1814_s1 + $0xe8] sm:$0xff] (!%p138_p3)  }
   0xc   : > { %v1453_v14 = vld [vmem:[%s1814_s1 + $0x18] sm:$0xff] (!%p138_p3)   ;;  %v1457_v18 = vld [vmem:[%s1814_s1 + $0x20] sm:$0xff] (!%p138_p3)   ;;  %v1461_v22 = vld [vmem:[%s1814_s1 + $0x28] sm:$0xff] (!%p138_p3)  }
   0xd   : > { %1245 = vmatpush3.bf16.msra.mxu0 (!%p138_p3), %v1445_v6  ;;  %v1454_v15 = vld [vmem:[%s1814_s1 + $0x98] sm:$0xff] (!%p138_p3)   ;;  %v1458_v19 = vld [vmem:[%s1814_s1 + $0xa0] sm:$0xff] (!%p138_p3)   ;;  %v1462_v23 = vld [vmem:[%s1814_s1 + $0xa8] sm:$0xff] (!%p138_p3)  }
   0xe   : > { %1309 = vmatpush3.bf16.msra.mxu1 %v1446_v7  ;;  %1246 = vmatprep.subr.bf16.mxu0 %v1447_v8  ;;  %s1821_s19 = smov (!%p168_p4, %s1152_s19), 63  ;;  %v1463_v24 = vld [vmem:[%s1814_s1 + $0x70] sm:$0xff]   ;;  %v1467_v28 = vld [vmem:[%s1814_s1 + $0x78] sm:$0xff]   ;;  %v1477_v36 = vld [vmem:[%s1814_s1 + $0x100] sm:$0xff]  }
   0xf   : > { %1310 = vmatprep.subr.bf16.mxu1 %v1448_v9  ;;  %v1464_v25 = vld [vmem:[%s1814_s1 + $0xf0] sm:$0xff]   ;;  %s1414_s17 = smul.u32 20, %s1821_s19  ;;  %v1468_v29 = vld [vmem:[%s1814_s1 + $0xf8] sm:$0xff]   ;;  %v1490_v42 = vld [vmem:[%s1814_s1 + $0x108] sm:$0xff]  }
  0x10   : > { %v1465_v26 = vld [vmem:[%s1814_s1 + $0x30] sm:$0xff]   ;;  %v1469_v30 = vld [vmem:[%s1814_s1 + $0x38] sm:$0xff]  }
  0x11   : > { %1247 = vmatpush3.bf16.msra.mxu0 %v1449_v10  ;;  %v1466_v27 = vld [vmem:[%s1814_s1 + $0xb0] sm:$0xff]   ;;  %s1687_s28 = scalar_lea.vmem %s1813_s0, %s1414_s17  ;;  %v1470_v31 = vld [vmem:[%s1814_s1 + $0xb8] sm:$0xff]   ;;  %s1155_s17 = sshll.u32 %s1821_s19, 3 }
  0x12   : > { %1311 = vmatpush3.bf16.msra.mxu1 %v1450_v11  ;;  %1248 = vmatprep.subr.bf16.mxu0 %v1451_v12  ;;  %v1471_v32 = vld [vmem:[%s1687_s28] ss:$20 sps:$4 sm:$0xff]   ;;  %v1473_v33 = vld [vmem:[%s1687_s28 + $0x4] ss:$20 sps:$4 sm:$0xff]   ;;  %v1474_v34 = vld [vmem:[%s1687_s28 + $0x8] ss:$20 sps:$4 sm:$0xff]   ;;  %s1777_s21 = scalar_lea.vmem %s1815_s2, %s1155_s17 }
  0x13   : > { %1312 = vmatprep.subr.bf16.mxu1 %v1452_v13  ;;  %v1476_v35 = vld [vmem:[%s1687_s28 + $0xc] ss:$20 sps:$4 sm:$0xff]   ;;  %781 = vmatprep.mubr.bf16.mxu0 %v1473_v33  ;;  %v1480_v38 = vld [vmem:[%s1687_s28 + $0x34] ss:$20 sps:$4 sm:$0xff]   ;;  %v1483_v40 = vld [vmem:[%s1687_s28 + $0x30] ss:$20 sps:$4 sm:$0xff]  }
  0x14   : > { %878 = vmatprep.mubr.bf16.mxu1 %v1476_v35  ;;  %v1478_v37 = vld [vmem:[%s1687_s28 + $0x2c] ss:$20 sps:$4 sm:$0xff]   ;;  %v1482_v39 = vld [vmem:[%s1687_s28 + $0x28] ss:$20 sps:$4 sm:$0xff]   ;;  %v1488_v44 = vld [vmem:[%s1687_s28 + $0x50] ss:$20 sps:$4 sm:$0xff]  }
  0x15   : > { %1249 = vmatpush3.bf16.msra.mxu0 %v1453_v14  ;;  %v1484_v41 = vld [vmem:[%s1687_s28 + $0x54] ss:$20 sps:$4 sm:$0xff]   ;;  %v1486_v43 = vld [vmem:[%s1687_s28 + $0x5c] ss:$20 sps:$4 sm:$0xff]   ;;  %v1489_v45 = vld [vmem:[%s1687_s28 + $0x58] ss:$20 sps:$4 sm:$0xff]  }
  0x16   : > { %1313 = vmatpush3.bf16.msra.mxu1 %v1454_v15  ;;  %1250 = vmatprep.subr.bf16.mxu0 %v1455_v16  ;;  %v1503_v46 = vld [vmem:[%s1814_s1 + $0x110] sm:$0xff]   ;;  %v1493_v48 = vld [vmem:[%s1687_s28 + $0x84] ss:$20 sps:$4 sm:$0xff]   ;;  %v1499_v53 = vld [vmem:[%s1687_s28 + $0xac] ss:$20 sps:$4 sm:$0xff]  }
  0x17   : > { %1314 = vmatprep.subr.bf16.mxu1 %v1456_v17  ;;  %v1491_v47 = vld [vmem:[%s1687_s28 + $0x7c] ss:$20 sps:$4 sm:$0xff]   ;;  %v1495_v50 = vld [vmem:[%s1687_s28 + $0x78] ss:$20 sps:$4 sm:$0xff]   ;;  %v1496_v51 = vld [vmem:[%s1687_s28 + $0x80] ss:$20 sps:$4 sm:$0xff]  }
  0x18   : > { %v1516_v49 = vld [vmem:[%s1814_s1 + $0x118] sm:$0xff]   ;;  %v1501_v54 = vld [vmem:[%s1687_s28 + $0xa0] ss:$20 sps:$4 sm:$0xff]   ;;  %v1509_v59 = vld [vmem:[%s1687_s28 + $0xd0] ss:$20 sps:$4 sm:$0xff]  }
  0x19   : > { %1251 = vmatpush3.bf16.msra.mxu0 %v1457_v18  ;;  %v1497_v52 = vld [vmem:[%s1687_s28 + $0xa4] ss:$20 sps:$4 sm:$0xff]   ;;  %v1502_v55 = vld [vmem:[%s1687_s28 + $0xa8] ss:$20 sps:$4 sm:$0xff]   ;;  %v1504_v56 = vld [vmem:[%s1687_s28 + $0xcc] ss:$20 sps:$4 sm:$0xff]  }
  0x1a   : > { %1315 = vmatpush3.bf16.msra.mxu1 %v1458_v19  ;;  %1252 = vmatprep.subr.bf16.mxu0 %v1459_v20  ;;  %v1506_v57 = vld [vmem:[%s1687_s28 + $0xd4] ss:$20 sps:$4 sm:$0xff]   ;;  %v1512_v61 = vld [vmem:[%s1687_s28 + $0xfc] ss:$20 sps:$4 sm:$0xff]   ;;  %v1515_v63 = vld [vmem:[%s1687_s28 + $0xf8] ss:$20 sps:$4 sm:$0xff]  }
  0x1b   : > { %1316 = vmatprep.subr.bf16.mxu1 %v1460_v21  ;;  %v1508_v58 = vld [vmem:[%s1687_s28 + $0xc8] ss:$20 sps:$4 sm:$0xff]   ;;  %v1514_v62 = vld [vmem:[%s1687_s28 + $0xf0] ss:$20 sps:$4 sm:$0xff]   ;;  %v1521_v2 = vld [vmem:[%s1687_s28 + $0x118] ss:$20 sps:$4 sm:$0xff]  }
  0x1c   : > { %v1510_v60 = vld [vmem:[%s1687_s28 + $0xf4] ss:$20 sps:$4 sm:$0xff]   ;;  %v1517_v0 = vld [vmem:[%s1687_s28 + $0x11c] ss:$20 sps:$4 sm:$0xff]   ;;  %v1519_v1 = vld [vmem:[%s1687_s28 + $0x124] ss:$20 sps:$4 sm:$0xff]  }
  0x1d   : > { %1253 = vmatpush3.bf16.msra.mxu0 %v1461_v22  ;;  %v1522_v3 = vld [vmem:[%s1687_s28 + $0x120] ss:$20 sps:$4 sm:$0xff]   ;;  %v1523_v4 = vld [vmem:[%s1687_s28 + $0x10] ss:$20 sps:$4 sm:$0xff]   ;;  %v1525_v6 = vld [vmem:[%s1687_s28 + $0x38] ss:$20 sps:$4 sm:$0xff]  }
  0x1e   : > { %1317 = vmatpush3.bf16.msra.mxu1 %v1462_v23  ;;  %1254 = vmatprep.subr.bf16.mxu0 %v1463_v24  ;;  %v1524_v5 = vld [vmem:[%s1687_s28 + $0xb0] ss:$20 sps:$4 sm:$0xff]   ;;  %v1526_v7 = vld [vmem:[%s1687_s28 + $0xd8] ss:$20 sps:$4 sm:$0xff]   ;;  %v1527_v8 = vld [vmem:[%s1687_s28 + $0x60] ss:$20 sps:$4 sm:$0xff]  }
  0x1f   : > { %1318 = vmatprep.subr.bf16.mxu1 %v1464_v25  ;;  %v1528_v9 = vld [vmem:[%s1687_s28 + $0x100] ss:$20 sps:$4 sm:$0xff]   ;;  %v1529_v10 = vld [vmem:[%s1687_s28 + $0x88] ss:$20 sps:$4 sm:$0xff]  }
  0x20   : > { %v1530_v11 = vld [vmem:[%s1687_s28 + $0x128] ss:$20 sps:$4 sm:$0xff]  }
  0x21   : > { %1255 = vmatpush3.bf16.msra.mxu0 %v1465_v26 }
  0x22   : > { %1319 = vmatpush3.bf16.msra.mxu1 %v1466_v27  ;;  %1256 = vmatprep.subr.bf16.mxu0 %v1467_v28 }
  0x23   : > { %1320 = vmatprep.subr.bf16.mxu1 %v1468_v29 }
  0x25   : > { %1257 = vmatpush3.bf16.msra.mxu0 %v1469_v30 }
  0x26   : > { %1321 = vmatpush3.bf16.msra.mxu1 %v1470_v31  ;;  %1382 = vmatprep.subr.bf16.mxu0 %v1477_v36 }
  0x27   : > { %1406 = vmatprep.subr.bf16.mxu1 %v1477_v36 }
  0x28   : > { %782 = vmatmul.mubr.bf16.vlgmr.msra.gmra.mrb[0].mxu0 %v1471_v32 }
  0x29   : > { %879 = vmatmul.mubr.bf16.vlgmr.msra.gmra.mrb[0].mxu1 %v1474_v34  ;;  %1383 = vmatpush3.bf16.msra.mxu0 %v1477_v36 }
  0x2a   : > { %1410 = vmatpush3.bf16.msra.mxu1 %v1477_v36  ;;  %789 = vmatprep.mubr.bf16.mxu0 %v1478_v37 }
  0x2b   : > { %886 = vmatprep.mubr.bf16.mxu1 %v1480_v38  ;;  %1384 = vmatprep.subr.bf16.mxu0 %v1490_v42 }
  0x2c   : > { %1407 = vmatprep.subr.bf16.mxu1 %v1490_v42 }
  0x2d   : > { %1385 = vmatpush3.bf16.msra.mxu0 %v1490_v42 }
  0x2e   : > { %1411 = vmatpush3.bf16.msra.mxu1 %v1490_v42  ;;  %1386 = vmatprep.subr.bf16.mxu0 %v1503_v46 }
  0x2f   : > { %1408 = vmatprep.subr.bf16.mxu1 %v1503_v46 }
  0x30   : > { %790 = vmatmul.mubr.bf16.gmra.mrb[4].mxu0 %v1482_v39 }
  0x31   : > { %887 = vmatmul.mubr.bf16.gmra.mrb[4].mxu1 %v1483_v40  ;;  %797 = vmatprep.mubr.bf16.mxu0 %v1484_v41 }
  0x32   : > { %894 = vmatprep.mubr.bf16.mxu1 %v1486_v43  ;;  %1387 = vmatpush3.bf16.msra.mxu0 %v1503_v46 }
  0x33   : > { %1412 = vmatpush3.bf16.msra.mxu1 %v1503_v46  ;;  %1388 = vmatprep.subr.bf16.mxu0 %v1516_v49 }
  0x34   : > { %1409 = vmatprep.subr.bf16.mxu1 %v1516_v49 }
  0x36   : > { %1389 = vmatpush3.bf16.msra.mxu0 %v1516_v49 }
  0x37   : > { %1413 = vmatpush3.bf16.msra.mxu1 %v1516_v49 }
  0x38   : > { %798 = vmatmul.mubr.bf16.gmra.mrb[8].mxu0 %v1488_v44 }
  0x39   : > { %895 = vmatmul.mubr.bf16.gmra.mrb[8].mxu1 %v1489_v45  ;;  %805 = vmatprep.mubr.bf16.mxu0 %v1491_v47 }
  0x3a   : > { %902 = vmatprep.mubr.bf16.mxu1 %v1493_v48 }
  0x40   : > { %806 = vmatmul.mubr.bf16.gmra.mrb[12].mxu0 %v1495_v50 }
  0x41   : > { %903 = vmatmul.mubr.bf16.gmra.mrb[12].mxu1 %v1496_v51  ;;  %813 = vmatprep.mubr.bf16.mxu0 %v1497_v52 }
  0x42   : > { %910 = vmatprep.mubr.bf16.mxu1 %v1499_v53 }
  0x48   : > { %814 = vmatmul.mubr.bf16.gmra.mrb[16].mxu0 %v1501_v54 }
  0x49   : > { %911 = vmatmul.mubr.bf16.gmra.mrb[16].mxu1 %v1502_v55  ;;  %821 = vmatprep.mubr.bf16.mxu0 %v1504_v56 }
  0x4a   : > { %918 = vmatprep.mubr.bf16.mxu1 %v1506_v57 }
  0x50   : > { %822 = vmatmul.mubr.bf16.gmra.mrb[20].mxu0 %v1508_v58 }
  0x51   : > { %919 = vmatmul.mubr.bf16.gmra.mrb[20].mxu1 %v1509_v59  ;;  %829 = vmatprep.mubr.bf16.mxu0 %v1510_v60 }
  0x52   : > { %926 = vmatprep.mubr.bf16.mxu1 %v1512_v61 }
  0x58   : > { %830 = vmatmul.mubr.bf16.gmra.mrb[24].mxu0 %v1514_v62 }
  0x59   : > { %927 = vmatmul.mubr.bf16.gmra.mrb[24].mxu1 %v1515_v63  ;;  %837 = vmatprep.mubr.bf16.mxu0 %v1517_v0 }
  0x5a   : > { %934 = vmatprep.mubr.bf16.mxu1 %v1519_v1 }
  0x60   : > { %838 = vmatmul.mubr.bf16.gmra.mrb[28].mxu0 %v1521_v2 }
  0x61   : > { %935 = vmatmul.mubr.bf16.gmra.mrb[28].mxu1 %v1522_v3  ;;  %1390 = vmatprep.mubr.msk.bf16.mxu0 %vm724_vm0, %v1523_v4 }
  0x62   : > { %1398 = vmatprep.mubr.msk.bf16.mxu1 %vm724_vm0, %v1524_v5 }
  0x68   : > { %1391 = vmatmul.mubr.msk.bf16.vlgmr.msra.gmra.mrb[32].mxu0 %vm724_vm0, %v1525_v6 }
  0x69   : > { %1399 = vmatmul.mubr.msk.bf16.vlgmr.msra.gmra.mrb[32].mxu1 %vm724_vm0, %v1526_v7  ;;  %1394 = vmatprep.mubr.msk.bf16.mxu0 %vm724_vm0, %v1527_v8 }
  0x6a   : > { %1402 = vmatprep.mubr.msk.bf16.mxu1 %vm724_vm0, %v1528_v9 }
  0x70   : > { %1395 = vmatmul.mubr.msk.bf16.gmra.mrb[36].mxu0 %vm724_vm0, %v1529_v10 }
  0x71   : > { %1403 = vmatmul.mubr.msk.bf16.gmra.mrb[36].mxu1 %vm724_vm0, %v1530_v11 }
  0xfb   : > { %v1258_v12 = vpop.f32.mrb[0].mxu0 }
  0xfc   : > { %v1322_v13 = vpop.f32.mrb[0].mxu1  ;;  %v1259_v14 = vpop.f32.mrb[1].mxu0 }
  0xfd   : > { %v1260_v15 = vadd.f32 %v1259_v14, %v1258_v12  ;;  %v1323_v16 = vpop.f32.mrb[1].mxu1  ;;  %v1261_v17 = vpop.f32.mrb[2].mxu0 }
  0xfe   : > { %v1324_v18 = vadd.f32 %v1323_v16, %v1322_v13  ;;  %v1325_v19 = vpop.f32.mrb[2].mxu1  ;;  %v1262_v20 = vpop.f32.mrb[3].mxu0 }
  0xff   : > { %v1263_v21 = vadd.f32 %v1262_v20, %v1261_v17  ;;  %v1326_v22 = vpop.f32.mrb[3].mxu1 }
 0x100   : > { %v1327_v23 = vadd.f32 %v1326_v22, %v1325_v19  ;;  %v1755_v24 = vadd.f32 %v1324_v18, %v1260_v15 }
 0x102   : > { %v1757_v25 = vadd.f32 %v1327_v23, %v1263_v21 }
 0x103   : > { %v1264_v26 = vpop.f32.mrb[4].mxu0 }
 0x104   : > { %v1328_v27 = vpop.f32.mrb[4].mxu1  ;;  %v1265_v28 = vpop.f32.mrb[5].mxu0 }
 0x105   : > { %v1266_v29 = vadd.f32 %v1265_v28, %v1264_v26  ;;  %v1329_v30 = vpop.f32.mrb[5].mxu1  ;;  %v1267_v31 = vpop.f32.mrb[6].mxu0 }
 0x106   : > { %v1330_v32 = vadd.f32 %v1329_v30, %v1328_v27  ;;  %v1331_v33 = vpop.f32.mrb[6].mxu1  ;;  %v1268_v34 = vpop.f32.mrb[7].mxu0 }
 0x107   : > { %v1269_v35 = vadd.f32 %v1268_v34, %v1267_v31  ;;  %v1332_v36 = vpop.f32.mrb[7].mxu1 }
 0x108   : > { %v1333_v37 = vadd.f32 %v1332_v36, %v1331_v33  ;;  %v1759_v38 = vadd.f32 %v1330_v32, %v1266_v29 }
 0x10a   : > { %v1761_v39 = vadd.f32 %v1333_v37, %v1269_v35 }
 0x10b   : > { %v1270_v40 = vpop.f32.mrb[8].mxu0 }
 0x10c   : > { %v1334_v41 = vpop.f32.mrb[8].mxu1  ;;  %v1271_v42 = vpop.f32.mrb[9].mxu0 }
 0x10d   : > { %v1272_v43 = vadd.f32 %v1271_v42, %v1270_v40  ;;  %v1335_v44 = vpop.f32.mrb[9].mxu1  ;;  %v1273_v45 = vpop.f32.mrb[10].mxu0 }
 0x10e   : > { %v1336_v46 = vadd.f32 %v1335_v44, %v1334_v41  ;;  %v1337_v47 = vpop.f32.mrb[10].mxu1  ;;  %v1274_v48 = vpop.f32.mrb[11].mxu0 }
 0x10f   : > { %v1275_v49 = vadd.f32 %v1274_v48, %v1273_v45  ;;  %v1338_v50 = vpop.f32.mrb[11].mxu1 }
 0x110   : > { %v1339_v51 = vadd.f32 %v1338_v50, %v1337_v47  ;;  %v1763_v52 = vadd.f32 %v1336_v46, %v1272_v43 }
 0x112   : > { %v1765_v53 = vadd.f32 %v1339_v51, %v1275_v49 }
 0x113   : > { %v1276_v54 = vpop.f32.mrb[12].mxu0 }
 0x114   : > { %v1340_v55 = vpop.f32.mrb[12].mxu1  ;;  %v1277_v56 = vpop.f32.mrb[13].mxu0 }
 0x115   : > { %v1278_v57 = vadd.f32 %v1277_v56, %v1276_v54  ;;  %v1341_v58 = vpop.f32.mrb[13].mxu1  ;;  %v1279_v59 = vpop.f32.mrb[14].mxu0 }
 0x116   : > { %v1342_v60 = vadd.f32 %v1341_v58, %v1340_v55  ;;  %v1343_v61 = vpop.f32.mrb[14].mxu1  ;;  %v1280_v62 = vpop.f32.mrb[15].mxu0 }
 0x117   : > { %v1281_v63 = vadd.f32 %v1280_v62, %v1279_v59  ;;  %v1344_v0 = vpop.f32.mrb[15].mxu1 }
 0x118   : > { %v1345_v1 = vadd.f32 %v1344_v0, %v1343_v61  ;;  %v1767_v2 = vadd.f32 %v1342_v60, %v1278_v57 }
 0x11a   : > { %v1769_v3 = vadd.f32 %v1345_v1, %v1281_v63 }
 0x11b   : > { %v1282_v4 = vpop.f32.mrb[16].mxu0 }
 0x11c   : > { %v1346_v5 = vpop.f32.mrb[16].mxu1  ;;  %v1283_v6 = vpop.f32.mrb[17].mxu0 }
 0x11d   : > { %v1284_v7 = vadd.f32 %v1283_v6, %v1282_v4  ;;  %v1347_v8 = vpop.f32.mrb[17].mxu1  ;;  %v1285_v9 = vpop.f32.mrb[18].mxu0 }
 0x11e   : > { %v1348_v10 = vadd.f32 %v1347_v8, %v1346_v5  ;;  %v1349_v11 = vpop.f32.mrb[18].mxu1  ;;  %v1286_v12 = vpop.f32.mrb[19].mxu0 }
 0x11f   : > { %v1287_v13 = vadd.f32 %v1286_v12, %v1285_v9  ;;  %v1350_v14 = vpop.f32.mrb[19].mxu1 }
 0x120   : > { %v1351_v15 = vadd.f32 %v1350_v14, %v1349_v11  ;;  %v913_v16 = vadd.f32 %v1348_v10, %v1284_v7 }
 0x122   : > { %v1771_v17 = vadd.f32 %v1351_v15, %v1287_v13 }
 0x123   : > { %v1288_v18 = vpop.f32.mrb[20].mxu0 }
 0x124   : > { %v1352_v19 = vpop.f32.mrb[20].mxu1  ;;  %v1289_v20 = vpop.f32.mrb[21].mxu0 }
 0x125   : > { %v1290_v21 = vadd.f32 %v1289_v20, %v1288_v18  ;;  %v1353_v22 = vpop.f32.mrb[21].mxu1  ;;  %v1291_v23 = vpop.f32.mrb[22].mxu0 }
 0x126   : > { %v1354_v26 = vadd.f32 %v1353_v22, %v1352_v19  ;;  %v1355_v27 = vpop.f32.mrb[22].mxu1  ;;  %v1292_v28 = vpop.f32.mrb[23].mxu0 }
 0x127   : > { %v1293_v29 = vadd.f32 %v1292_v28, %v1291_v23  ;;  %v1356_v30 = vpop.f32.mrb[23].mxu1 }
 0x128   : > { %v1357_v31 = vadd.f32 %v1356_v30, %v1355_v27  ;;  %v921_v32 = vadd.f32 %v1354_v26, %v1290_v21 }
 0x12a   : > { %v924_v33 = vadd.f32 %v1357_v31, %v1293_v29 }
 0x12b   : > { %v1294_v34 = vpop.f32.mrb[24].mxu0 }
 0x12c   : > { %v1358_v35 = vpop.f32.mrb[24].mxu1  ;;  %v1295_v36 = vpop.f32.mrb[25].mxu0 }
 0x12d   : > { %v1296_v37 = vadd.f32 %v1295_v36, %v1294_v34  ;;  %v1359_v40 = vpop.f32.mrb[25].mxu1  ;;  %v1297_v41 = vpop.f32.mrb[26].mxu0 }
 0x12e   : > { %v1360_v42 = vadd.f32 %v1359_v40, %v1358_v35  ;;  %v1361_v43 = vpop.f32.mrb[26].mxu1  ;;  %v1298_v44 = vpop.f32.mrb[27].mxu0 }
 0x12f   : > { %v1299_v45 = vadd.f32 %v1298_v44, %v1297_v41  ;;  %v1362_v46 = vpop.f32.mrb[27].mxu1 }
 0x130   : > { %v1363_v47 = vadd.f32 %v1362_v46, %v1361_v43  ;;  %v929_v48 = vadd.f32 %v1360_v42, %v1296_v37 }
 0x132   : > { %v932_v49 = vadd.f32 %v1363_v47, %v1299_v45 }
 0x133   : > { %v1300_v50 = vpop.f32.mrb[28].mxu0 }
 0x134   : > { %v1364_v51 = vpop.f32.mrb[28].mxu1  ;;  %v1301_v54 = vpop.f32.mrb[29].mxu0 }
 0x135   : > { %v1302_v55 = vadd.f32 %v1301_v54, %v1300_v50  ;;  %v1365_v56 = vpop.f32.mrb[29].mxu1  ;;  %v1303_v57 = vpop.f32.mrb[30].mxu0 }
 0x136   : > { %v1366_v58 = vadd.f32 %v1365_v56, %v1364_v51  ;;  %v1367_v59 = vpop.f32.mrb[30].mxu1  ;;  %v1304_v60 = vpop.f32.mrb[31].mxu0 }
 0x137   : > { %v1305_v61 = vadd.f32 %v1304_v60, %v1303_v57  ;;  %v1368_v62 = vpop.f32.mrb[31].mxu1 }
 0x138   : > { %v1369_v63 = vadd.f32 %v1368_v62, %v1367_v59  ;;  %v937_v0 = vadd.f32 %v1366_v58, %v1302_v55 }
 0x13a   : > { %v940_v1 = vadd.f32 %v1369_v63, %v1305_v61 }
 0x13b   : > { %v1392_v4 = vpop.f32.mrb[32].mxu0 }
 0x13c   : > { %v986_v5 = vadd.f32 %v1392_v4, %v1759_v38  ;;  %v1400_v6 = vpop.f32.mrb[32].mxu1  ;;  %v977_v7 = vpop.f32.mrb[33].mxu0 }
 0x13d   : > { %v1018_v8 = vadd.f32 %v1400_v6, %v921_v32  ;;  %v978_v9 = vadd.f32 %v977_v7, %v1755_v24  ;;  %v1009_v10 = vpop.f32.mrb[33].mxu1  ;;  %v1393_v11 = vpop.f32.mrb[34].mxu0 }
 0x13e   : > { %1042 = vst [vmem:[%s1777_s21 + $0x10] sm:$0xff] %v986_v5  ;;  %v1010_v12 = vadd.f32 %v1009_v10, %v913_v16  ;;  %v989_v13 = vadd.f32 %v1393_v11, %v1761_v39  ;;  %v1401_v14 = vpop.f32.mrb[34].mxu1  ;;  %v980_v15 = vpop.f32.mrb[35].mxu0 }
 0x13f   : > { %1050 = vst [vmem:[%s1777_s21 + $0x50] sm:$0xff] %v1018_v8  ;;  %1040 = vst [vmem:[%s1777_s21] sm:$0xff] %v978_v9  ;;  %v1021_v38 = vadd.f32 %v1401_v14, %v924_v33  ;;  %v981_v18 = vadd.f32 %v980_v15, %v1757_v25  ;;  %v1012_v19 = vpop.f32.mrb[35].mxu1 }
 0x140   : > { %1048 = vst [vmem:[%s1777_s21 + $0x40] sm:$0xff] %v1010_v12  ;;  %1043 = vst [vmem:[%s1777_s21 + $0x18] sm:$0xff] %v989_v13  ;;  %v1013_v24 = vadd.f32 %v1012_v19, %v1771_v17 }
 0x141   : > { %1051 = vst [vmem:[%s1777_s21 + $0x58] sm:$0xff] %v1021_v38  ;;  %1041 = vst [vmem:[%s1777_s21 + $0x8] sm:$0xff] %v981_v18 }
 0x142   : > { %1049 = vst [vmem:[%s1777_s21 + $0x48] sm:$0xff] %v1013_v24 }
 0x143   : > { %v1396_v16 = vpop.f32.mrb[36].mxu0 }
 0x144   : > { %v1002_v39 = vadd.f32 %v1396_v16, %v1767_v2  ;;  %v1404_v20 = vpop.f32.mrb[36].mxu1  ;;  %v993_v21 = vpop.f32.mrb[37].mxu0 }
 0x145   : > { %v1034_v22 = vadd.f32 %v1404_v20, %v937_v0  ;;  %v994_v25 = vadd.f32 %v993_v21, %v1763_v52  ;;  %v1025_v23 = vpop.f32.mrb[37].mxu1  ;;  %v1397_v26 = vpop.f32.mrb[38].mxu0 }
 0x146   : > { %1046 = vst [vmem:[%s1777_s21 + $0x30] sm:$0xff] %v1002_v39  ;;  %v1026_v17 = vadd.f32 %v1025_v23, %v929_v48  ;;  %v1005_v27 = vadd.f32 %v1397_v26, %v1769_v3  ;;  %v1405_v28 = vpop.f32.mrb[38].mxu1  ;;  %v996_v29 = vpop.f32.mrb[39].mxu0 }
 0x147   : > { %1054 = vst [vmem:[%s1777_s21 + $0x70] sm:$0xff] %v1034_v22  ;;  %1044 = vst [vmem:[%s1777_s21 + $0x20] sm:$0xff] %v994_v25  ;;  %v1037_v2 = vadd.f32 %v1405_v28, %v940_v1  ;;  %v997_v30 = vadd.f32 %v996_v29, %v1765_v53  ;;  %v1028_v31 = vpop.f32.mrb[39].mxu1 }
 0x148   : > { %1052 = vst [vmem:[%s1777_s21 + $0x60] sm:$0xff] %v1026_v17  ;;  %1047 = vst [vmem:[%s1777_s21 + $0x38] sm:$0xff] %v1005_v27  ;;  %v1029_v52 = vadd.f32 %v1028_v31, %v932_v49 }
 0x149   : > { %1055 = vst [vmem:[%s1777_s21 + $0x78] sm:$0xff] %v1037_v2  ;;  %1045 = vst [vmem:[%s1777_s21 + $0x28] sm:$0xff] %v997_v30 }
 0x14a   : > { %1053 = vst [vmem:[%s1777_s21 + $0x68] sm:$0xff] %v1029_v52 }
 0x14b PF: > { %s12_s11 = sadd.s32 1, %s1553_s11   ;;  %s1816_s9 = smov %s1549_s10 }
 0x14c   : > { %p9_p5 = scmp.ge.s32.totalorder %s12_s11, 6   ;;  %s1817_s10 = smov %s1819_s12 }
 0x14e   :  { %11 = sbr.rel (!%p9_p5) target bundleno = 2 (0x2), region = 61 }

// kernel: smooth_dilated_block_forward.5
= control target key start
LH: loop header
LB: loop body
LE: loop exit
PB: predicated region body
PF: predicated region fallthrough
CT: control target
= control target key end

     0   :  { %8 = vsyncpa [#allocation3], 0  ;;  %s1410_s0 = inlined_call_operand.vmem [shape: f32[2,256,128], index: 0, kind: input, shape index: {}]   ;;  %s1411_s1 = inlined_call_operand.vmem [shape: f32[1,128], index: 1, kind: input, shape index: {}]   ;;  %s1412_s2 = inlined_call_operand.vmem [shape: f32[1,128], index: 2, kind: input, shape index: {}]   ;;  %s1413_s3 = inlined_call_operand.hbm [shape: f32[2,256,128], index: 3, kind: output, shape index: {}]  }
   0x1   :  { %10 = vsyncpa [#allocation3 + $0x1], 0  ;;  %s804_s12 = smov 0   ;;  %s806_s13 = smov 0  }
   0x2   :  { %s808_s14 = smov 0   ;;  %s810_s15 = smov 0  }
   0x3 LB: > { %s825_s16 = sadd.s32 4294967295, %s779_s15   ;;  %s658_s17 = sadd.s32 4294967294, %s779_s15   ;;  %s779_s15 = sphi %s810_s15, %s1419_s15   ;;  %s775_s14 = sphi %s808_s14, %s1418_s14   ;;  %s771_s13 = sphi %s806_s13, %s1417_s13   ;;  %s767_s12 = sphi %s804_s12, %s1416_s12  }
   0x4   : > { %s829_s18 = sadd.s32 1, %s779_s15   ;;  %s91_s19 = sadd.s32 1, %s775_s14 }
   0x5   : > { %s88_s20 = ssub.s32 %s779_s15, %s829_s18  ;;  %p101_p0 = scmp.ne.s32.totalorder %s775_s14, %s771_s13 }
   0x6   : > { %p89_p1 = scmp.eq.s32.totalorder %s88_s20, 0  ;;  %p102_p2 = scmp.eq.s32.totalorder %s825_s16, 1 }
   0x7   : > { %p107_p3 = scmp.ne.s32.totalorder %s771_s13, %s767_s12  ;;  %p108_p4 = scmp.eq.s32.totalorder %s658_s17, 1 }
   0x8   : > { %s840_s21 = scalar_select %p89_p1, %s775_s14, %s91_s19  }
   0x9   : > { %p842_p5 = por %p102_p2, %p101_p0  ;;  %p846_p6 = por %p108_p4, %p107_p3 }
   0xa   : > { %p661_p7 = scmp.ge.s32.totalorder %s779_s15, 1  ;;  %p140_p8 = scmp.lt.s32.totalorder %s779_s15, 3 }
   0xc   : > { %p141_p9 = pnand %p661_p7, %p140_p8 }
   0xd   : > { %p164_p10 = scmp.lt.s32.totalorder (!%p141_p9), %s825_s16, 1  ;;  %s161_s29 = sand.u32 (!%p141_p9), 1, %s771_s13  }
   0xe   : > { %144 = sbr.rel (%p141_p9) target bundleno = 262 (0x106), region = 32  ;;  %s662_s7 = sshll.u32 (!%p141_p9), %s161_s29, 8 }
   0xf   : > { %s1228_s8 = scalar_lea.vmem (!%p141_p9), [#allocation2], %s662_s7  ;;  %s673_s9 = sshll.u32 (!%p141_p9), %s825_s16, 12 }
  0x10   : > { %s596_s10 = sshll.u32 (!%p141_p9), %s1228_s8, 4  ;;  %s1362_s19 = scalar_lea.hbm (!%p141_p9), %s1413_s3, %s673_s9  ;;  %s1364_s10 = int_to_ptr.vmem [resolvable:$true] %s596_s10 }
  0x11   : > { %s717_s20 = scalar_lea.vmem (!%p141_p9), %s1364_s10, 4096 }
  0x12   : > { %p718_p11 = scmp.ne.s32.totalorder (!%p141_p9), %s1364_s10, %s717_s20 }
  0x14   : > { %p719_p12 = pnand (!%p141_p9), %p718_p11, %p842_p5 }
  0x15   : > { %s165_s24 = scalar_select %p164_p10, %s825_s16, 1 }
  0x16   : > { %s1369_s16 = scalar_lea.sflag [#allocation3], %s161_s29  ;;  %p720_p13 = pneg %p719_p12 }
  0x17   : > { %s672_s25 = sshll.u32 %s165_s24, 8  ;;  %s781_s24 = smov [#allocation2]  }
  0x18   : > { %s857_s28 = scalar_lea.vmem %s1410_s0, %s672_s25  ;;  %s721_s25 = sshll.u32 %s781_s24, 4  ;;  %s722_s25 = int_to_ptr.vmem [resolvable:$false] %s721_s25 }
  0x19   : > { %v860_v0 = vld [vmem:[%s857_s28] sm:$0xff]  ;;  %v863_v1 = vld [vmem:[%s857_s28 + $0x8] sm:$0xff]  ;;  %v866_v2 = vld [vmem:[%s857_s28 + $0x10] sm:$0xff]  ;;  %s723_s26 = scalar_lea.vmem %s722_s25, 8192  ;;  %p724_p0 = scmp.lt.s32.totalorder %s1364_s10, %s722_s25 }
  0x1a   : > { %v201_v3 = vadd.f32 %v863_v1, %v860_v0  ;;  %v871_v4 = vld [vmem:[%s857_s28 + $0x18] sm:$0xff]  ;;  %v875_v6 = vld [vmem:[%s857_s28 + $0x20] sm:$0xff]  ;;  %v879_v8 = vld [vmem:[%s857_s28 + $0x28] sm:$0xff]  ;;  %p725_p1 = scmp.lt.s32.totalorder %s723_s26, %s717_s20 }
  0x1b   : > { %v883_v10 = vld [vmem:[%s857_s28 + $0x30] sm:$0xff]  ;;  %v887_v12 = vld [vmem:[%s857_s28 + $0x38] sm:$0xff]  ;;  %v891_v14 = vld [vmem:[%s857_s28 + $0x40] sm:$0xff] }
  0x1c   : > { %v202_v5 = vadd.f32 %v201_v3, %v866_v2  ;;  %v895_v16 = vld [vmem:[%s857_s28 + $0x48] sm:$0xff]  ;;  %v899_v18 = vld [vmem:[%s857_s28 + $0x50] sm:$0xff]  ;;  %v903_v20 = vld [vmem:[%s857_s28 + $0x58] sm:$0xff]  ;;  %p726_p2 = por %p725_p1, %p724_p0 }
  0x1d   : > { %v907_v22 = vld [vmem:[%s857_s28 + $0x60] sm:$0xff]  ;;  %v911_v24 = vld [vmem:[%s857_s28 + $0x68] sm:$0xff]  ;;  %v915_v26 = vld [vmem:[%s857_s28 + $0x70] sm:$0xff] }
  0x1e   : > { %v203_v7 = vadd.f32 %v202_v5, %v871_v4  ;;  %v919_v28 = vld [vmem:[%s857_s28 + $0x78] sm:$0xff]  ;;  %v923_v30 = vld [vmem:[%s857_s28 + $0x80] sm:$0xff]  ;;  %v927_v32 = vld [vmem:[%s857_s28 + $0x88] sm:$0xff]  ;;  %p727_p3 = pnand %p726_p2, %p720_p13 }
  0x1f   : > { %v931_v34 = vld [vmem:[%s857_s28 + $0x90] sm:$0xff]  ;;  %v935_v36 = vld [vmem:[%s857_s28 + $0x98] sm:$0xff]  ;;  %v939_v38 = vld [vmem:[%s857_s28 + $0xa0] sm:$0xff] }
  0x20   : > { %v204_v9 = vadd.f32 %v203_v7, %v875_v6  ;;  %v943_v40 = vld [vmem:[%s857_s28 + $0xa8] sm:$0xff]  ;;  %v947_v42 = vld [vmem:[%s857_s28 + $0xb0] sm:$0xff]  ;;  %v951_v44 = vld [vmem:[%s857_s28 + $0xb8] sm:$0xff] }
  0x21   : > { %v955_v46 = vld [vmem:[%s857_s28 + $0xc0] sm:$0xff]  ;;  %v959_v48 = vld [vmem:[%s857_s28 + $0xc8] sm:$0xff]  ;;  %v963_v50 = vld [vmem:[%s857_s28 + $0xd0] sm:$0xff] }
  0x22   : > { %v205_v11 = vadd.f32 %v204_v9, %v879_v8  ;;  %v967_v52 = vld [vmem:[%s857_s28 + $0xd8] sm:$0xff]  ;;  %v971_v54 = vld [vmem:[%s857_s28 + $0xe0] sm:$0xff]  ;;  %v975_v56 = vld [vmem:[%s857_s28 + $0xe8] sm:$0xff] }
  0x23   : > { %v979_v58 = vld [vmem:[%s857_s28 + $0xf0] sm:$0xff]  ;;  %v983_v60 = vld [vmem:[%s857_s28 + $0xf8] sm:$0xff] }
  0x24   : > { %v206_v13 = vadd.f32 %v205_v11, %v883_v10 }
  0x26   : > { %v207_v15 = vadd.f32 %v206_v13, %v887_v12 }
  0x28   : > { %v208_v17 = vadd.f32 %v207_v15, %v891_v14 }
  0x2a   : > { %v209_v19 = vadd.f32 %v208_v17, %v895_v16 }
  0x2c   : > { %v210_v21 = vadd.f32 %v209_v19, %v899_v18 }
  0x2e   : > { %v211_v23 = vadd.f32 %v210_v21, %v903_v20 }
  0x30   : > { %v212_v25 = vadd.f32 %v211_v23, %v907_v22 }
  0x32   : > { %v213_v27 = vadd.f32 %v212_v25, %v911_v24 }
  0x34   : > { %v214_v29 = vadd.f32 %v213_v27, %v915_v26 }
  0x36   : > { %v215_v31 = vadd.f32 %v214_v29, %v919_v28 }
  0x38   : > { %v216_v33 = vadd.f32 %v215_v31, %v923_v30 }
  0x3a   : > { %v217_v35 = vadd.f32 %v216_v33, %v927_v32 }
  0x3c   : > { %v218_v37 = vadd.f32 %v217_v35, %v931_v34 }
  0x3e   : > { %v219_v39 = vadd.f32 %v218_v37, %v935_v36 }
  0x40   : > { %v220_v41 = vadd.f32 %v219_v39, %v939_v38 }
  0x42   : > { %v221_v43 = vadd.f32 %v220_v41, %v943_v40 }
  0x44   : > { %v222_v45 = vadd.f32 %v221_v43, %v947_v42 }
  0x46   : > { %v223_v47 = vadd.f32 %v222_v45, %v951_v44 }
  0x48   : > { %v224_v49 = vadd.f32 %v223_v47, %v955_v46 }
  0x4a   : > { %v225_v51 = vadd.f32 %v224_v49, %v959_v48 }
  0x4c   : > { %v226_v53 = vadd.f32 %v225_v51, %v963_v50 }
  0x4e   : > { %v227_v55 = vadd.f32 %v226_v53, %v967_v52 }
  0x50   : > { %v228_v57 = vadd.f32 %v227_v55, %v971_v54 }
  0x52   : > { %v229_v59 = vadd.f32 %v228_v57, %v975_v56 }
  0x54   : > { %v230_v61 = vadd.f32 %v229_v59, %v979_v58 }
  0x56   : > { %v231_v62 = vadd.f32 %v230_v61, %v983_v60 }
  0x58   : > { %v232_v63 = vrot.slane %v231_v62, 4 }
  0x5a   : > { %v233_v3 = vadd.f32 %v232_v63, %v231_v62 }
  0x5c   : > { %v234_v5 = vrot.slane %v233_v3, 2 }
  0x5e   : > { %v235_v7 = vadd.f32 %v234_v5, %v233_v3 }
  0x60   : > { %v236_v9 = vrot.slane %v235_v7, 1 }
  0x62   : > { %v237_v11 = vadd.f32 %v236_v9, %v235_v7 }
  0x64   : > { %v987_v13 = vmul.f32 0.00390625, %v237_v11 }
  0x66   : > { %v991_v15 = vsub.f32 %v860_v0, %v987_v13  ;;  %v995_v17 = vsub.f32 %v863_v1, %v987_v13  ;;  %v999_v19 = vsub.f32 %v866_v2, %v987_v13  ;;  %v1003_v21 = vsub.f32 %v871_v4, %v987_v13 }
  0x67   : > { %v1011_v0 = vsub.f32 %v875_v6, %v987_v13  ;;  %v1017_v2 = vsub.f32 %v879_v8, %v987_v13  ;;  %v1023_v29 = vsub.f32 %v883_v10, %v987_v13  ;;  %v1029_v33 = vsub.f32 %v887_v12, %v987_v13 }
  0x68   : > { %v272_v23 = vmul.f32 %v991_v15, %v991_v15  ;;  %v273_v25 = vmul.f32 %v995_v17, %v995_v17  ;;  %v274_v1 = vmul.f32 %v999_v19, %v999_v19  ;;  %v275_v4 = vmul.f32 %v1003_v21, %v1003_v21 }
  0x69   : > { %v276_v31 = vmul.f32 %v1011_v0, %v1011_v0  ;;  %v277_v8 = vmul.f32 %v1017_v2, %v1017_v2  ;;  %v1035_v37 = vsub.f32 %v891_v14, %v987_v13  ;;  %v278_v10 = vmul.f32 %v1023_v29, %v1023_v29 }
  0x6a   : > { %v304_v27 = vadd.f32 %v273_v25, %v272_v23  ;;  %v1041_v41 = vsub.f32 %v895_v16, %v987_v13  ;;  %v279_v12 = vmul.f32 %v1029_v33, %v1029_v33  ;;  %v1047_v45 = vsub.f32 %v899_v18, %v987_v13 }
  0x6b   : > { %v280_v14 = vmul.f32 %v1035_v37, %v1035_v37  ;;  %v1053_v49 = vsub.f32 %v903_v20, %v987_v13  ;;  %v1059_v53 = vsub.f32 %v907_v22, %v987_v13  ;;  %v1065_v57 = vsub.f32 %v911_v24, %v987_v13 }
  0x6c   : > { %v305_v6 = vadd.f32 %v304_v27, %v274_v1  ;;  %v281_v16 = vmul.f32 %v1041_v41, %v1041_v41  ;;  %v282_v18 = vmul.f32 %v1047_v45, %v1047_v45  ;;  %v1071_v61 = vsub.f32 %v915_v26, %v987_v13 }
  0x6d   : > { %v283_v20 = vmul.f32 %v1053_v49, %v1053_v49  ;;  %v284_v22 = vmul.f32 %v1059_v53, %v1059_v53  ;;  %v1077_v63 = vsub.f32 %v919_v28, %v987_v13  ;;  %v285_v24 = vmul.f32 %v1065_v57, %v1065_v57 }
  0x6e   : > { %v306_v35 = vadd.f32 %v305_v6, %v275_v4  ;;  %v1083_v5 = vsub.f32 %v923_v30, %v987_v13  ;;  %v286_v26 = vmul.f32 %v1071_v61, %v1071_v61  ;;  %v1089_v9 = vsub.f32 %v927_v32, %v987_v13 }
  0x6f   : > { %v287_v28 = vmul.f32 %v1077_v63, %v1077_v63  ;;  %v1095_v23 = vsub.f32 %v931_v34, %v987_v13  ;;  %v1101_v1 = vsub.f32 %v935_v36, %v987_v13  ;;  %v1107_v27 = vsub.f32 %v939_v38, %v987_v13 }
  0x70   : > { %v307_v39 = vadd.f32 %v306_v35, %v276_v31  ;;  %v288_v30 = vmul.f32 %v1083_v5, %v1083_v5  ;;  %v289_v32 = vmul.f32 %v1089_v9, %v1089_v9  ;;  %v1113_v6 = vsub.f32 %v943_v40, %v987_v13 }
  0x71   : > { %v290_v34 = vmul.f32 %v1095_v23, %v1095_v23  ;;  %v291_v36 = vmul.f32 %v1101_v1, %v1101_v1  ;;  %v1119_v35 = vsub.f32 %v947_v42, %v987_v13  ;;  %v292_v38 = vmul.f32 %v1107_v27, %v1107_v27 }
  0x72   : > { %v308_v43 = vadd.f32 %v307_v39, %v277_v8  ;;  %v1125_v39 = vsub.f32 %v951_v44, %v987_v13  ;;  %v293_v40 = vmul.f32 %v1113_v6, %v1113_v6 }
  0x73   : > { %v294_v42 = vmul.f32 %v1119_v35, %v1119_v35 }
  0x74   : > { %v309_v47 = vadd.f32 %v308_v43, %v278_v10  ;;  %v1131_v43 = vsub.f32 %v955_v46, %v987_v13  ;;  %v295_v44 = vmul.f32 %v1125_v39, %v1125_v39 }
  0x76   : > { %v310_v51 = vadd.f32 %v309_v47, %v279_v12  ;;  %v1137_v47 = vsub.f32 %v959_v48, %v987_v13  ;;  %v296_v46 = vmul.f32 %v1131_v43, %v1131_v43 }
  0x78   : > { %v311_v55 = vadd.f32 %v310_v51, %v280_v14  ;;  %v1143_v51 = vsub.f32 %v963_v50, %v987_v13  ;;  %v297_v48 = vmul.f32 %v1137_v47, %v1137_v47 }
  0x7a   : > { %v312_v59 = vadd.f32 %v311_v55, %v281_v16  ;;  %v1149_v55 = vsub.f32 %v967_v52, %v987_v13  ;;  %v298_v50 = vmul.f32 %v1143_v51, %v1143_v51 }
  0x7c   : > { %v313_v62 = vadd.f32 %v312_v59, %v282_v18  ;;  %v1155_v59 = vsub.f32 %v971_v54, %v987_v13  ;;  %v299_v52 = vmul.f32 %v1149_v55, %v1149_v55 }
  0x7e   : > { %v314_v3 = vadd.f32 %v313_v62, %v283_v20  ;;  %v1161_v62 = vsub.f32 %v975_v56, %v987_v13  ;;  %v300_v54 = vmul.f32 %v1155_v59, %v1155_v59 }
  0x80   : > { %v315_v7 = vadd.f32 %v314_v3, %v284_v22  ;;  %v1167_v3 = vsub.f32 %v979_v58, %v987_v13  ;;  %v301_v56 = vmul.f32 %v1161_v62, %v1161_v62 }
  0x82   : > { %v316_v11 = vadd.f32 %v315_v7, %v285_v24  ;;  %v1173_v7 = vsub.f32 %v983_v60, %v987_v13 }
  0x84   : > { %v317_v25 = vadd.f32 %v316_v11, %v286_v26  ;;  %v302_v11 = vmul.f32 %v1167_v3, %v1167_v3  ;;  %v303_v58 = vmul.f32 %v1173_v7, %v1173_v7 }
  0x86   : > { %v318_v4 = vadd.f32 %v317_v25, %v287_v28 }
  0x88   : > { %v319_v31 = vadd.f32 %v318_v4, %v288_v30 }
  0x8a   : > { %v320_v8 = vadd.f32 %v319_v31, %v289_v32 }
  0x8c   : > { %v321_v10 = vadd.f32 %v320_v8, %v290_v34 }
  0x8e   : > { %v322_v12 = vadd.f32 %v321_v10, %v291_v36 }
  0x90   : > { %v323_v14 = vadd.f32 %v322_v12, %v292_v38  ;;  %v1187_v12 = vld [vmem:[%s1411_s1] ss:$0 sm:$0xff] }
  0x92   : > { %v324_v16 = vadd.f32 %v323_v14, %v293_v40 }
  0x94   : > { %v325_v18 = vadd.f32 %v324_v16, %v294_v42 }
  0x96   : > { %v326_v20 = vadd.f32 %v325_v18, %v295_v44 }
  0x98   : > { %v327_v22 = vadd.f32 %v326_v20, %v296_v46  ;;  %v1200_v46 = vld [vmem:[%s1412_s2] ss:$0 sm:$0xff] }
  0x9a   : > { %v328_v24 = vadd.f32 %v327_v22, %v297_v48 }
  0x9c   : > { %v329_v26 = vadd.f32 %v328_v24, %v298_v50 }
  0x9e   : > { %v330_v28 = vadd.f32 %v329_v26, %v299_v52 }
  0xa0   : > { %v331_v30 = vadd.f32 %v330_v28, %v300_v54 }
  0xa2   : > { %v332_v25 = vadd.f32 %v331_v30, %v301_v56 }
  0xa4   : > { %v333_v32 = vadd.f32 %v332_v25, %v302_v11 }
  0xa6   : > { %v334_v4 = vadd.f32 %v333_v32, %v303_v58 }
  0xa8   : > { %v335_v34 = vrot.slane %v334_v4, 4 }
  0xaa   : > { %v336_v31 = vadd.f32 %v335_v34, %v334_v4 }
  0xac   : > { %v337_v36 = vrot.slane %v336_v31, 2 }
  0xae   : > { %v338_v60 = vadd.f32 %v337_v36, %v336_v31 }
  0xb0   : > { %v339_v13 = vrot.slane %v338_v60, 1 }
  0xb2   : > { %v340_v8 = vadd.f32 %v339_v13, %v338_v60 }
  0xb4   : > { %v341_v38 = vmul.f32 0.00390625, %v340_v8 }
  0xb6   : > { %v342_v10 = vadd.f32 1e-05, %v341_v38 }
  0xb8   : > { %715 = vrsqrt.f32 %v342_v10 }
  0xc2   : > { %v1181_v40 = vpop.eup %715 }
  0xc3   : > { %v344_v42 = vmul.f32 %v1181_v40, %v991_v15  ;;  %v345_v14 = vmul.f32 %v1181_v40, %v995_v17  ;;  %v346_v44 = vmul.f32 %v1181_v40, %v999_v19  ;;  %v347_v16 = vmul.f32 %v1181_v40, %v1003_v21 }
  0xc4   : > { %v348_v18 = vmul.f32 %v1181_v40, %v1011_v0  ;;  %v349_v15 = vmul.f32 %v1181_v40, %v1017_v2  ;;  %v350_v17 = vmul.f32 %v1181_v40, %v1023_v29  ;;  %v351_v19 = vmul.f32 %v1181_v40, %v1029_v33 }
  0xc5   : > { %v383_v21 = vmul.f32 %v1187_v12, %v344_v42  ;;  %v384_v48 = vmul.f32 %v1187_v12, %v345_v14  ;;  %v385_v20 = vmul.f32 %v1187_v12, %v346_v44  ;;  %v386_v50 = vmul.f32 %v1187_v12, %v347_v16 }
  0xc6   : > { %v387_v0 = vmul.f32 %v1187_v12, %v348_v18  ;;  %v388_v2 = vmul.f32 %v1187_v12, %v349_v15  ;;  %v389_v22 = vmul.f32 %v1187_v12, %v350_v17  ;;  %v390_v29 = vmul.f32 %v1187_v12, %v351_v19 }
  0xc7   : > { %v422_v33 = vadd.f32 %v1200_v46, %v383_v21  ;;  %v423_v52 = vadd.f32 %v1200_v46, %v384_v48  ;;  %v424_v24 = vadd.f32 %v1200_v46, %v385_v20  ;;  %v425_v54 = vadd.f32 %v1200_v46, %v386_v50 }
  0xc8   : > { %v426_v26 = vadd.f32 %v1200_v46, %v387_v0  ;;  %v427_v56 = vadd.f32 %v1200_v46, %v388_v2  ;;  %v428_v28 = vadd.f32 %v1200_v46, %v389_v22  ;;  %v429_v11 = vadd.f32 %v1200_v46, %v390_v29 }
  0xc9   : > { %vm454_vm0 = vcmp.ge.f32.partialorder %v422_v33, 0.0  ;;  %v486_v30 = vmul.f32 0.01, %v422_v33  ;;  %vm455_vm1 = vcmp.ge.f32.partialorder %v423_v52, 0.0  ;;  %v487_v58 = vmul.f32 0.01, %v423_v52 }
  0xca   : > { %vm456_vm2 = vcmp.ge.f32.partialorder %v424_v24, 0.0  ;;  %v488_v25 = vmul.f32 0.01, %v424_v24  ;;  %vm457_vm3 = vcmp.ge.f32.partialorder %v425_v54, 0.0  ;;  %v489_v32 = vmul.f32 0.01, %v425_v54 }
  0xcb   : > { %v518_v4 = vsel %vm454_vm0, %v422_v33, %v486_v30  ;;  %v519_v34 = vsel %vm455_vm1, %v423_v52, %v487_v58  ;;  %vm458_vm4 = vcmp.ge.f32.partialorder %v426_v26, 0.0  ;;  %v490_v31 = vmul.f32 0.01, %v426_v26 }
  0xcc   : > { %550 = vst [vmem:[%s1228_s8] sm:$0xff] %v518_v4  ;;  %551 = vst [vmem:[%s1228_s8 + $0x8] sm:$0xff] %v519_v34  ;;  %v520_v36 = vsel %vm456_vm2, %v424_v24, %v488_v25  ;;  %v521_v60 = vsel %vm457_vm3, %v425_v54, %v489_v32  ;;  %vm459_vm5 = vcmp.ge.f32.partialorder %v427_v56, 0.0  ;;  %v491_v13 = vmul.f32 0.01, %v427_v56 }
  0xcd   : > { %552 = vst [vmem:[%s1228_s8 + $0x10] sm:$0xff] %v520_v36  ;;  %553 = vst [vmem:[%s1228_s8 + $0x18] sm:$0xff] %v521_v60  ;;  %v522_v8 = vsel %vm458_vm4, %v426_v26, %v490_v31  ;;  %vm460_vm6 = vcmp.ge.f32.partialorder %v428_v28, 0.0  ;;  %v492_v38 = vmul.f32 0.01, %v428_v28  ;;  %vm461_vm7 = vcmp.ge.f32.partialorder %v429_v11, 0.0 }
  0xce   : > { %554 = vst [vmem:[%s1228_s8 + $0x20] sm:$0xff] %v522_v8  ;;  %v523_v10 = vsel %vm459_vm5, %v427_v56, %v491_v13  ;;  %v493_v42 = vmul.f32 0.01, %v429_v11  ;;  %v352_v14 = vmul.f32 %v1181_v40, %v1035_v37  ;;  %v353_v44 = vmul.f32 %v1181_v40, %v1041_v41 }
  0xcf   : > { %555 = vst [vmem:[%s1228_s8 + $0x28] sm:$0xff] %v523_v10  ;;  %v524_v16 = vsel %vm460_vm6, %v428_v28, %v492_v38  ;;  %v354_v18 = vmul.f32 %v1181_v40, %v1047_v45  ;;  %v355_v15 = vmul.f32 %v1181_v40, %v1053_v49  ;;  %v356_v17 = vmul.f32 %v1181_v40, %v1059_v53 }
  0xd0   : > { %556 = vst [vmem:[%s1228_s8 + $0x30] sm:$0xff] %v524_v16  ;;  %v525_v19 = vsel %vm461_vm7, %v429_v11, %v493_v42  ;;  %v391_v21 = vmul.f32 %v1187_v12, %v352_v14  ;;  %v392_v37 = vmul.f32 %v1187_v12, %v353_v44  ;;  %v357_v41 = vmul.f32 %v1181_v40, %v1065_v57 }
  0xd1   : > { %557 = vst [vmem:[%s1228_s8 + $0x38] sm:$0xff] %v525_v19  ;;  %v393_v48 = vmul.f32 %v1187_v12, %v354_v18  ;;  %v394_v45 = vmul.f32 %v1187_v12, %v355_v15  ;;  %v395_v20 = vmul.f32 %v1187_v12, %v356_v17  ;;  %v358_v49 = vmul.f32 %v1181_v40, %v1071_v61 }
  0xd2   : > { %v430_v53 = vadd.f32 %v1200_v46, %v391_v21  ;;  %v431_v50 = vadd.f32 %v1200_v46, %v392_v37  ;;  %v396_v0 = vmul.f32 %v1187_v12, %v357_v41  ;;  %v359_v2 = vmul.f32 %v1181_v40, %v1077_v63 }
  0xd3   : > { %v432_v57 = vadd.f32 %v1200_v46, %v393_v48  ;;  %v433_v22 = vadd.f32 %v1200_v46, %v394_v45  ;;  %v434_v29 = vadd.f32 %v1200_v46, %v395_v20  ;;  %v397_v33 = vmul.f32 %v1187_v12, %v358_v49 }
  0xd4   : > { %vm462_vm8 = vcmp.ge.f32.partialorder %v430_v53, 0.0  ;;  %v494_v61 = vmul.f32 0.01, %v430_v53  ;;  %vm463_vm9 = vcmp.ge.f32.partialorder %v431_v50, 0.0  ;;  %v495_v52 = vmul.f32 0.01, %v431_v50 }
  0xd5   : > { %vm464_vm10 = vcmp.ge.f32.partialorder %v432_v57, 0.0  ;;  %v496_v24 = vmul.f32 0.01, %v432_v57  ;;  %vm465_vm11 = vcmp.ge.f32.partialorder %v433_v22, 0.0  ;;  %v497_v63 = vmul.f32 0.01, %v433_v22 }
  0xd6   : > { %v526_v54 = vsel %vm462_vm8, %v430_v53, %v494_v61  ;;  %v527_v26 = vsel %vm463_vm9, %v431_v50, %v495_v52  ;;  %vm466_vm12 = vcmp.ge.f32.partialorder %v434_v29, 0.0  ;;  %v498_v56 = vmul.f32 0.01, %v434_v29 }
  0xd7   : > { %558 = vst [vmem:[%s1228_s8 + $0x40] sm:$0xff] %v526_v54  ;;  %559 = vst [vmem:[%s1228_s8 + $0x48] sm:$0xff] %v527_v26  ;;  %v528_v28 = vsel %vm464_vm10, %v432_v57, %v496_v24  ;;  %v529_v11 = vsel %vm465_vm11, %v433_v22, %v497_v63  ;;  %v435_v30 = vadd.f32 %v1200_v46, %v396_v0 }
  0xd8   : > { %v436_v58 = vadd.f32 %v1200_v46, %v397_v33  ;;  %560 = vst [vmem:[%s1228_s8 + $0x50] sm:$0xff] %v528_v28  ;;  %561 = vst [vmem:[%s1228_s8 + $0x58] sm:$0xff] %v529_v11  ;;  %v530_v25 = vsel %vm466_vm12, %v434_v29, %v498_v56  ;;  %v398_v32 = vmul.f32 %v1187_v12, %v359_v2 }
  0xd9   : > { %v360_v4 = vmul.f32 %v1181_v40, %v1083_v5  ;;  %v361_v34 = vmul.f32 %v1181_v40, %v1089_v9  ;;  %562 = vst [vmem:[%s1228_s8 + $0x60] sm:$0xff] %v530_v25  ;;  %vm467_vm13 = vcmp.ge.f32.partialorder %v435_v30, 0.0  ;;  %v499_v31 = vmul.f32 0.01, %v435_v30 }
  0xda   : > { %vm468_vm14 = vcmp.ge.f32.partialorder %v436_v58, 0.0  ;;  %v500_v36 = vmul.f32 0.01, %v436_v58  ;;  %v437_v60 = vadd.f32 %v1200_v46, %v398_v32  ;;  %v362_v38 = vmul.f32 %v1181_v40, %v1095_v23 }
  0xdb   : > { %v399_v13 = vmul.f32 %v1187_v12, %v360_v4  ;;  %v400_v8 = vmul.f32 %v1187_v12, %v361_v34  ;;  %v531_v10 = vsel %vm467_vm13, %v435_v30, %v499_v31  ;;  %v363_v42 = vmul.f32 %v1181_v40, %v1101_v1 }
  0xdc   : > { %v532_v5 = vsel %vm468_vm14, %v436_v58, %v500_v36  ;;  %v364_v9 = vmul.f32 %v1181_v40, %v1107_v27  ;;  %563 = vst [vmem:[%s1228_s8 + $0x68] sm:$0xff] %v531_v10  ;;  %vm469_vm15 = vcmp.ge.f32.partialorder %v437_v60, 0.0  ;;  %v501_v14 = vmul.f32 0.01, %v437_v60 }
  0xdd   : > { %564 = vst [vmem:[%s1228_s8 + $0x70] sm:$0xff] %v532_v5  ;;  %v438_v44 = vadd.f32 %v1200_v46, %v399_v13  ;;  %v439_v16 = vadd.f32 %v1200_v46, %v400_v8  ;;  %v401_v18 = vmul.f32 %v1187_v12, %v362_v38  ;;  %v402_v23 = vmul.f32 %v1187_v12, %v363_v42 }
  0xde   : > { %v403_v15 = vmul.f32 %v1187_v12, %v364_v9  ;;  %v365_v1 = vmul.f32 %v1181_v40, %v1113_v6  ;;  %v533_v17 = vsel %vm469_vm15, %v437_v60, %v501_v14  ;;  %v366_v20 = vmul.f32 %v1181_v40, %v1119_v35 }
  0xdf   : > { %vm470_vm0 = vcmp.ge.f32.partialorder %v438_v44, 0.0  ;;  %v502_v27 = vmul.f32 0.01, %v438_v44  ;;  %vm471_vm1 = vcmp.ge.f32.partialorder %v439_v16, 0.0  ;;  %565 = vst [vmem:[%s1228_s8 + $0x78] sm:$0xff] %v533_v17  ;;  %v440_v21 = vadd.f32 %v1200_v46, %v401_v18 }
  0xe0   : > { %v503_v19 = vmul.f32 0.01, %v439_v16  ;;  %v441_v37 = vadd.f32 %v1200_v46, %v402_v23  ;;  %v442_v41 = vadd.f32 %v1200_v46, %v403_v15  ;;  %v404_v45 = vmul.f32 %v1187_v12, %v365_v1 }
  0xe1   : > { %v534_v48 = vsel %vm470_vm0, %v438_v44, %v502_v27  ;;  %v367_v6 = vmul.f32 %v1181_v40, %v1125_v39  ;;  %vm472_vm2 = vcmp.ge.f32.partialorder %v440_v21, 0.0  ;;  %v504_v53 = vmul.f32 0.01, %v440_v21 }
  0xe2   : > { %566 = vst [vmem:[%s1228_s8 + $0x80] sm:$0xff] %v534_v48  ;;  %v535_v49 = vsel %vm471_vm1, %v439_v16, %v503_v19  ;;  %vm473_vm3 = vcmp.ge.f32.partialorder %v441_v37, 0.0  ;;  %v505_v50 = vmul.f32 0.01, %v441_v37  ;;  %vm474_vm4 = vcmp.ge.f32.partialorder %v442_v41, 0.0 }
  0xe3   : > { %567 = vst [vmem:[%s1228_s8 + $0x88] sm:$0xff] %v535_v49  ;;  %v506_v0 = vmul.f32 0.01, %v442_v41  ;;  %v443_v2 = vadd.f32 %v1200_v46, %v404_v45  ;;  %v536_v57 = vsel %vm472_vm2, %v440_v21, %v504_v53  ;;  %v405_v35 = vmul.f32 %v1187_v12, %v366_v20 }
  0xe4   : > { %v406_v22 = vmul.f32 %v1187_v12, %v367_v6  ;;  %v368_v39 = vmul.f32 %v1181_v40, %v1131_v43  ;;  %568 = vst [vmem:[%s1228_s8 + $0x90] sm:$0xff] %v536_v57  ;;  %v537_v29 = vsel %vm473_vm3, %v441_v37, %v505_v50  ;;  %v369_v54 = vmul.f32 %v1181_v40, %v1137_v47 }
  0xe5   : > { %v538_v33 = vsel %vm474_vm4, %v442_v41, %v506_v0  ;;  %vm475_vm5 = vcmp.ge.f32.partialorder %v443_v2, 0.0  ;;  %v507_v61 = vmul.f32 0.01, %v443_v2  ;;  %569 = vst [vmem:[%s1228_s8 + $0x98] sm:$0xff] %v537_v29  ;;  %v444_v52 = vadd.f32 %v1200_v46, %v405_v35 }
  0xe6   : > { %570 = vst [vmem:[%s1228_s8 + $0xa0] sm:$0xff] %v538_v33  ;;  %v445_v24 = vadd.f32 %v1200_v46, %v406_v22  ;;  %v407_v63 = vmul.f32 %v1187_v12, %v368_v39  ;;  %v370_v43 = vmul.f32 %v1181_v40, %v1143_v51  ;;  %v371_v56 = vmul.f32 %v1181_v40, %v1149_v55 }
  0xe7   : > { %v539_v26 = vsel %vm475_vm5, %v443_v2, %v507_v61  ;;  %v372_v28 = vmul.f32 %v1181_v40, %v1155_v59  ;;  %vm476_vm6 = vcmp.ge.f32.partialorder %v444_v52, 0.0  ;;  %v508_v11 = vmul.f32 0.01, %v444_v52 }
  0xe8   : > { %571 = vst [vmem:[%s1228_s8 + $0xa8] sm:$0xff] %v539_v26  ;;  %vm477_vm7 = vcmp.ge.f32.partialorder %v445_v24, 0.0  ;;  %v509_v30 = vmul.f32 0.01, %v445_v24  ;;  %v446_v58 = vadd.f32 %v1200_v46, %v407_v63  ;;  %v408_v47 = vmul.f32 %v1187_v12, %v369_v54 }
  0xe9   : > { %v409_v25 = vmul.f32 %v1187_v12, %v370_v43  ;;  %v410_v51 = vmul.f32 %v1187_v12, %v371_v56  ;;  %v540_v32 = vsel %vm476_vm6, %v444_v52, %v508_v11  ;;  %v411_v55 = vmul.f32 %v1187_v12, %v372_v28 }
  0xea   : > { %v541_v4 = vsel %vm477_vm7, %v445_v24, %v509_v30  ;;  %v373_v59 = vmul.f32 %v1181_v40, %v1161_v62  ;;  %572 = vst [vmem:[%s1228_s8 + $0xb0] sm:$0xff] %v540_v32  ;;  %vm478_vm8 = vcmp.ge.f32.partialorder %v446_v58, 0.0  ;;  %v510_v34 = vmul.f32 0.01, %v446_v58 }
  0xeb   : > { %573 = vst [vmem:[%s1228_s8 + $0xb8] sm:$0xff] %v541_v4  ;;  %v447_v31 = vadd.f32 %v1200_v46, %v408_v47  ;;  %v448_v36 = vadd.f32 %v1200_v46, %v409_v25  ;;  %v449_v60 = vadd.f32 %v1200_v46, %v410_v51  ;;  %v450_v13 = vadd.f32 %v1200_v46, %v411_v55 }
  0xec   : > { %v412_v8 = vmul.f32 %v1187_v12, %v373_v59  ;;  %v374_v38 = vmul.f32 %v1181_v40, %v1167_v3  ;;  %v542_v10 = vsel %vm478_vm8, %v446_v58, %v510_v34  ;;  %v375_v23 = vmul.f32 %v1181_v40, %v1173_v7 }
  0xed   : > { %vm479_vm9 = vcmp.ge.f32.partialorder %v447_v31, 0.0  ;;  %v511_v62 = vmul.f32 0.01, %v447_v31  ;;  %vm480_vm10 = vcmp.ge.f32.partialorder %v448_v36, 0.0  ;;  %574 = vst [vmem:[%s1228_s8 + $0xc0] sm:$0xff] %v542_v10  ;;  %vm481_vm11 = vcmp.ge.f32.partialorder %v449_v60, 0.0 }
  0xee   : > { %v512_v5 = vmul.f32 0.01, %v448_v36  ;;  %v513_v42 = vmul.f32 0.01, %v449_v60  ;;  %vm482_vm12 = vcmp.ge.f32.partialorder %v450_v13, 0.0  ;;  %v451_v44 = vadd.f32 %v1200_v46, %v412_v8 }
  0xef   : > { %v543_v9 = vsel %vm479_vm9, %v447_v31, %v511_v62  ;;  %v514_v14 = vmul.f32 0.01, %v450_v13  ;;  %v413_v16 = vmul.f32 %v1187_v12, %v374_v38  ;;  %v414_v27 = vmul.f32 %v1187_v12, %v375_v23 }
  0xf0   : > { %575 = vst [vmem:[%s1228_s8 + $0xc8] sm:$0xff] %v543_v9  ;;  %v544_v3 = vsel %vm480_vm10, %v448_v36, %v512_v5  ;;  %v545_v18 = vsel %vm481_vm11, %v449_v60, %v513_v42  ;;  %vm483_vm13 = vcmp.ge.f32.partialorder %v451_v44, 0.0  ;;  %v515_v1 = vmul.f32 0.01, %v451_v44 }
  0xf1   : > { %576 = vst [vmem:[%s1228_s8 + $0xd0] sm:$0xff] %v544_v3  ;;  %577 = vst [vmem:[%s1228_s8 + $0xd8] sm:$0xff] %v545_v18  ;;  %v546_v15 = vsel %vm482_vm12, %v450_v13, %v514_v14  ;;  %v452_v17 = vadd.f32 %v1200_v46, %v413_v16  ;;  %v453_v7 = vadd.f32 %v1200_v46, %v414_v27 }
  0xf2   : > { %578 = vst [vmem:[%s1228_s8 + $0xe0] sm:$0xff] %v546_v15  ;;  %v547_v19 = vsel %vm483_vm13, %v451_v44, %v515_v1 }
  0xf3   : > { %vm484_vm14 = vcmp.ge.f32.partialorder %v452_v17, 0.0  ;;  %v516_v21 = vmul.f32 0.01, %v452_v17  ;;  %579 = vst [vmem:[%s1228_s8 + $0xe8] sm:$0xff] %v547_v19  ;;  %vm485_vm15 = vcmp.ge.f32.partialorder %v453_v7, 0.0 }
  0xf4   : > { %v517_v37 = vmul.f32 0.01, %v453_v7 }
  0xf5   : > { %v548_v40 = vsel %vm484_vm14, %v452_v17, %v516_v21 }
  0xf6   : > { %580 = vst [vmem:[%s1228_s8 + $0xf0] sm:$0xff] %v548_v40  ;;  %v549_v12 = vsel %vm485_vm15, %v453_v7, %v517_v37 }
  0xf7   : > { %581 = vst [vmem:[%s1228_s8 + $0xf8] sm:$0xff] %v549_v12 }
  0xf8   : > { %730 = shalt.err (!%p727_p3)
}
  0xf9   : > { %s731_s27 = scalar_lea.hbm %s1362_s19, 4096  ;;  %s735_s30 = scalar_lea.hbm %s1413_s3, 8192 }
  0xfa   : > { %p732_p4 = scmp.ne.s32.totalorder %s1362_s19, %s731_s27  ;;  %p736_p9 = scmp.lt.u32.totalorder %s1362_s19, %s1413_s3 }
  0xfb   : > { %p737_p10 = scmp.lt.u32.totalorder %s735_s30, %s731_s27  ;;  %p739_p12 = scmp.lt.u32.totalorder %s731_s27, %s1362_s19 }
  0xfc   : > { %p733_p7 = pnand %p732_p4, %p842_p5 }
  0xfd   : > { %p738_p11 = por %p737_p10, %p736_p9 }
  0xfe   : > { %p734_p8 = pneg %p733_p7 }
  0xff   : > { %p740_p13 = por %p739_p12, %p738_p11 }
 0x101   : > { %p741_p0 = pnand %p740_p13, %p734_p8 }
 0x103   : > { %744 = shalt.err (!%p741_p0)
}
 0x104   : > { %s782_s6 = smov 128   ;;  %s783_s7 = smov 8  }
 0x105   : > { %674 = dma.vmem_to_hbm [thread:$0]  (%p842_p5), %s1364_s10, 4096, %s1362_s19, %s1369_s16, %s782_s6, %s782_s6, %s783_s7  }
 0x106 PF: > { %p680_p1 = scmp.ge.s32.totalorder %s779_s15, 2  ;;  %s611_s8 = sand.u32 1, %s767_s12  }
 0x107   : > { %s612_s9 = scalar_lea.sflag [#allocation3], %s611_s8 }
 0x108   : > { %p677_p2 = pnand %p680_p1, %p846_p6 }
 0x10a   : > { %762 = dma.done.wait (!%p677_p2), %s612_s9, 4096  }
 0x10b   : > { %764 = vsyncadd (!%p677_p2), %s612_s9, 4294963200  ;;  %p13_p3 = scmp.ge.s32.totalorder %s829_s18, 4   ;;  %s1416_s12 = smov %s771_s13 }
 0x10c   : > { %s1417_s13 = smov %s775_s14  ;;  %s1418_s14 = smov %s840_s21 }
 0x10d   : > { %s1419_s15 = smov %s829_s18  ;;  %15 = sbr.rel (!%p13_p3) target bundleno = 3 (0x3), region = 67 }
 0x114   :  { %617 = vsyncpa [#allocation3], 1 }
 0x115   :  { %619 = vsyncpa [#allocation3 + $0x1], 1 }

</bundles_post_ra>
